<compile_context>
chip_gen: v5e
topology: v5e:2x2
jax: 0.10.0
libtpu: 0.0.40
codegen_flags: <defaults>
</compile_context>

<pallas_src>
import functools

import jax
import jax.numpy as jnp
import numpy as np
from jax.experimental import pallas as pl
from jax.experimental.pallas import tpu as pltpu

LANE = 128
SUBLANE = 8


def _round_up(x, m):
    return ((x + m - 1) // m) * m


# ------------------------------- Pallas kernel --------------------------------

def _chebykan_fused_kernel(x_ref, *refs, degree, num_layers, emit_intermediates):
    """All ChebyKAN layers for one batch tile.

    x_ref:   (TB, I0_pad) f32
    refs:    [c_0, b_0, ..., c_{L-1}, b_{L-1},  y_0..y_{n_out-1},  feats_scratch]
      c_l:   (degree*Ipad_l, Opad_l)  matmul dtype (degrees 1..D stacked along K)
      b_l:   (1, Opad_l)              f32 (T_0 contribution: sum_i coeffs[i,o,0])
      y_*:   (TB, Opad)               f32 (all layers, or just the final one)
      feats_scratch: (TB, max_K)      matmul dtype, reused by every layer
    """
    n_out = num_layers if emit_intermediates else 1
    coeff_refs = refs[0:2 * num_layers:2]
    bias_refs = refs[1:2 * num_layers:2]
    out_refs = refs[2 * num_layers:2 * num_layers + n_out]
    feats_ref = refs[2 * num_layers + n_out]
    mm_dtype = feats_ref.dtype

    act = x_ref[...]                                           # (TB, I0_pad) f32
    for l in range(num_layers):
        i_pad = act.shape[-1]
        t = jnp.tanh(act)                                      # f32

        # Chebyshev recurrence T_1..T_degree kept in f32 registers; each T_d is stored
        # (cast to the matmul dtype) into its lane-aligned slice of the shared slab.
        # No poly list, no concatenate, no full-tensor cast copy.
        feats_ref[:, 0:i_pad] = t.astype(mm_dtype)
        t_prev2, t_prev1 = 1.0, t
        for d in range(2, degree + 1):
            t_cur = 2.0 * t * t_prev1 - t_prev2
            feats_ref[:, (d - 1) * i_pad:d * i_pad] = t_cur.astype(mm_dtype)
            t_prev2, t_prev1 = t_prev1, t_cur

        k_l = degree * i_pad
        # Padded lanes of the slab are NOT zero; the matching coefficient rows are.
        acc = jnp.dot(feats_ref[:, 0:k_l], coeff_refs[l][...],
                      preferred_element_type=jnp.float32)      # (TB, O_pad) f32
        acc = acc + bias_refs[l][...]                          # broadcast (1, O_pad)

        if l == num_layers - 1:
            acc = jnp.maximum(acc, 0.0)                        # act2 = ReLU on output layer
            out_refs[-1][...] = acc
        elif emit_intermediates:
            out_refs[l][...] = acc
        act = acc


# ------------------------------ parameter packing ------------------------------

def init_chebykan_raw_params(key, layer_sizes, output_size, degree):
    """Xavier-normal init matching torch parameter shapes (I, O, degree+1), f32."""
    dims = list(zip(layer_sizes[:-1], layer_sizes[1:])) + [(layer_sizes[-1], output_size)]
    keys = jax.random.split(key, len(dims))
    raw = []
    for k, (i_dim, o_dim) in zip(keys, dims):
        rf = degree + 1
        fan_in, fan_out = o_dim * rf, i_dim * rf               # torch xavier_normal_ on 3-D
        std = float(np.sqrt(2.0 / (fan_in + fan_out)))
        raw.append(jax.random.normal(k, (i_dim, o_dim, degree + 1), jnp.float32) * std)
    return raw


def pack_chebykan_params(raw_params, *, matmul_dtype=jnp.bfloat16):
    """One-time layout transform (done at init time, NOT per forward).

    For each layer coeffs (I, O, D+1):
      bias[o]                    = sum_i coeffs[i, o, 0]          (T_0 == 1 term)
      packed[(d-1)*I_pad + i, o] = coeffs[i, o, d],  d = 1..D
    I_pad, O_pad are multiples of 128 (zero-padded rows/cols contribute 0).
    """
    # TODO(synk): optional fp8 (e4m3) weight storage for the v7x MXU, with a per-layer
    # scale folded into bias/output; accuracy must be re-validated.
    packed = []
    for c in raw_params:
        I, O, D1 = c.shape
        degree = D1 - 1
        assert degree >= 1, "degree must be >= 1"
        i_pad = _round_up(I, LANE)
        o_pad = _round_up(O, LANE)
        bias = jnp.zeros((1, o_pad), jnp.float32).at[0, :O].set(jnp.sum(c[:, :, 0], axis=0))
        w = jnp.transpose(c[:, :, 1:], (2, 0, 1))              # (D, I, O)
        w = jnp.pad(w, ((0, 0), (0, i_pad - I), (0, o_pad - O)))
        w = w.reshape(degree * i_pad, o_pad).astype(matmul_dtype)
        packed.append(dict(coeffs=w, bias=bias, in_dim=I, out_dim=O,
                           in_pad=i_pad, out_pad=o_pad, degree=degree))
    return packed


# ------------------------- generation-aware tile sizing -------------------------

def _vmem_budget_bytes():
    """~3/4 of physical per-core VMEM: ~48 MiB on v7x (64 MiB/TC), 96 MiB on v5e/v6e."""
    cap = 64 << 20                                             # safe default (v7x-sized)
    try:
        cap = int(pltpu.get_tpu_info().vmem_capacity_bytes)
    except Exception:
        pass
    return max(32 << 20, min(cap * 3 // 4, 96 << 20))


def _default_block_b(B, packed_params, matmul_bytes, vmem_budget, emit_intermediates):
    max_k = max(p['degree'] * p['in_pad'] for p in packed_params)
    max_ipad = max(p['in_pad'] for p in packed_params)
    weight_bytes = sum(p['coeffs'].size * matmul_bytes + p['bias'].size * 4
                       for p in packed_params)
    out_params = packed_params if emit_intermediates else packed_params[-1:]
    # Per-batch-row VMEM: double-buffered input + double-buffered outputs + feats slab
    # + live f32 recurrence values.
    per_row = 2 * packed_params[0]['in_pad'] * 4
    per_row += sum(2 * p['out_pad'] * 4 for p in out_params)
    per_row += max_k * matmul_bytes
    per_row += 4 * max_ipad * 4
    avail = max(vmem_budget - weight_bytes, SUBLANE * per_row)
    cap = max(SUBLANE, min(512, (avail // per_row) // SUBLANE * SUBLANE))
    if B <= SUBLANE:
        return SUBLANE
    # >= 2 grid steps so the "parallel" batch axis can shard across v7x's two TensorCores;
    # cap at 256 rows (fills 256-wide MXUs, amortizes per-step weight push).
    want = _round_up(max(SUBLANE, -(-B // 2)), SUBLANE)
    return int(min(cap, want, 256))


# --------------------------------- forward ------------------------------------

def chebykan_forward(x, packed_params, *, block_b=None, return_intermediates=True,
                     interpret=False):
    """Replicates ChebyKAN.forward.

    Returns (final_relu_output, per_layer_outputs). If return_intermediates=False, only
    the final layer is emitted (no intermediate HBM writeback) and the list has length 1.
    """
    num_layers = len(packed_params)
    degree = packed_params[0]['degree']
    assert all(p['degree'] == degree for p in packed_params)

    matmul_dtype = packed_params[0]['coeffs'].dtype
    matmul_bytes = jnp.dtype(matmul_dtype).itemsize

    B, I0 = x.shape
    assert I0 == packed_params[0]['in_dim']
    I0_pad = packed_params[0]['in_pad']

    vmem_budget = _vmem_budget_bytes()
    if block_b is None:
        block_b = _default_block_b(B, packed_params, matmul_bytes, vmem_budget,
                                   return_intermediates)
    block_b = max(SUBLANE, _round_up(block_b, SUBLANE))
    B_pad = _round_up(B, block_b)

    # jnp.pad fuses better than zeros+scatter. Padded feature lanes hit zero coefficient
    # rows; padded batch rows are sliced off at the end.
    xp = jnp.pad(x.astype(jnp.float32), ((0, B_pad - B), (0, I0_pad - I0)))

    max_k = max(p['degree'] * p['in_pad'] for p in packed_params)
    out_params = packed_params if return_intermediates else packed_params[-1:]

    args = [xp]
    for p in packed_params:
        args.append(p['coeffs'])
        args.append(p['bias'])

    out_shape = tuple(jax.ShapeDtypeStruct((B_pad, p['out_pad']), jnp.float32)
                      for p in out_params)

    kernel = functools.partial(_chebykan_fused_kernel, degree=degree,
                               num_layers=num_layers,
                               emit_intermediates=return_intermediates)

    # Advisory cost estimate for XLA's scheduler around this large fused custom call.
    flops = 2 * B_pad * sum(p['degree'] * p['in_pad'] * p['out_pad'] for p in packed_params)
    flops += 3 * B_pad * sum((p['degree'] - 1) * p['in_pad'] for p in packed_params)
    transcendentals = B_pad * sum(p['in_pad'] for p in packed_params)
    bytes_accessed = (xp.size * 4
                      + sum(p['coeffs'].size * matmul_bytes + p['bias'].size * 4
                            for p in packed_params)
                      + sum(B_pad * p['out_pad'] * 4 for p in out_params))
    cost = pl.CostEstimate(flops=int(flops), transcendentals=int(transcendentals),
                           bytes_accessed=int(bytes_accessed))

    def build_in_specs(weight_pipeline_mode):
        in_specs = [pl.BlockSpec((block_b, I0_pad), lambda b: (b, 0))]
        for p in packed_params:
            K, o_pad = p['coeffs'].shape
            if weight_pipeline_mode is None:
                in_specs.append(pl.BlockSpec((K, o_pad), lambda b: (0, 0)))
                in_specs.append(pl.BlockSpec((1, o_pad), lambda b: (0, 0)))
            else:
                # Grid-invariant blocks -> single-buffer them to halve resident VMEM.
                in_specs.append(pl.BlockSpec((K, o_pad), lambda b: (0, 0),
                                             pipeline_mode=weight_pipeline_mode))
                in_specs.append(pl.BlockSpec((1, o_pad), lambda b: (0, 0),
                                             pipeline_mode=weight_pipeline_mode))
        return in_specs

    out_specs = tuple(pl.BlockSpec((block_b, p['out_pad']), lambda b: (b, 0))
                      for p in out_params)

    def run(weight_pipeline_mode):
        return pl.pallas_call(
            kernel,
            grid=(B_pad // block_b,),
            in_specs=build_in_specs(weight_pipeline_mode),
            out_specs=out_specs,
            out_shape=out_shape,
            scratch_shapes=[pltpu.VMEM((block_b, max_k), matmul_dtype)],
            compiler_params=pltpu.CompilerParams(
                dimension_semantics=("parallel",),             # megacore-shard batch (v7x)
                vmem_limit_bytes=int(vmem_budget)),
            cost_estimate=cost,
            interpret=interpret,
        )(*args)

    try:
        outs = run(pl.Buffered(1))          # single-buffered resident weights/biases
    except Exception:
        outs = run(None)                    # defensive fallback: default double-buffering

    outs = [o[:B, :p['out_dim']] for o, p in zip(outs, out_params)]
    # module(x.detach()) == module(x) numerically -> list entries equal running activations.
    return outs[-1], outs


# ----------------------------- pure-JAX reference ------------------------------

def _layer_ref(x, coeffs):
    degree = coeffs.shape[-1] - 1
    t = jnp.tanh(x)
    theta = jnp.arccos(t)[..., None]
    d = jnp.arange(degree + 1, dtype=jnp.float32)
    feats = jnp.cos(theta * d)
    return jnp.einsum("bid,iod->bo", feats, coeffs)


def chebykan_forward_ref(x, raw_params):
    outs = []
    for c in raw_params[:-1]:
        x = _layer_ref(x, c)
        outs.append(x)
    x = jnp.maximum(_layer_ref(x, raw_params[-1]), 0.0)
    outs.append(x)
    return x, outs


# ----------------------------------- main --------------------------------------

if __name__ == "__main__":
    degree = 4
    layer_sizes = [32, 64, 32, 32]      # small shapes (module default is [784, 256, 128, 128])
    output_size = 10
    batch = 16

    key = jax.random.PRNGKey(0)
    k_x, k_w = jax.random.split(key)
    x = jax.random.normal(k_x, (batch, layer_sizes[0]), dtype=jnp.float32)
    raw = init_chebykan_raw_params(k_w, layer_sizes, output_size, degree)

    y_ref, outs_ref = chebykan_forward_ref(x, raw)

    # f32 matmul path with per-layer outputs: tight check against the cos/acos reference.
    packed_f32 = pack_chebykan_params(raw, matmul_dtype=jnp.float32)
    y32, outs32 = chebykan_forward(x, packed_f32, return_intermediates=True)
    y32 = jax.block_until_ready(y32)
    outs32 = [jax.block_until_ready(o) for o in outs32]
    np.testing.assert_allclose(np.asarray(y32), np.asarray(y_ref), rtol=1e-3, atol=1e-3)
    for o, o_ref in zip(outs32, outs_ref):
        np.testing.assert_allclose(np.asarray(o), np.asarray(o_ref), rtol=1e-3, atol=1e-3)

    # bf16-operand fast path (f32 accumulate), final output only (no intermediate writeback).
    packed_bf16 = pack_chebykan_params(raw, matmul_dtype=jnp.bfloat16)
    y16, _ = chebykan_forward(x, packed_bf16, return_intermediates=False)
    y16 = jax.block_until_ready(y16)
    np.testing.assert_allclose(np.asarray(y16), np.asarray(y_ref), rtol=5e-2, atol=5e-2)

    print("KERNEL_OK")
</pallas_src>

<mosaic_0001>
module attributes {stable_mosaic.version = 11 : i64} {
  func.func @_chebykan_fused_kernel(%arg0: i32, %arg1: memref<8x128xf32, #tpu.memory_space<vmem>>, %arg2: memref<512x128xf32, #tpu.memory_space<vmem>>, %arg3: memref<1x128xf32, #tpu.memory_space<vmem>>, %arg4: memref<512x128xf32, #tpu.memory_space<vmem>>, %arg5: memref<1x128xf32, #tpu.memory_space<vmem>>, %arg6: memref<512x128xf32, #tpu.memory_space<vmem>>, %arg7: memref<1x128xf32, #tpu.memory_space<vmem>>, %arg8: memref<512x128xf32, #tpu.memory_space<vmem>>, %arg9: memref<1x128xf32, #tpu.memory_space<vmem>>, %arg10: memref<8x128xf32, #tpu.memory_space<vmem>>, %arg11: memref<8x128xf32, #tpu.memory_space<vmem>>, %arg12: memref<8x128xf32, #tpu.memory_space<vmem>>, %arg13: memref<8x128xf32, #tpu.memory_space<vmem>>, %arg14: memref<8x512xf32, #tpu.memory_space<vmem>>) attributes {dimension_semantics = [#tpu.dimension_semantics<parallel>], iteration_bounds = array<i64: 2>, scalar_prefetch = 0 : i64, scratch_operands = 1 : i64, tpu.core_type = #tpu.core_type<tc>, window_params = [{transform_indices = @transform_0, window_bounds = array<i64: 8, 128>}, {pipeline_mode = #tpu.pipeline_mode<synchronous>, transform_indices = @transform_1, window_bounds = array<i64: 512, 128>}, {pipeline_mode = #tpu.pipeline_mode<synchronous>, transform_indices = @transform_2, window_bounds = array<i64: 1, 128>}, {pipeline_mode = #tpu.pipeline_mode<synchronous>, transform_indices = @transform_3, window_bounds = array<i64: 512, 128>}, {pipeline_mode = #tpu.pipeline_mode<synchronous>, transform_indices = @transform_4, window_bounds = array<i64: 1, 128>}, {pipeline_mode = #tpu.pipeline_mode<synchronous>, transform_indices = @transform_5, window_bounds = array<i64: 512, 128>}, {pipeline_mode = #tpu.pipeline_mode<synchronous>, transform_indices = @transform_6, window_bounds = array<i64: 1, 128>}, {pipeline_mode = #tpu.pipeline_mode<synchronous>, transform_indices = @transform_7, window_bounds = array<i64: 512, 128>}, {pipeline_mode = #tpu.pipeline_mode<synchronous>, transform_indices = @transform_8, window_bounds = array<i64: 1, 128>}, {transform_indices = @transform_9, window_bounds = array<i64: 8, 128>}, {transform_indices = @transform_10, window_bounds = array<i64: 8, 128>}, {transform_indices = @transform_11, window_bounds = array<i64: 8, 128>}, {transform_indices = @transform_12, window_bounds = array<i64: 8, 128>}]} {
    %c0 = arith.constant 0 : index
    %c0_0 = arith.constant 0 : index
    %0 = vector.load %arg1[%c0, %c0_0] : memref<8x128xf32, #tpu.memory_space<vmem>>, vector<8x128xf32>
    %1 = math.tanh %0 : vector<8x128xf32>
    %c0_1 = arith.constant 0 : index
    %c0_2 = arith.constant 0 : index
    %2 = vector.load %arg14[%c0_1, %c0_2] : memref<8x512xf32, #tpu.memory_space<vmem>>, vector<8x128xf32>
    tpu.vector_store %arg14[%c0_1, %c0_2], %1 {strides = array<i32>} : memref<8x512xf32, #tpu.memory_space<vmem>>, vector<8x128xf32>,
    %cst = arith.constant 2.000000e+00 : f32
    %3 = vector.broadcast %cst : f32 to vector<8x128xf32>
    %4 = arith.mulf %3, %1 : vector<8x128xf32>
    %5 = arith.mulf %4, %1 : vector<8x128xf32>
    %cst_3 = arith.constant 1.000000e+00 : f32
    %6 = vector.broadcast %cst_3 : f32 to vector<8x128xf32>
    %7 = arith.subf %5, %6 : vector<8x128xf32>
    %c0_4 = arith.constant 0 : index
    %c128 = arith.constant 128 : index
    %8 = vector.load %arg14[%c0_4, %c128] : memref<8x512xf32, #tpu.memory_space<vmem>>, vector<8x128xf32>
    tpu.vector_store %arg14[%c0_4, %c128], %7 {strides = array<i32>} : memref<8x512xf32, #tpu.memory_space<vmem>>, vector<8x128xf32>,
    %cst_5 = arith.constant 2.000000e+00 : f32
    %9 = vector.broadcast %cst_5 : f32 to vector<8x128xf32>
    %10 = arith.mulf %9, %1 : vector<8x128xf32>
    %11 = arith.mulf %10, %7 : vector<8x128xf32>
    %12 = arith.subf %11, %1 : vector<8x128xf32>
    %c0_6 = arith.constant 0 : index
    %c256 = arith.constant 256 : index
    %13 = vector.load %arg14[%c0_6, %c256] : memref<8x512xf32, #tpu.memory_space<vmem>>, vector<8x128xf32>
    tpu.vector_store %arg14[%c0_6, %c256], %12 {strides = array<i32>} : memref<8x512xf32, #tpu.memory_space<vmem>>, vector<8x128xf32>,
    %cst_7 = arith.constant 2.000000e+00 : f32
    %14 = vector.broadcast %cst_7 : f32 to vector<8x128xf32>
    %15 = arith.mulf %14, %1 : vector<8x128xf32>
    %16 = arith.mulf %15, %12 : vector<8x128xf32>
    %17 = arith.subf %16, %7 : vector<8x128xf32>
    %c0_8 = arith.constant 0 : index
    %c384 = arith.constant 384 : index
    %18 = vector.load %arg14[%c0_8, %c384] : memref<8x512xf32, #tpu.memory_space<vmem>>, vector<8x128xf32>
    tpu.vector_store %arg14[%c0_8, %c384], %17 {strides = array<i32>} : memref<8x512xf32, #tpu.memory_space<vmem>>, vector<8x128xf32>,
    %c0_9 = arith.constant 0 : index
    %c0_10 = arith.constant 0 : index
    %19 = vector.load %arg14[%c0_9, %c0_10] : memref<8x512xf32, #tpu.memory_space<vmem>>, vector<8x512xf32>
    %c0_11 = arith.constant 0 : index
    %c0_12 = arith.constant 0 : index
    %20 = vector.load %arg2[%c0_11, %c0_12] : memref<512x128xf32, #tpu.memory_space<vmem>>, vector<512x128xf32>
    %cst_13 = arith.constant dense<0.000000e+00> : vector<8x128xf32>
    %21 = tpu.matmul %19, %20, %cst_13 {dimension_numbers = #tpu.dot_dimension_numbers<[1], [0], [0], [1], [0, 0, 1, 1], [], []>} : vector<8x512xf32>, vector<512x128xf32>, vector<8x128xf32> -> vector<8x128xf32>
    %c0_14 = arith.constant 0 : index
    %c0_15 = arith.constant 0 : index
    %22 = vector.load %arg3[%c0_14, %c0_15] : memref<1x128xf32, #tpu.memory_space<vmem>>, vector<1x128xf32>
    %23 = vector.broadcast %22 : vector<1x128xf32> to vector<8x128xf32>
    %24 = arith.addf %21, %23 : vector<8x128xf32>
    %c0_16 = arith.constant 0 : index
    %c0_17 = arith.constant 0 : index
    %25 = vector.load %arg10[%c0_16, %c0_17] : memref<8x128xf32, #tpu.memory_space<vmem>>, vector<8x128xf32>
    tpu.vector_store %arg10[%c0_16, %c0_17], %24 {strides = array<i32>} : memref<8x128xf32, #tpu.memory_space<vmem>>, vector<8x128xf32>,
    %26 = math.tanh %24 : vector<8x128xf32>
    %c0_18 = arith.constant 0 : index
    %c0_19 = arith.constant 0 : index
    %27 = vector.load %arg14[%c0_18, %c0_19] : memref<8x512xf32, #tpu.memory_space<vmem>>, vector<8x128xf32>
    tpu.vector_store %arg14[%c0_18, %c0_19], %26 {strides = array<i32>} : memref<8x512xf32, #tpu.memory_space<vmem>>, vector<8x128xf32>,
    %cst_20 = arith.constant 2.000000e+00 : f32
    %28 = vector.broadcast %cst_20 : f32 to vector<8x128xf32>
    %29 = arith.mulf %28, %26 : vector<8x128xf32>
    %30 = arith.mulf %29, %26 : vector<8x128xf32>
    %cst_21 = arith.constant 1.000000e+00 : f32
    %31 = vector.broadcast %cst_21 : f32 to vector<8x128xf32>
    %32 = arith.subf %30, %31 : vector<8x128xf32>
    %c0_22 = arith.constant 0 : index
    %c128_23 = arith.constant 128 : index
    %33 = vector.load %arg14[%c0_22, %c128_23] : memref<8x512xf32, #tpu.memory_space<vmem>>, vector<8x128xf32>
    tpu.vector_store %arg14[%c0_22, %c128_23], %32 {strides = array<i32>} : memref<8x512xf32, #tpu.memory_space<vmem>>, vector<8x128xf32>,
    %cst_24 = arith.constant 2.000000e+00 : f32
    %34 = vector.broadcast %cst_24 : f32 to vector<8x128xf32>
    %35 = arith.mulf %34, %26 : vector<8x128xf32>
    %36 = arith.mulf %35, %32 : vector<8x128xf32>
    %37 = arith.subf %36, %26 : vector<8x128xf32>
    %c0_25 = arith.constant 0 : index
    %c256_26 = arith.constant 256 : index
    %38 = vector.load %arg14[%c0_25, %c256_26] : memref<8x512xf32, #tpu.memory_space<vmem>>, vector<8x128xf32>
    tpu.vector_store %arg14[%c0_25, %c256_26], %37 {strides = array<i32>} : memref<8x512xf32, #tpu.memory_space<vmem>>, vector<8x128xf32>,
    %cst_27 = arith.constant 2.000000e+00 : f32
    %39 = vector.broadcast %cst_27 : f32 to vector<8x128xf32>
    %40 = arith.mulf %39, %26 : vector<8x128xf32>
    %41 = arith.mulf %40, %37 : vector<8x128xf32>
    %42 = arith.subf %41, %32 : vector<8x128xf32>
    %c0_28 = arith.constant 0 : index
    %c384_29 = arith.constant 384 : index
    %43 = vector.load %arg14[%c0_28, %c384_29] : memref<8x512xf32, #tpu.memory_space<vmem>>, vector<8x128xf32>
    tpu.vector_store %arg14[%c0_28, %c384_29], %42 {strides = array<i32>} : memref<8x512xf32, #tpu.memory_space<vmem>>, vector<8x128xf32>,
    %c0_30 = arith.constant 0 : index
    %c0_31 = arith.constant 0 : index
    %44 = vector.load %arg14[%c0_30, %c0_31] : memref<8x512xf32, #tpu.memory_space<vmem>>, vector<8x512xf32>
    %c0_32 = arith.constant 0 : index
    %c0_33 = arith.constant 0 : index
    %45 = vector.load %arg4[%c0_32, %c0_33] : memref<512x128xf32, #tpu.memory_space<vmem>>, vector<512x128xf32>
    %cst_34 = arith.constant dense<0.000000e+00> : vector<8x128xf32>
    %46 = tpu.matmul %44, %45, %cst_34 {dimension_numbers = #tpu.dot_dimension_numbers<[1], [0], [0], [1], [0, 0, 1, 1], [], []>} : vector<8x512xf32>, vector<512x128xf32>, vector<8x128xf32> -> vector<8x128xf32>
    %c0_35 = arith.constant 0 : index
    %c0_36 = arith.constant 0 : index
    %47 = vector.load %arg5[%c0_35, %c0_36] : memref<1x128xf32, #tpu.memory_space<vmem>>, vector<1x128xf32>
    %48 = vector.broadcast %47 : vector<1x128xf32> to vector<8x128xf32>
    %49 = arith.addf %46, %48 : vector<8x128xf32>
    %c0_37 = arith.constant 0 : index
    %c0_38 = arith.constant 0 : index
    %50 = vector.load %arg11[%c0_37, %c0_38] : memref<8x128xf32, #tpu.memory_space<vmem>>, vector<8x128xf32>
    tpu.vector_store %arg11[%c0_37, %c0_38], %49 {strides = array<i32>} : memref<8x128xf32, #tpu.memory_space<vmem>>, vector<8x128xf32>,
    %51 = math.tanh %49 : vector<8x128xf32>
    %c0_39 = arith.constant 0 : index
    %c0_40 = arith.constant 0 : index
    %52 = vector.load %arg14[%c0_39, %c0_40] : memref<8x512xf32, #tpu.memory_space<vmem>>, vector<8x128xf32>
    tpu.vector_store %arg14[%c0_39, %c0_40], %51 {strides = array<i32>} : memref<8x512xf32, #tpu.memory_space<vmem>>, vector<8x128xf32>,
    %cst_41 = arith.constant 2.000000e+00 : f32
    %53 = vector.broadcast %cst_41 : f32 to vector<8x128xf32>
    %54 = arith.mulf %53, %51 : vector<8x128xf32>
    %55 = arith.mulf %54, %51 : vector<8x128xf32>
    %cst_42 = arith.constant 1.000000e+00 : f32
    %56 = vector.broadcast %cst_42 : f32 to vector<8x128xf32>
    %57 = arith.subf %55, %56 : vector<8x128xf32>
    %c0_43 = arith.constant 0 : index
    %c128_44 = arith.constant 128 : index
    %58 = vector.load %arg14[%c0_43, %c128_44] : memref<8x512xf32, #tpu.memory_space<vmem>>, vector<8x128xf32>
    tpu.vector_store %arg14[%c0_43, %c128_44], %57 {strides = array<i32>} : memref<8x512xf32, #tpu.memory_space<vmem>>, vector<8x128xf32>,
    %cst_45 = arith.constant 2.000000e+00 : f32
    %59 = vector.broadcast %cst_45 : f32 to vector<8x128xf32>
    %60 = arith.mulf %59, %51 : vector<8x128xf32>
    %61 = arith.mulf %60, %57 : vector<8x128xf32>
    %62 = arith.subf %61, %51 : vector<8x128xf32>
    %c0_46 = arith.constant 0 : index
    %c256_47 = arith.constant 256 : index
    %63 = vector.load %arg14[%c0_46, %c256_47] : memref<8x512xf32, #tpu.memory_space<vmem>>, vector<8x128xf32>
    tpu.vector_store %arg14[%c0_46, %c256_47], %62 {strides = array<i32>} : memref<8x512xf32, #tpu.memory_space<vmem>>, vector<8x128xf32>,
    %cst_48 = arith.constant 2.000000e+00 : f32
    %64 = vector.broadcast %cst_48 : f32 to vector<8x128xf32>
    %65 = arith.mulf %64, %51 : vector<8x128xf32>
    %66 = arith.mulf %65, %62 : vector<8x128xf32>
    %67 = arith.subf %66, %57 : vector<8x128xf32>
    %c0_49 = arith.constant 0 : index
    %c384_50 = arith.constant 384 : index
    %68 = vector.load %arg14[%c0_49, %c384_50] : memref<8x512xf32, #tpu.memory_space<vmem>>, vector<8x128xf32>
    tpu.vector_store %arg14[%c0_49, %c384_50], %67 {strides = array<i32>} : memref<8x512xf32, #tpu.memory_space<vmem>>, vector<8x128xf32>,
    %c0_51 = arith.constant 0 : index
    %c0_52 = arith.constant 0 : index
    %69 = vector.load %arg14[%c0_51, %c0_52] : memref<8x512xf32, #tpu.memory_space<vmem>>, vector<8x512xf32>
    %c0_53 = arith.constant 0 : index
    %c0_54 = arith.constant 0 : index
    %70 = vector.load %arg6[%c0_53, %c0_54] : memref<512x128xf32, #tpu.memory_space<vmem>>, vector<512x128xf32>
    %cst_55 = arith.constant dense<0.000000e+00> : vector<8x128xf32>
    %71 = tpu.matmul %69, %70, %cst_55 {dimension_numbers = #tpu.dot_dimension_numbers<[1], [0], [0], [1], [0, 0, 1, 1], [], []>} : vector<8x512xf32>, vector<512x128xf32>, vector<8x128xf32> -> vector<8x128xf32>
    %c0_56 = arith.constant 0 : index
    %c0_57 = arith.constant 0 : index
    %72 = vector.load %arg7[%c0_56, %c0_57] : memref<1x128xf32, #tpu.memory_space<vmem>>, vector<1x128xf32>
    %73 = vector.broadcast %72 : vector<1x128xf32> to vector<8x128xf32>
    %74 = arith.addf %71, %73 : vector<8x128xf32>
    %c0_58 = arith.constant 0 : index
    %c0_59 = arith.constant 0 : index
    %75 = vector.load %arg12[%c0_58, %c0_59] : memref<8x128xf32, #tpu.memory_space<vmem>>, vector<8x128xf32>
    tpu.vector_store %arg12[%c0_58, %c0_59], %74 {strides = array<i32>} : memref<8x128xf32, #tpu.memory_space<vmem>>, vector<8x128xf32>,
    %76 = math.tanh %74 : vector<8x128xf32>
    %c0_60 = arith.constant 0 : index
    %c0_61 = arith.constant 0 : index
    %77 = vector.load %arg14[%c0_60, %c0_61] : memref<8x512xf32, #tpu.memory_space<vmem>>, vector<8x128xf32>
    tpu.vector_store %arg14[%c0_60, %c0_61], %76 {strides = array<i32>} : memref<8x512xf32, #tpu.memory_space<vmem>>, vector<8x128xf32>,
    %cst_62 = arith.constant 2.000000e+00 : f32
    %78 = vector.broadcast %cst_62 : f32 to vector<8x128xf32>
    %79 = arith.mulf %78, %76 : vector<8x128xf32>
    %80 = arith.mulf %79, %76 : vector<8x128xf32>
    %cst_63 = arith.constant 1.000000e+00 : f32
    %81 = vector.broadcast %cst_63 : f32 to vector<8x128xf32>
    %82 = arith.subf %80, %81 : vector<8x128xf32>
    %c0_64 = arith.constant 0 : index
    %c128_65 = arith.constant 128 : index
    %83 = vector.load %arg14[%c0_64, %c128_65] : memref<8x512xf32, #tpu.memory_space<vmem>>, vector<8x128xf32>
    tpu.vector_store %arg14[%c0_64, %c128_65], %82 {strides = array<i32>} : memref<8x512xf32, #tpu.memory_space<vmem>>, vector<8x128xf32>,
    %cst_66 = arith.constant 2.000000e+00 : f32
    %84 = vector.broadcast %cst_66 : f32 to vector<8x128xf32>
    %85 = arith.mulf %84, %76 : vector<8x128xf32>
    %86 = arith.mulf %85, %82 : vector<8x128xf32>
    %87 = arith.subf %86, %76 : vector<8x128xf32>
    %c0_67 = arith.constant 0 : index
    %c256_68 = arith.constant 256 : index
    %88 = vector.load %arg14[%c0_67, %c256_68] : memref<8x512xf32, #tpu.memory_space<vmem>>, vector<8x128xf32>
    tpu.vector_store %arg14[%c0_67, %c256_68], %87 {strides = array<i32>} : memref<8x512xf32, #tpu.memory_space<vmem>>, vector<8x128xf32>,
    %cst_69 = arith.constant 2.000000e+00 : f32
    %89 = vector.broadcast %cst_69 : f32 to vector<8x128xf32>
    %90 = arith.mulf %89, %76 : vector<8x128xf32>
    %91 = arith.mulf %90, %87 : vector<8x128xf32>
    %92 = arith.subf %91, %82 : vector<8x128xf32>
    %c0_70 = arith.constant 0 : index
    %c384_71 = arith.constant 384 : index
    %93 = vector.load %arg14[%c0_70, %c384_71] : memref<8x512xf32, #tpu.memory_space<vmem>>, vector<8x128xf32>
    tpu.vector_store %arg14[%c0_70, %c384_71], %92 {strides = array<i32>} : memref<8x512xf32, #tpu.memory_space<vmem>>, vector<8x128xf32>,
    %c0_72 = arith.constant 0 : index
    %c0_73 = arith.constant 0 : index
    %94 = vector.load %arg14[%c0_72, %c0_73] : memref<8x512xf32, #tpu.memory_space<vmem>>, vector<8x512xf32>
    %c0_74 = arith.constant 0 : index
    %c0_75 = arith.constant 0 : index
    %95 = vector.load %arg8[%c0_74, %c0_75] : memref<512x128xf32, #tpu.memory_space<vmem>>, vector<512x128xf32>
    %cst_76 = arith.constant dense<0.000000e+00> : vector<8x128xf32>
    %96 = tpu.matmul %94, %95, %cst_76 {dimension_numbers = #tpu.dot_dimension_numbers<[1], [0], [0], [1], [0, 0, 1, 1], [], []>} : vector<8x512xf32>, vector<512x128xf32>, vector<8x128xf32> -> vector<8x128xf32>
    %c0_77 = arith.constant 0 : index
    %c0_78 = arith.constant 0 : index
    %97 = vector.load %arg9[%c0_77, %c0_78] : memref<1x128xf32, #tpu.memory_space<vmem>>, vector<1x128xf32>
    %98 = vector.broadcast %97 : vector<1x128xf32> to vector<8x128xf32>
    %99 = arith.addf %96, %98 : vector<8x128xf32>
    %cst_79 = arith.constant 0.000000e+00 : f32
    %100 = vector.broadcast %cst_79 : f32 to vector<8x128xf32>
    %101 = arith.maximumf %99, %100 : vector<8x128xf32>
    %c0_80 = arith.constant 0 : index
    %c0_81 = arith.constant 0 : index
    %102 = vector.load %arg13[%c0_80, %c0_81] : memref<8x128xf32, #tpu.memory_space<vmem>>, vector<8x128xf32>
    tpu.vector_store %arg13[%c0_80, %c0_81], %101 {strides = array<i32>} : memref<8x128xf32, #tpu.memory_space<vmem>>, vector<8x128xf32>,
    return
  }
  func.func @transform_0(%arg0: i32) -> (i32, i32) {
    %c0_i32 = arith.constant 0 : i32
    %c0_i32_0 = arith.constant 0 : i32
    return %arg0, %c0_i32 : i32, i32
  }
  func.func @transform_1(%arg0: i32) -> (i32, i32) {
    %c0_i32 = arith.constant 0 : i32
    %c0_i32_0 = arith.constant 0 : i32
    %c0_i32_1 = arith.constant 0 : i32
    return %c0_i32, %c0_i32_0 : i32, i32
  }
  func.func @transform_2(%arg0: i32) -> (i32, i32) {
    %c0_i32 = arith.constant 0 : i32
    %c0_i32_0 = arith.constant 0 : i32
    %c0_i32_1 = arith.constant 0 : i32
    return %c0_i32, %c0_i32_0 : i32, i32
  }
  func.func @transform_3(%arg0: i32) -> (i32, i32) {
    %c0_i32 = arith.constant 0 : i32
    %c0_i32_0 = arith.constant 0 : i32
    %c0_i32_1 = arith.constant 0 : i32
    return %c0_i32, %c0_i32_0 : i32, i32
  }
  func.func @transform_4(%arg0: i32) -> (i32, i32) {
    %c0_i32 = arith.constant 0 : i32
    %c0_i32_0 = arith.constant 0 : i32
    %c0_i32_1 = arith.constant 0 : i32
    return %c0_i32, %c0_i32_0 : i32, i32
  }
  func.func @transform_5(%arg0: i32) -> (i32, i32) {
    %c0_i32 = arith.constant 0 : i32
    %c0_i32_0 = arith.constant 0 : i32
    %c0_i32_1 = arith.constant 0 : i32
    return %c0_i32, %c0_i32_0 : i32, i32
  }
  func.func @transform_6(%arg0: i32) -> (i32, i32) {
    %c0_i32 = arith.constant 0 : i32
    %c0_i32_0 = arith.constant 0 : i32
    %c0_i32_1 = arith.constant 0 : i32
    return %c0_i32, %c0_i32_0 : i32, i32
  }
  func.func @transform_7(%arg0: i32) -> (i32, i32) {
    %c0_i32 = arith.constant 0 : i32
    %c0_i32_0 = arith.constant 0 : i32
    %c0_i32_1 = arith.constant 0 : i32
    return %c0_i32, %c0_i32_0 : i32, i32
  }
  func.func @transform_8(%arg0: i32) -> (i32, i32) {
    %c0_i32 = arith.constant 0 : i32
    %c0_i32_0 = arith.constant 0 : i32
    %c0_i32_1 = arith.constant 0 : i32
    return %c0_i32, %c0_i32_0 : i32, i32
  }
  func.func @transform_9(%arg0: i32) -> (i32, i32) {
    %c0_i32 = arith.constant 0 : i32
    %c0_i32_0 = arith.constant 0 : i32
    return %arg0, %c0_i32 : i32, i32
  }
  func.func @transform_10(%arg0: i32) -> (i32, i32) {
    %c0_i32 = arith.constant 0 : i32
    %c0_i32_0 = arith.constant 0 : i32
    return %arg0, %c0_i32 : i32, i32
  }
  func.func @transform_11(%arg0: i32) -> (i32, i32) {
    %c0_i32 = arith.constant 0 : i32
    %c0_i32_0 = arith.constant 0 : i32
    return %arg0, %c0_i32 : i32, i32
  }
  func.func @transform_12(%arg0: i32) -> (i32, i32) {
    %c0_i32 = arith.constant 0 : i32
    %c0_i32_0 = arith.constant 0 : i32
    return %arg0, %c0_i32 : i32, i32
  }
}

module attributes {stable_mosaic.version = 11 : i64} {
  func.func @_chebykan_fused_kernel(%arg0: i32, %arg1: memref<8x128xf32, #tpu.memory_space<vmem>>, %arg2: memref<512x128xf32, #tpu.memory_space<vmem>>, %arg3: memref<1x128xf32, #tpu.memory_space<vmem>>, %arg4: memref<512x128xf32, #tpu.memory_space<vmem>>, %arg5: memref<1x128xf32, #tpu.memory_space<vmem>>, %arg6: memref<512x128xf32, #tpu.memory_space<vmem>>, %arg7: memref<1x128xf32, #tpu.memory_space<vmem>>, %arg8: memref<512x128xf32, #tpu.memory_space<vmem>>, %arg9: memref<1x128xf32, #tpu.memory_space<vmem>>, %arg10: memref<8x128xf32, #tpu.memory_space<vmem>>, %arg11: memref<8x128xf32, #tpu.memory_space<vmem>>, %arg12: memref<8x128xf32, #tpu.memory_space<vmem>>, %arg13: memref<8x128xf32, #tpu.memory_space<vmem>>, %arg14: memref<8x512xf32, #tpu.memory_space<vmem>>) attributes {dimension_semantics = [#tpu.dimension_semantics<parallel>], iteration_bounds = array<i64: 2>, scalar_prefetch = 0 : i64, scratch_operands = 1 : i64, tpu.core_type = #tpu.core_type<tc>, window_params = [{transform_indices = @transform_0, window_bounds = array<i64: 8, 128>}, {pipeline_mode = #tpu.pipeline_mode<synchronous>, transform_indices = @transform_1, window_bounds = array<i64: 512, 128>}, {pipeline_mode = #tpu.pipeline_mode<synchronous>, transform_indices = @transform_2, window_bounds = array<i64: 1, 128>}, {pipeline_mode = #tpu.pipeline_mode<synchronous>, transform_indices = @transform_3, window_bounds = array<i64: 512, 128>}, {pipeline_mode = #tpu.pipeline_mode<synchronous>, transform_indices = @transform_4, window_bounds = array<i64: 1, 128>}, {pipeline_mode = #tpu.pipeline_mode<synchronous>, transform_indices = @transform_5, window_bounds = array<i64: 512, 128>}, {pipeline_mode = #tpu.pipeline_mode<synchronous>, transform_indices = @transform_6, window_bounds = array<i64: 1, 128>}, {pipeline_mode = #tpu.pipeline_mode<synchronous>, transform_indices = @transform_7, window_bounds = array<i64: 512, 128>}, {pipeline_mode = #tpu.pipeline_mode<synchronous>, transform_indices = @transform_8, window_bounds = array<i64: 1, 128>}, {transform_indices = @transform_9, window_bounds = array<i64: 8, 128>}, {transform_indices = @transform_10, window_bounds = array<i64: 8, 128>}, {transform_indices = @transform_11, window_bounds = array<i64: 8, 128>}, {transform_indices = @transform_12, window_bounds = array<i64: 8, 128>}]} {
    %c0 = arith.constant 0 : index
    %c0_0 = arith.constant 0 : index
    %0 = vector.load %arg1[%c0, %c0_0] : memref<8x128xf32, #tpu.memory_space<vmem>>, vector<8x128xf32>
    %1 = math.tanh %0 : vector<8x128xf32>
    %c0_1 = arith.constant 0 : index
    %c0_2 = arith.constant 0 : index
    %2 = vector.load %arg14[%c0_1, %c0_2] : memref<8x512xf32, #tpu.memory_space<vmem>>, vector<8x128xf32>
    tpu.vector_store %arg14[%c0_1, %c0_2], %1 {strides = array<i32>} : memref<8x512xf32, #tpu.memory_space<vmem>>, vector<8x128xf32>,
    %cst = arith.constant 2.000000e+00 : f32
    %3 = vector.broadcast %cst : f32 to vector<8x128xf32>
    %4 = arith.mulf %3, %1 : vector<8x128xf32>
    %5 = arith.mulf %4, %1 : vector<8x128xf32>
    %cst_3 = arith.constant 1.000000e+00 : f32
    %6 = vector.broadcast %cst_3 : f32 to vector<8x128xf32>
    %7 = arith.subf %5, %6 : vector<8x128xf32>
    %c0_4 = arith.constant 0 : index
    %c128 = arith.constant 128 : index
    %8 = vector.load %arg14[%c0_4, %c128] : memref<8x512xf32, #tpu.memory_space<vmem>>, vector<8x128xf32>
    tpu.vector_store %arg14[%c0_4, %c128], %7 {strides = array<i32>} : memref<8x512xf32, #tpu.memory_space<vmem>>, vector<8x128xf32>,
    %cst_5 = arith.constant 2.000000e+00 : f32
    %9 = vector.broadcast %cst_5 : f32 to vector<8x128xf32>
    %10 = arith.mulf %9, %1 : vector<8x128xf32>
    %11 = arith.mulf %10, %7 : vector<8x128xf32>
    %12 = arith.subf %11, %1 : vector<8x128xf32>
    %c0_6 = arith.constant 0 : index
    %c256 = arith.constant 256 : index
    %13 = vector.load %arg14[%c0_6, %c256] : memref<8x512xf32, #tpu.memory_space<vmem>>, vector<8x128xf32>
    tpu.vector_store %arg14[%c0_6, %c256], %12 {strides = array<i32>} : memref<8x512xf32, #tpu.memory_space<vmem>>, vector<8x128xf32>,
    %cst_7 = arith.constant 2.000000e+00 : f32
    %14 = vector.broadcast %cst_7 : f32 to vector<8x128xf32>
    %15 = arith.mulf %14, %1 : vector<8x128xf32>
    %16 = arith.mulf %15, %12 : vector<8x128xf32>
    %17 = arith.subf %16, %7 : vector<8x128xf32>
    %c0_8 = arith.constant 0 : index
    %c384 = arith.constant 384 : index
    %18 = vector.load %arg14[%c0_8, %c384] : memref<8x512xf32, #tpu.memory_space<vmem>>, vector<8x128xf32>
    tpu.vector_store %arg14[%c0_8, %c384], %17 {strides = array<i32>} : memref<8x512xf32, #tpu.memory_space<vmem>>, vector<8x128xf32>,
    %c0_9 = arith.constant 0 : index
    %c0_10 = arith.constant 0 : index
    %19 = vector.load %arg14[%c0_9, %c0_10] : memref<8x512xf32, #tpu.memory_space<vmem>>, vector<8x512xf32>
    %c0_11 = arith.constant 0 : index
    %c0_12 = arith.constant 0 : index
    %20 = vector.load %arg2[%c0_11, %c0_12] : memref<512x128xf32, #tpu.memory_space<vmem>>, vector<512x128xf32>
    %cst_13 = arith.constant dense<0.000000e+00> : vector<8x128xf32>
    %21 = tpu.matmul %19, %20, %cst_13 {dimension_numbers = #tpu.dot_dimension_numbers<[1], [0], [0], [1], [0, 0, 1, 1], [], []>} : vector<8x512xf32>, vector<512x128xf32>, vector<8x128xf32> -> vector<8x128xf32>
    %c0_14 = arith.constant 0 : index
    %c0_15 = arith.constant 0 : index
    %22 = vector.load %arg3[%c0_14, %c0_15] : memref<1x128xf32, #tpu.memory_space<vmem>>, vector<1x128xf32>
    %23 = vector.broadcast %22 : vector<1x128xf32> to vector<8x128xf32>
    %24 = arith.addf %21, %23 : vector<8x128xf32>
    %c0_16 = arith.constant 0 : index
    %c0_17 = arith.constant 0 : index
    %25 = vector.load %arg10[%c0_16, %c0_17] : memref<8x128xf32, #tpu.memory_space<vmem>>, vector<8x128xf32>
    tpu.vector_store %arg10[%c0_16, %c0_17], %24 {strides = array<i32>} : memref<8x128xf32, #tpu.memory_space<vmem>>, vector<8x128xf32>,
    %26 = math.tanh %24 : vector<8x128xf32>
    %c0_18 = arith.constant 0 : index
    %c0_19 = arith.constant 0 : index
    %27 = vector.load %arg14[%c0_18, %c0_19] : memref<8x512xf32, #tpu.memory_space<vmem>>, vector<8x128xf32>
    tpu.vector_store %arg14[%c0_18, %c0_19], %26 {strides = array<i32>} : memref<8x512xf32, #tpu.memory_space<vmem>>, vector<8x128xf32>,
    %cst_20 = arith.constant 2.000000e+00 : f32
    %28 = vector.broadcast %cst_20 : f32 to vector<8x128xf32>
    %29 = arith.mulf %28, %26 : vector<8x128xf32>
    %30 = arith.mulf %29, %26 : vector<8x128xf32>
    %cst_21 = arith.constant 1.000000e+00 : f32
    %31 = vector.broadcast %cst_21 : f32 to vector<8x128xf32>
    %32 = arith.subf %30, %31 : vector<8x128xf32>
    %c0_22 = arith.constant 0 : index
    %c128_23 = arith.constant 128 : index
    %33 = vector.load %arg14[%c0_22, %c128_23] : memref<8x512xf32, #tpu.memory_space<vmem>>, vector<8x128xf32>
    tpu.vector_store %arg14[%c0_22, %c128_23], %32 {strides = array<i32>} : memref<8x512xf32, #tpu.memory_space<vmem>>, vector<8x128xf32>,
    %cst_24 = arith.constant 2.000000e+00 : f32
    %34 = vector.broadcast %cst_24 : f32 to vector<8x128xf32>
    %35 = arith.mulf %34, %26 : vector<8x128xf32>
    %36 = arith.mulf %35, %32 : vector<8x128xf32>
    %37 = arith.subf %36, %26 : vector<8x128xf32>
    %c0_25 = arith.constant 0 : index
    %c256_26 = arith.constant 256 : index
    %38 = vector.load %arg14[%c0_25, %c256_26] : memref<8x512xf32, #tpu.memory_space<vmem>>, vector<8x128xf32>
    tpu.vector_store %arg14[%c0_25, %c256_26], %37 {strides = array<i32>} : memref<8x512xf32, #tpu.memory_space<vmem>>, vector<8x128xf32>,
    %cst_27 = arith.constant 2.000000e+00 : f32
    %39 = vector.broadcast %cst_27 : f32 to vector<8x128xf32>
    %40 = arith.mulf %39, %26 : vector<8x128xf32>
    %41 = arith.mulf %40, %37 : vector<8x128xf32>
    %42 = arith.subf %41, %32 : vector<8x128xf32>
    %c0_28 = arith.constant 0 : index
    %c384_29 = arith.constant 384 : index
    %43 = vector.load %arg14[%c0_28, %c384_29] : memref<8x512xf32, #tpu.memory_space<vmem>>, vector<8x128xf32>
    tpu.vector_store %arg14[%c0_28, %c384_29], %42 {strides = array<i32>} : memref<8x512xf32, #tpu.memory_space<vmem>>, vector<8x128xf32>,
    %c0_30 = arith.constant 0 : index
    %c0_31 = arith.constant 0 : index
    %44 = vector.load %arg14[%c0_30, %c0_31] : memref<8x512xf32, #tpu.memory_space<vmem>>, vector<8x512xf32>
    %c0_32 = arith.constant 0 : index
    %c0_33 = arith.constant 0 : index
    %45 = vector.load %arg4[%c0_32, %c0_33] : memref<512x128xf32, #tpu.memory_space<vmem>>, vector<512x128xf32>
    %cst_34 = arith.constant dense<0.000000e+00> : vector<8x128xf32>
    %46 = tpu.matmul %44, %45, %cst_34 {dimension_numbers = #tpu.dot_dimension_numbers<[1], [0], [0], [1], [0, 0, 1, 1], [], []>} : vector<8x512xf32>, vector<512x128xf32>, vector<8x128xf32> -> vector<8x128xf32>
    %c0_35 = arith.constant 0 : index
    %c0_36 = arith.constant 0 : index
    %47 = vector.load %arg5[%c0_35, %c0_36] : memref<1x128xf32, #tpu.memory_space<vmem>>, vector<1x128xf32>
    %48 = vector.broadcast %47 : vector<1x128xf32> to vector<8x128xf32>
    %49 = arith.addf %46, %48 : vector<8x128xf32>
    %c0_37 = arith.constant 0 : index
    %c0_38 = arith.constant 0 : index
    %50 = vector.load %arg11[%c0_37, %c0_38] : memref<8x128xf32, #tpu.memory_space<vmem>>, vector<8x128xf32>
    tpu.vector_store %arg11[%c0_37, %c0_38], %49 {strides = array<i32>} : memref<8x128xf32, #tpu.memory_space<vmem>>, vector<8x128xf32>,
    %51 = math.tanh %49 : vector<8x128xf32>
    %c0_39 = arith.constant 0 : index
    %c0_40 = arith.constant 0 : index
    %52 = vector.load %arg14[%c0_39, %c0_40] : memref<8x512xf32, #tpu.memory_space<vmem>>, vector<8x128xf32>
    tpu.vector_store %arg14[%c0_39, %c0_40], %51 {strides = array<i32>} : memref<8x512xf32, #tpu.memory_space<vmem>>, vector<8x128xf32>,
    %cst_41 = arith.constant 2.000000e+00 : f32
    %53 = vector.broadcast %cst_41 : f32 to vector<8x128xf32>
    %54 = arith.mulf %53, %51 : vector<8x128xf32>
    %55 = arith.mulf %54, %51 : vector<8x128xf32>
    %cst_42 = arith.constant 1.000000e+00 : f32
    %56 = vector.broadcast %cst_42 : f32 to vector<8x128xf32>
    %57 = arith.subf %55, %56 : vector<8x128xf32>
    %c0_43 = arith.constant 0 : index
    %c128_44 = arith.constant 128 : index
    %58 = vector.load %arg14[%c0_43, %c128_44] : memref<8x512xf32, #tpu.memory_space<vmem>>, vector<8x128xf32>
    tpu.vector_store %arg14[%c0_43, %c128_44], %57 {strides = array<i32>} : memref<8x512xf32, #tpu.memory_space<vmem>>, vector<8x128xf32>,
    %cst_45 = arith.constant 2.000000e+00 : f32
    %59 = vector.broadcast %cst_45 : f32 to vector<8x128xf32>
    %60 = arith.mulf %59, %51 : vector<8x128xf32>
    %61 = arith.mulf %60, %57 : vector<8x128xf32>
    %62 = arith.subf %61, %51 : vector<8x128xf32>
    %c0_46 = arith.constant 0 : index
    %c256_47 = arith.constant 256 : index
    %63 = vector.load %arg14[%c0_46, %c256_47] : memref<8x512xf32, #tpu.memory_space<vmem>>, vector<8x128xf32>
    tpu.vector_store %arg14[%c0_46, %c256_47], %62 {strides = array<i32>} : memref<8x512xf32, #tpu.memory_space<vmem>>, vector<8x128xf32>,
    %cst_48 = arith.constant 2.000000e+00 : f32
    %64 = vector.broadcast %cst_48 : f32 to vector<8x128xf32>
    %65 = arith.mulf %64, %51 : vector<8x128xf32>
    %66 = arith.mulf %65, %62 : vector<8x128xf32>
    %67 = arith.subf %66, %57 : vector<8x128xf32>
    %c0_49 = arith.constant 0 : index
    %c384_50 = arith.constant 384 : index
    %68 = vector.load %arg14[%c0_49, %c384_50] : memref<8x512xf32, #tpu.memory_space<vmem>>, vector<8x128xf32>
    tpu.vector_store %arg14[%c0_49, %c384_50], %67 {strides = array<i32>} : memref<8x512xf32, #tpu.memory_space<vmem>>, vector<8x128xf32>,
    %c0_51 = arith.constant 0 : index
    %c0_52 = arith.constant 0 : index
    %69 = vector.load %arg14[%c0_51, %c0_52] : memref<8x512xf32, #tpu.memory_space<vmem>>, vector<8x512xf32>
    %c0_53 = arith.constant 0 : index
    %c0_54 = arith.constant 0 : index
    %70 = vector.load %arg6[%c0_53, %c0_54] : memref<512x128xf32, #tpu.memory_space<vmem>>, vector<512x128xf32>
    %cst_55 = arith.constant dense<0.000000e+00> : vector<8x128xf32>
    %71 = tpu.matmul %69, %70, %cst_55 {dimension_numbers = #tpu.dot_dimension_numbers<[1], [0], [0], [1], [0, 0, 1, 1], [], []>} : vector<8x512xf32>, vector<512x128xf32>, vector<8x128xf32> -> vector<8x128xf32>
    %c0_56 = arith.constant 0 : index
    %c0_57 = arith.constant 0 : index
    %72 = vector.load %arg7[%c0_56, %c0_57] : memref<1x128xf32, #tpu.memory_space<vmem>>, vector<1x128xf32>
    %73 = vector.broadcast %72 : vector<1x128xf32> to vector<8x128xf32>
    %74 = arith.addf %71, %73 : vector<8x128xf32>
    %c0_58 = arith.constant 0 : index
    %c0_59 = arith.constant 0 : index
    %75 = vector.load %arg12[%c0_58, %c0_59] : memref<8x128xf32, #tpu.memory_space<vmem>>, vector<8x128xf32>
    tpu.vector_store %arg12[%c0_58, %c0_59], %74 {strides = array<i32>} : memref<8x128xf32, #tpu.memory_space<vmem>>, vector<8x128xf32>,
    %76 = math.tanh %74 : vector<8x128xf32>
    %c0_60 = arith.constant 0 : index
    %c0_61 = arith.constant 0 : index
    %77 = vector.load %arg14[%c0_60, %c0_61] : memref<8x512xf32, #tpu.memory_space<vmem>>, vector<8x128xf32>
    tpu.vector_store %arg14[%c0_60, %c0_61], %76 {strides = array<i32>} : memref<8x512xf32, #tpu.memory_space<vmem>>, vector<8x128xf32>,
    %cst_62 = arith.constant 2.000000e+00 : f32
    %78 = vector.broadcast %cst_62 : f32 to vector<8x128xf32>
    %79 = arith.mulf %78, %76 : vector<8x128xf32>
    %80 = arith.mulf %79, %76 : vector<8x128xf32>
    %cst_63 = arith.constant 1.000000e+00 : f32
    %81 = vector.broadcast %cst_63 : f32 to vector<8x128xf32>
    %82 = arith.subf %80, %81 : vector<8x128xf32>
    %c0_64 = arith.constant 0 : index
    %c128_65 = arith.constant 128 : index
    %83 = vector.load %arg14[%c0_64, %c128_65] : memref<8x512xf32, #tpu.memory_space<vmem>>, vector<8x128xf32>
    tpu.vector_store %arg14[%c0_64, %c128_65], %82 {strides = array<i32>} : memref<8x512xf32, #tpu.memory_space<vmem>>, vector<8x128xf32>,
    %cst_66 = arith.constant 2.000000e+00 : f32
    %84 = vector.broadcast %cst_66 : f32 to vector<8x128xf32>
    %85 = arith.mulf %84, %76 : vector<8x128xf32>
    %86 = arith.mulf %85, %82 : vector<8x128xf32>
    %87 = arith.subf %86, %76 : vector<8x128xf32>
    %c0_67 = arith.constant 0 : index
    %c256_68 = arith.constant 256 : index
    %88 = vector.load %arg14[%c0_67, %c256_68] : memref<8x512xf32, #tpu.memory_space<vmem>>, vector<8x128xf32>
    tpu.vector_store %arg14[%c0_67, %c256_68], %87 {strides = array<i32>} : memref<8x512xf32, #tpu.memory_space<vmem>>, vector<8x128xf32>,
    %cst_69 = arith.constant 2.000000e+00 : f32
    %89 = vector.broadcast %cst_69 : f32 to vector<8x128xf32>
    %90 = arith.mulf %89, %76 : vector<8x128xf32>
    %91 = arith.mulf %90, %87 : vector<8x128xf32>
    %92 = arith.subf %91, %82 : vector<8x128xf32>
    %c0_70 = arith.constant 0 : index
    %c384_71 = arith.constant 384 : index
    %93 = vector.load %arg14[%c0_70, %c384_71] : memref<8x512xf32, #tpu.memory_space<vmem>>, vector<8x128xf32>
    tpu.vector_store %arg14[%c0_70, %c384_71], %92 {strides = array<i32>} : memref<8x512xf32, #tpu.memory_space<vmem>>, vector<8x128xf32>,
    %c0_72 = arith.constant 0 : index
    %c0_73 = arith.constant 0 : index
    %94 = vector.load %arg14[%c0_72, %c0_73] : memref<8x512xf32, #tpu.memory_space<vmem>>, vector<8x512xf32>
    %c0_74 = arith.constant 0 : index
    %c0_75 = arith.constant 0 : index
    %95 = vector.load %arg8[%c0_74, %c0_75] : memref<512x128xf32, #tpu.memory_space<vmem>>, vector<512x128xf32>
    %cst_76 = arith.constant dense<0.000000e+00> : vector<8x128xf32>
    %96 = tpu.matmul %94, %95, %cst_76 {dimension_numbers = #tpu.dot_dimension_numbers<[1], [0], [0], [1], [0, 0, 1, 1], [], []>} : vector<8x512xf32>, vector<512x128xf32>, vector<8x128xf32> -> vector<8x128xf32>
    %c0_77 = arith.constant 0 : index
    %c0_78 = arith.constant 0 : index
    %97 = vector.load %arg9[%c0_77, %c0_78] : memref<1x128xf32, #tpu.memory_space<vmem>>, vector<1x128xf32>
    %98 = vector.broadcast %97 : vector<1x128xf32> to vector<8x128xf32>
    %99 = arith.addf %96, %98 : vector<8x128xf32>
    %cst_79 = arith.constant 0.000000e+00 : f32
    %100 = vector.broadcast %cst_79 : f32 to vector<8x128xf32>
    %101 = arith.maximumf %99, %100 : vector<8x128xf32>
    %c0_80 = arith.constant 0 : index
    %c0_81 = arith.constant 0 : index
    %102 = vector.load %arg13[%c0_80, %c0_81] : memref<8x128xf32, #tpu.memory_space<vmem>>, vector<8x128xf32>
    tpu.vector_store %arg13[%c0_80, %c0_81], %101 {strides = array<i32>} : memref<8x128xf32, #tpu.memory_space<vmem>>, vector<8x128xf32>,
    return
  }
  func.func @transform_0(%arg0: i32) -> (i32, i32) {
    %c0_i32 = arith.constant 0 : i32
    %c0_i32_0 = arith.constant 0 : i32
    return %arg0, %c0_i32 : i32, i32
  }
  func.func @transform_1(%arg0: i32) -> (i32, i32) {
    %c0_i32 = arith.constant 0 : i32
    %c0_i32_0 = arith.constant 0 : i32
    %c0_i32_1 = arith.constant 0 : i32
    return %c0_i32, %c0_i32_0 : i32, i32
  }
  func.func @transform_2(%arg0: i32) -> (i32, i32) {
    %c0_i32 = arith.constant 0 : i32
    %c0_i32_0 = arith.constant 0 : i32
    %c0_i32_1 = arith.constant 0 : i32
    return %c0_i32, %c0_i32_0 : i32, i32
  }
  func.func @transform_3(%arg0: i32) -> (i32, i32) {
    %c0_i32 = arith.constant 0 : i32
    %c0_i32_0 = arith.constant 0 : i32
    %c0_i32_1 = arith.constant 0 : i32
    return %c0_i32, %c0_i32_0 : i32, i32
  }
  func.func @transform_4(%arg0: i32) -> (i32, i32) {
    %c0_i32 = arith.constant 0 : i32
    %c0_i32_0 = arith.constant 0 : i32
    %c0_i32_1 = arith.constant 0 : i32
    return %c0_i32, %c0_i32_0 : i32, i32
  }
  func.func @transform_5(%arg0: i32) -> (i32, i32) {
    %c0_i32 = arith.constant 0 : i32
    %c0_i32_0 = arith.constant 0 : i32
    %c0_i32_1 = arith.constant 0 : i32
    return %c0_i32, %c0_i32_0 : i32, i32
  }
  func.func @transform_6(%arg0: i32) -> (i32, i32) {
    %c0_i32 = arith.constant 0 : i32
    %c0_i32_0 = arith.constant 0 : i32
    %c0_i32_1 = arith.constant 0 : i32
    return %c0_i32, %c0_i32_0 : i32, i32
  }
  func.func @transform_7(%arg0: i32) -> (i32, i32) {
    %c0_i32 = arith.constant 0 : i32
    %c0_i32_0 = arith.constant 0 : i32
    %c0_i32_1 = arith.constant 0 : i32
    return %c0_i32, %c0_i32_0 : i32, i32
  }
  func.func @transform_8(%arg0: i32) -> (i32, i32) {
    %c0_i32 = arith.constant 0 : i32
    %c0_i32_0 = arith.constant 0 : i32
    %c0_i32_1 = arith.constant 0 : i32
    return %c0_i32, %c0_i32_0 : i32, i32
  }
  func.func @transform_9(%arg0: i32) -> (i32, i32) {
    %c0_i32 = arith.constant 0 : i32
    %c0_i32_0 = arith.constant 0 : i32
    return %arg0, %c0_i32 : i32, i32
  }
  func.func @transform_10(%arg0: i32) -> (i32, i32) {
    %c0_i32 = arith.constant 0 : i32
    %c0_i32_0 = arith.constant 0 : i32
    return %arg0, %c0_i32 : i32, i32
  }
  func.func @transform_11(%arg0: i32) -> (i32, i32) {
    %c0_i32 = arith.constant 0 : i32
    %c0_i32_0 = arith.constant 0 : i32
    return %arg0, %c0_i32 : i32, i32
  }
  func.func @transform_12(%arg0: i32) -> (i32, i32) {
    %c0_i32 = arith.constant 0 : i32
    %c0_i32_0 = arith.constant 0 : i32
    return %arg0, %c0_i32 : i32, i32
  }
}

</mosaic_0001>

<bundles_post_ra>
// kernel: tpu_custom_call.1
= control target key start
LH: loop header
LB: loop body
LE: loop exit
PB: predicated region body
PF: predicated region fallthrough
CT: control target
= control target key end

     0   :  { %s2256_s0 = inlined_call_operand.hbm [shape: f32[16,128], index: 0, kind: input, shape index: {}]   ;;  %s2257_s1 = inlined_call_operand.hbm [shape: f32[512,128], index: 1, kind: input, shape index: {}]   ;;  %s2258_s2 = inlined_call_operand.vmem [shape: f32[1,128], index: 2, kind: input, shape index: {}]   ;;  %s2259_s3 = inlined_call_operand.hbm [shape: f32[512,128], index: 3, kind: input, shape index: {}]   ;;  %s2260_s4 = inlined_call_operand.vmem [shape: f32[1,128], index: 4, kind: input, shape index: {}]   ;;  %s2261_s5 = inlined_call_operand.hbm [shape: f32[512,128], index: 5, kind: input, shape index: {}]   ;;  %s2262_s6 = inlined_call_operand.vmem [shape: f32[1,128], index: 6, kind: input, shape index: {}]   ;;  %s2263_s7 = inlined_call_operand.hbm [shape: f32[512,128], index: 7, kind: input, shape index: {}]   ;;  %s2264_s8 = inlined_call_operand.vmem [shape: f32[1,128], index: 8, kind: input, shape index: {}]   ;;  %s2265_s9 = inlined_call_operand.hbm [shape: f32[16,128], index: 9, kind: output, shape index: {0}]   ;;  %s2266_s10 = inlined_call_operand.hbm [shape: f32[16,128], index: 10, kind: output, shape index: {1}]   ;;  %s2267_s11 = inlined_call_operand.hbm [shape: f32[16,128], index: 11, kind: output, shape index: {2}]   ;;  %s2268_s12 = inlined_call_operand.hbm [shape: f32[16,128], index: 12, kind: output, shape index: {3}]  }
   0x1   :  { %2274 = sst [smem:[#allocation27_spill]] %s2256_s0 }
   0x2   :  { %2275 = sst [smem:[#allocation28_spill]] %s2257_s1 }
   0x3   :  { %2276 = sst [smem:[#allocation29_spill]] %s2258_s2 }
   0x4   :  { %2277 = sst [smem:[#allocation30_spill]] %s2259_s3 }
   0x5   :  { %2278 = sst [smem:[#allocation31_spill]] %s2261_s5 }
   0x6   :  { %2279 = sst [smem:[#allocation32_spill]] %s2263_s7 }
   0x7   :  { %18 = vsyncpa [#allocation4], 0 }
   0x8   :  { %20 = vsyncpa [#allocation4 + $0x1], 0 }
   0x9   :  { %21 = vsyncpa [#allocation7], 0 }
   0xa   :  { %22 = vsyncpa [#allocation10], 0 }
   0xb   :  { %23 = vsyncpa [#allocation5], 0 }
   0xc   :  { %25 = vsyncpa [#allocation5 + $0x1], 0 }
   0xd   :  { %26 = vsyncpa [#allocation14], 0 }
   0xe   :  { %28 = vsyncpa [#allocation14 + $0x1], 0 }
   0xf   :  { %29 = vsyncpa [#allocation17], 0 }
  0x10   :  { %31 = vsyncpa [#allocation17 + $0x1], 0  ;;  %s2002_s21 = smov 0   ;;  %s2004_s22 = smov 0  }
  0x11   :  { %s2006_s23 = smov 0   ;;  %s2008_s24 = smov 0  }
  0x12 LB: > { %2280 = sst [smem:[#allocation24_spill]] %s1925_s23  ;;  %s2026_s28 = sadd.s32 4294967295, %s1929_s24   ;;  %s1929_s24 = sphi %s2008_s24, %s2299_s24   ;;  %s1925_s23 = sphi %s2006_s23, %s2301_s23   ;;  %s1921_s22 = sphi %s2004_s22, %s2303_s22   ;;  %s1917_s21 = sphi %s2002_s21, %s2302_s21  }
  0x13   : > { %s2281_s1 = sld [smem:[#allocation28_spill]]  ;;  %p1465_p0 = scmp.ge.s32.totalorder %s1929_s24, 1 }
  0x14   : > { %p58_p1 = scmp.eq.s32.totalorder %s2026_s28, 0  ;;  %p340_p2 = scmp.lt.s32.totalorder %s1929_s24, 3 }
  0x15   : > { %s1931_s30 = smov [#allocation6]   ;;  %s2283_s5 = sld [smem:[#allocation31_spill]] }
  0x16   : > { %p2031_p3 = pnand %p1465_p0, %p340_p2  ;;  %s353_s13 = sshll.u32 %s1931_s30, 4  ;;  %s354_s13 = int_to_ptr.vmem [resolvable:$true] %s353_s13 }
  0x17   : > { %s2285_s3 = sld [smem:[#allocation30_spill]]  ;;  %s1932_s25 = smov [#allocation9]  }
  0x18   : > { %p1523_p4 = pneg %p2031_p3  ;;  %s387_s26 = sshll.u32 %s1932_s25, 4  ;;  %s388_s26 = int_to_ptr.vmem [resolvable:$true] %s387_s26 }
  0x19   : > { %s351_s27 = sshll.u32 %s2281_s1, 4  ;;  %s1933_s30 = smov 128   ;;  %s352_s27 = int_to_ptr.hbm [resolvable:$true] %s351_s27 }
  0x1a   : > { %p2043_p6 = pnand %p1523_p4, %p58_p1  ;;  %s1934_s14 = smov 8  }
  0x1b   : > { %s385_s16 = sshll.u32 %s2283_s5, 4  ;;  %s2286_s7 = sld [smem:[#allocation32_spill]]  ;;  %s386_s16 = int_to_ptr.hbm [resolvable:$true] %s385_s16 }
  0x1c   : > { %1526 = dma.hbm_to_vmem [thread:$0]  (!%p2043_p6), %s352_s27, 8192, %s354_s13, [#allocation7], %s1933_s30, %s1933_s30, %s1934_s14  }
  0x1d   : > { %s368_s20 = sshll.u32 %s2285_s3, 4  ;;  %s1935_s19 = smov [#allocation8]   ;;  %s369_s20 = int_to_ptr.hbm [resolvable:$true] %s368_s20 }
  0x1e   : > { %1532 = dma.hbm_to_vmem [thread:$0]  (!%p2043_p6), %s386_s16, 8192, %s388_s26, [#allocation10], %s1933_s30, %s1933_s30, %s1934_s14  }
  0x1f   : > { %s370_s25 = sshll.u32 %s1935_s19, 4  ;;  %s1936_s27 = smov [#allocation11]   ;;  %s371_s25 = int_to_ptr.vmem [resolvable:$true] %s370_s25 }
  0x20   : > { %1529 = dma.hbm_to_vmem [thread:$0]  (!%p2043_p6), %s369_s20, 8192, %s371_s25, [#allocation7], %s1933_s30, %s1933_s30, %s1934_s14  }
  0x21   : > { %s402_s18 = sshll.u32 %s2286_s7, 4  ;;  %s404_s13 = sshll.u32 %s1936_s27, 4  ;;  %s403_s18 = int_to_ptr.hbm [resolvable:$true] %s402_s18  ;;  %s405_s13 = int_to_ptr.vmem [resolvable:$true] %s404_s13 }
  0x22   : > { %1535 = dma.hbm_to_vmem [thread:$0]  (!%p2043_p6), %s403_s18, 8192, %s405_s13, [#allocation10], %s1933_s30, %s1933_s30, %s1934_s14  }
  0x23   : > { %s2269_s1 = sadd.s32 4294967294, %s1929_s24   ;;  %s2063_s16 = sadd.s32 1, %s1929_s24  }
  0x24   : > { %2287 = sst [smem:[#allocation25_spill]] %s2063_s16  ;;  %s41_s26 = ssub.s32 %s1929_s24, %s2063_s16 }
  0x25   : > { %s44_s15 = sadd.s32 1, %s1925_s23  ;;  %p42_p7 = scmp.eq.s32.totalorder %s41_s26, 0 }
  0x26   : > { %p51_p8 = scmp.ne.s32.totalorder %s1925_s23, %s1921_s22  ;;  %p52_p9 = scmp.eq.s32.totalorder %s1929_s24, 0 }
  0x27   : > { %p57_p10 = scmp.ne.s32.totalorder %s1921_s22, %s1917_s21  ;;  %p249_p13 = scmp.eq.s32.totalorder %s2026_s28, 1 }
  0x28   : > { %s2074_s20 = scalar_select %p42_p7, %s1925_s23, %s44_s15  }
  0x29   : > { %p2076_p11 = por %p52_p9, %p51_p8  ;;  %p2082_p12 = por %p58_p1, %p57_p10 }
  0x2a   : > { %2288 = sst [smem:[#allocation26_spill]] %s2074_s20  ;;  %p255_p0 = scmp.eq.s32.totalorder %s2269_s1, 1 }
  0x2b   : > { %p1557_p2 = scmp.lt.s32.totalorder %s1929_s24, 2  ;;  %s421_s30 = sand.u32 1, %s1925_s23  }
  0x2c   : > { %p2091_p4 = por %p249_p13, %p51_p8  ;;  %p2095_p6 = por %p255_p0, %p57_p10 }
  0x2d   : > { %s1471_s25 = sshll.u32 %s421_s30, 3  ;;  %s1472_s27 = sshll.u32 %s1929_s24, 3 }
  0x2e   : > { %s2293_s0 = sld [smem:[#allocation27_spill]]  ;;  %s425_s3 = scalar_lea.vmem [#allocation3], %s1471_s25 }
  0x2f   : > { %s433_s5 = sshll.u32 %s425_s3, 4  ;;  %p2105_p7 = pnand %p1557_p2, %p2076_p11  ;;  %s434_s5 = int_to_ptr.vmem [resolvable:$true] %s433_s5 }
  0x30   : > { %s422_s20 = scalar_lea.sflag [#allocation4], %s421_s30 }
  0x31   : > { %p1737_p9 = pneg %p2105_p7 }
  0x34   : > { %s429_s15 = scalar_lea.hbm %s2293_s0, %s1472_s27  ;;  %s1740_s27 = scalar_lea.hbm %s2293_s0, 16 }
  0x35   : > { %s431_s7 = sshll.u32 %s429_s15, 4  ;;  %s432_s7 = int_to_ptr.hbm [resolvable:$true] %s431_s7 }
  0x36   : > { %s1733_s23 = sshra.s32 %s432_s7, 4  ;;  %s1734_s23 = int_to_ptr.hbm [resolvable:$true] %s1733_s23 }
  0x37   : > { %s1735_s16 = scalar_lea.hbm %s1734_s23, 8  ;;  %p1741_p11 = scmp.lt.s32.totalorder %s1734_s23, %s2293_s0 }
  0x38   : > { %p1736_p8 = scmp.ne.s32.totalorder %s1734_s23, %s1735_s16  ;;  %p1742_p0 = scmp.lt.s32.totalorder %s1740_s27, %s1735_s16 }
  0x3a   : > { %p1738_p10 = pnand %p1737_p9, %p1736_p8  ;;  %p1743_p2 = por %p1742_p0, %p1741_p11 }
  0x3c   : > { %p1739_p13 = pneg %p1738_p10 }
  0x3e   : > { %p1744_p5 = pnand %p1743_p2, %p1739_p13 }
  0x40   : > { %1747 = shalt.err (!%p1744_p5)
}
  0x41   : > { %1539 = dma.hbm_to_vmem [thread:$0]  (!%p2105_p7), %s432_s7, 128, %s434_s5, %s422_s20  }
  0x42   : > { %442 = sbr.rel (%p2031_p3) target bundleno = 721 (0x2d1), region = 56  ;;  %s2122_s30 = sand.u32 (!%p2031_p3), 1, %s1921_s22  }
  0x43   : > { %s2125_s26 = sshll.u32 (!%p2031_p3), %s2122_s30, 3  ;;  %s445_s23 = scalar_lea.sflag (!%p2031_p3), [#allocation4], %s2122_s30 }
  0x44   : > { %s448_s16 = scalar_lea.vmem (!%p2031_p3), [#allocation3], %s2125_s26 }
  0x47   : > { %1892 = dma.done.wait (%p2082_p12), %s445_s23, 128  }
  0x48   : > { %1894 = vsyncadd (%p2082_p12), %s445_s23, 4294967168 }
  0x49   : > { %1896 = dma.done.wait (%p58_p1), [#allocation7], 16384  }
  0x4a   : > { %1898 = vsyncadd (%p58_p1), [#allocation7], 4294950912 }
  0x4b   : > { %1900 = dma.done.wait (%p58_p1), [#allocation10], 16384  }
  0x4c   : > { %1902 = vsyncadd (%p58_p1), [#allocation10], 4294950912  ;;  %v589_v0 = vld [vmem:[#allocation6 + $0x178] sm:$0xff]  ;;  %v588_v2 = vld [vmem:[#allocation6 + $0x170] sm:$0xff]  ;;  %s2295_s2 = sld [smem:[#allocation29_spill]]  ;;  %s2273_s29 = scalar_lea.vmem [#allocation12], %s2125_s26 }
  0x4d   : > { %v557_v1 = vld [vmem:[#allocation6 + $0x78] sm:$0xff]  ;;  %650 = vmatpush.msra.mxu2 %v589_v0  ;;  %v556_v4 = vld [vmem:[#allocation6 + $0x70] sm:$0xff]  ;;  %v587_v6 = vld [vmem:[#allocation6 + $0x168] sm:$0xff]  ;;  %s510_s17 = scalar_lea.vmem [#allocation13], %s2125_s26  ;;  %s517_s3 = scalar_lea.vmem [#allocation15], %s2125_s26 }
  0x4e   : > { %610 = vmatpush.msra.mxu0 %v557_v1  ;;  %v605_v3 = vld [vmem:[#allocation6 + $0x1f8] sm:$0xff]  ;;  %v604_v7 = vld [vmem:[#allocation6 + $0x1f0] sm:$0xff]  ;;  %v555_v8 = vld [vmem:[#allocation6 + $0x68] sm:$0xff]  ;;  %s2160_s27 = sshll.u32 %s2026_s28, 3  ;;  %s2162_s13 = sshll.u32 %s517_s3, 4  ;;  %s1244_s13 = int_to_ptr.vmem [resolvable:$true] %s2162_s13 }
  0x4f   : > { %v573_v5 = vld [vmem:[#allocation6 + $0xf8] sm:$0xff]  ;;  %670 = vmatpush.msra.mxu3 %v605_v3  ;;  %651 = vmatpush.msra.mxu2 %v588_v2  ;;  %v572_v9 = vld [vmem:[#allocation6 + $0xf0] sm:$0xff]  ;;  %v603_v10 = vld [vmem:[#allocation6 + $0x1e8] sm:$0xff]  ;;  %s1192_s5 = sand.u32 1, %s2026_s28   ;;  %s1229_s7 = sshll.u32 %s510_s17, 4  ;;  %s1230_s7 = int_to_ptr.vmem [resolvable:$true] %s1229_s7 }
  0x50   : > { %630 = vmatpush.msra.mxu1 %v573_v5  ;;  %611 = vmatpush.msra.mxu0 %v556_v4  ;;  %v586_v11 = vld [vmem:[#allocation6 + $0x160] sm:$0xff]  ;;  %v571_v13 = vld [vmem:[#allocation6 + $0xe8] sm:$0xff]  ;;  %v585_v16 = vld [vmem:[#allocation6 + $0x158] sm:$0xff]  ;;  %s1213_s25 = scalar_lea.hbm %s2265_s9, %s2160_s27 }
  0x51   : > { %671 = vmatpush.msra.mxu3 %v604_v7  ;;  %v554_v12 = vld [vmem:[#allocation6 + $0x60] sm:$0xff]  ;;  %652 = vmatpush.msra.mxu2 %v587_v6  ;;  %v553_v17 = vld [vmem:[#allocation6 + $0x58] sm:$0xff]  ;;  %v584_v20 = vld [vmem:[#allocation6 + $0x150] sm:$0xff] }
  0x52   : > { %631 = vmatpush.msra.mxu1 %v572_v9  ;;  %612 = vmatpush.msra.mxu0 %v555_v8  ;;  %v602_v14 = vld [vmem:[#allocation6 + $0x1e0] sm:$0xff]  ;;  %v601_v18 = vld [vmem:[#allocation6 + $0x1d8] sm:$0xff]  ;;  %v552_v21 = vld [vmem:[#allocation6 + $0x50] sm:$0xff] }
  0x53   : > { %v570_v15 = vld [vmem:[#allocation6 + $0xe0] sm:$0xff]  ;;  %672 = vmatpush.msra.mxu3 %v603_v10  ;;  %653 = vmatpush.msra.mxu2 %v586_v11  ;;  %v569_v19 = vld [vmem:[#allocation6 + $0xd8] sm:$0xff]  ;;  %v600_v22 = vld [vmem:[#allocation6 + $0x1d0] sm:$0xff] }
  0x54   : > { %632 = vmatpush.msra.mxu1 %v571_v13  ;;  %613 = vmatpush.msra.mxu0 %v554_v12  ;;  %v568_v23 = vld [vmem:[#allocation6 + $0xd0] sm:$0xff]  ;;  %v583_v24 = vld [vmem:[#allocation6 + $0x148] sm:$0xff]  ;;  %v582_v28 = vld [vmem:[#allocation6 + $0x140] sm:$0xff] }
  0x55   : > { %673 = vmatpush.msra.mxu3 %v602_v14  ;;  %654 = vmatpush.msra.mxu2 %v585_v16  ;;  %v551_v25 = vld [vmem:[#allocation6 + $0x48] sm:$0xff]  ;;  %v550_v29 = vld [vmem:[#allocation6 + $0x40] sm:$0xff]  ;;  %v581_v32 = vld [vmem:[#allocation6 + $0x138] sm:$0xff] }
  0x56   : > { %633 = vmatpush.msra.mxu1 %v570_v15  ;;  %614 = vmatpush.msra.mxu0 %v553_v17  ;;  %v599_v26 = vld [vmem:[#allocation6 + $0x1c8] sm:$0xff]  ;;  %v598_v30 = vld [vmem:[#allocation6 + $0x1c0] sm:$0xff]  ;;  %v549_v33 = vld [vmem:[#allocation6 + $0x38] sm:$0xff] }
  0x57   : > { %674 = vmatpush.msra.mxu3 %v601_v18  ;;  %655 = vmatpush.msra.mxu2 %v584_v20  ;;  %v567_v27 = vld [vmem:[#allocation6 + $0xc8] sm:$0xff]  ;;  %v566_v31 = vld [vmem:[#allocation6 + $0xc0] sm:$0xff]  ;;  %v597_v34 = vld [vmem:[#allocation6 + $0x1b8] sm:$0xff] }
  0x58   : > { %634 = vmatpush.msra.mxu1 %v569_v19  ;;  %615 = vmatpush.msra.mxu0 %v552_v21  ;;  %v565_v35 = vld [vmem:[#allocation6 + $0xb8] sm:$0xff]  ;;  %v580_v36 = vld [vmem:[#allocation6 + $0x130] sm:$0xff]  ;;  %v579_v40 = vld [vmem:[#allocation6 + $0x128] sm:$0xff] }
  0x59   : > { %675 = vmatpush.msra.mxu3 %v600_v22  ;;  %656 = vmatpush.msra.mxu2 %v583_v24  ;;  %v548_v37 = vld [vmem:[#allocation6 + $0x30] sm:$0xff]  ;;  %v547_v41 = vld [vmem:[#allocation6 + $0x28] sm:$0xff]  ;;  %v578_v44 = vld [vmem:[#allocation6 + $0x120] sm:$0xff] }
  0x5a   : > { %635 = vmatpush.msra.mxu1 %v568_v23  ;;  %616 = vmatpush.msra.mxu0 %v551_v25  ;;  %v596_v38 = vld [vmem:[#allocation6 + $0x1b0] sm:$0xff]  ;;  %v595_v42 = vld [vmem:[#allocation6 + $0x1a8] sm:$0xff]  ;;  %v546_v45 = vld [vmem:[#allocation6 + $0x20] sm:$0xff] }
  0x5b   : > { %676 = vmatpush.msra.mxu3 %v599_v26  ;;  %657 = vmatpush.msra.mxu2 %v582_v28  ;;  %v564_v39 = vld [vmem:[#allocation6 + $0xb0] sm:$0xff]  ;;  %v563_v43 = vld [vmem:[#allocation6 + $0xa8] sm:$0xff]  ;;  %v594_v47 = vld [vmem:[#allocation6 + $0x1a0] sm:$0xff] }
  0x5c   : > { %636 = vmatpush.msra.mxu1 %v567_v27  ;;  %617 = vmatpush.msra.mxu0 %v550_v29  ;;  %v525_v46 = vld [vmem:[%s448_s16] sm:$0xff]  ;;  %v562_v48 = vld [vmem:[#allocation6 + $0xa0] sm:$0xff]  ;;  %v575_v57 = vld [vmem:[#allocation6 + $0x108] sm:$0xff]  ;;  %s1227_s16 = scalar_lea.hbm %s2266_s10, %s2160_s27 }
  0x5d   : > { %677 = vmatpush.msra.mxu3 %v598_v30  ;;  %658 = vmatpush.msra.mxu2 %v581_v32  ;;  %1605 = vtanh.f32 %v525_v46  ;;  %v577_v49 = vld [vmem:[#allocation6 + $0x118] sm:$0xff]  ;;  %v576_v53 = vld [vmem:[#allocation6 + $0x110] sm:$0xff]  ;;  %v543_v58 = vld [vmem:[#allocation6 + $0x8] sm:$0xff]  ;;  %s1231_s1 = sshll.u32 %s1227_s16, 4  ;;  %s1232_s1 = int_to_ptr.hbm [resolvable:$true] %s1231_s1 }
  0x5e   : > { %637 = vmatpush.msra.mxu1 %v566_v31  ;;  %618 = vmatpush.msra.mxu0 %v549_v33  ;;  %v545_v50 = vld [vmem:[#allocation6 + $0x18] sm:$0xff]  ;;  %v544_v54 = vld [vmem:[#allocation6 + $0x10] sm:$0xff]  ;;  %v574_v59 = vld [vmem:[#allocation6 + $0x100] sm:$0xff]  ;;  %s1777_s0 = sshra.s32 %s1232_s1, 4  ;;  %s1778_s0 = int_to_ptr.hbm [resolvable:$true] %s1777_s0 }
  0x5f   : > { %678 = vmatpush.msra.mxu3 %v597_v34  ;;  %659 = vmatpush.msra.mxu2 %v580_v36  ;;  %v593_v51 = vld [vmem:[#allocation6 + $0x198] sm:$0xff]  ;;  %v592_v55 = vld [vmem:[#allocation6 + $0x190] sm:$0xff]  ;;  %v591_v61 = vld [vmem:[#allocation6 + $0x188] sm:$0xff]  ;;  %p1784_p12 = scmp.lt.s32.totalorder %s1778_s0, %s2266_s10 }
  0x60   : > { %638 = vmatpush.msra.mxu1 %v565_v35  ;;  %619 = vmatpush.msra.mxu0 %v548_v37  ;;  %v561_v52 = vld [vmem:[#allocation6 + $0x98] sm:$0xff]  ;;  %v560_v56 = vld [vmem:[#allocation6 + $0x90] sm:$0xff]  ;;  %v559_v62 = vld [vmem:[#allocation6 + $0x88] sm:$0xff] }
  0x61   : > { %679 = vmatpush.msra.mxu3 %v596_v38  ;;  %660 = vmatpush.msra.mxu2 %v579_v40  ;;  %v542_v0 = vld [vmem:[#allocation6] sm:$0xff]  ;;  %v722_v4 = vld [vmem:[#allocation8 + $0x78] sm:$0xff]  ;;  %v721_v7 = vld [vmem:[#allocation8 + $0x70] sm:$0xff] }
  0x62   : > { %639 = vmatpush.msra.mxu1 %v564_v39  ;;  %620 = vmatpush.msra.mxu0 %v547_v41  ;;  %v590_v1 = vld [vmem:[#allocation6 + $0x180] sm:$0xff]  ;;  %v754_v5 = vld [vmem:[#allocation8 + $0x178] sm:$0xff]  ;;  %v753_v9 = vld [vmem:[#allocation8 + $0x170] sm:$0xff] }
  0x63   : > { %680 = vmatpush.msra.mxu3 %v595_v42  ;;  %661 = vmatpush.msra.mxu2 %v578_v44  ;;  %v1606_v60 = vpop.eup %1605  ;;  %v558_v3 = vld [vmem:[#allocation6 + $0x80] sm:$0xff]  ;;  %v738_v8 = vld [vmem:[#allocation8 + $0xf8] sm:$0xff]  ;;  %v720_v12 = vld [vmem:[#allocation8 + $0x68] sm:$0xff] }
  0x64   : > { %640 = vmatpush.msra.mxu1 %v563_v43  ;;  %621 = vmatpush.msra.mxu0 %v546_v45  ;;  %v528_v63 = vmul.f32 2.0, %v1606_v60  ;;  %v770_v10 = vld [vmem:[#allocation8 + $0x1f8] sm:$0xff]  ;;  %v737_v13 = vld [vmem:[#allocation8 + $0xf0] sm:$0xff]  ;;  %v719_v15 = vld [vmem:[#allocation8 + $0x60] sm:$0xff] }
  0x65   : > { %681 = vmatpush.msra.mxu3 %v594_v47  ;;  %662 = vmatpush.msra.mxu2 %v577_v49  ;;  %v736_v16 = vld [vmem:[#allocation8 + $0xe8] sm:$0xff]  ;;  %v718_v19 = vld [vmem:[#allocation8 + $0x58] sm:$0xff]  ;;  %v735_v20 = vld [vmem:[#allocation8 + $0xe0] sm:$0xff] }
  0x66   : > { %641 = vmatpush.msra.mxu1 %v562_v48  ;;  %622 = vmatpush.msra.mxu0 %v545_v50  ;;  %v529_v2 = vmul.f32 %v1606_v60, %v528_v63  ;;  %v752_v17 = vld [vmem:[#allocation8 + $0x168] sm:$0xff]  ;;  %v717_v22 = vld [vmem:[#allocation8 + $0x50] sm:$0xff]  ;;  %v734_v23 = vld [vmem:[#allocation8 + $0xd8] sm:$0xff] }
  0x67   : > { %682 = vmatpush.msra.mxu3 %v593_v51  ;;  %663 = vmatpush.msra.mxu2 %v576_v53  ;;  %v716_v24 = vld [vmem:[#allocation8 + $0x48] sm:$0xff]  ;;  %v715_v25 = vld [vmem:[#allocation8 + $0x40] sm:$0xff]  ;;  %v714_v26 = vld [vmem:[#allocation8 + $0x38] sm:$0xff] }
  0x68   : > { %642 = vmatpush.msra.mxu1 %v561_v52  ;;  %623 = vmatpush.msra.mxu0 %v544_v54  ;;  %v1483_v6 = vadd.f32 -1.0, %v529_v2  ;;  %v733_v27 = vld [vmem:[#allocation8 + $0xd0] sm:$0xff]  ;;  %v751_v28 = vld [vmem:[#allocation8 + $0x160] sm:$0xff]  ;;  %v732_v31 = vld [vmem:[#allocation8 + $0xc8] sm:$0xff] }
  0x69   : > { %683 = vmatpush.msra.mxu3 %v592_v55  ;;  %664 = vmatpush.msra.mxu2 %v575_v57  ;;  %v769_v29 = vld [vmem:[#allocation8 + $0x1f0] sm:$0xff]  ;;  %v750_v32 = vld [vmem:[#allocation8 + $0x158] sm:$0xff]  ;;  %v768_v33 = vld [vmem:[#allocation8 + $0x1e8] sm:$0xff] }
  0x6a   : > { %643 = vmatpush.msra.mxu1 %v560_v56  ;;  %624 = vmatpush.msra.mxu0 %v543_v58  ;;  %v532_v11 = vmul.f32 %v1483_v6, %v528_v63  ;;  %v713_v30 = vld [vmem:[#allocation8 + $0x30] sm:$0xff]  ;;  %v712_v34 = vld [vmem:[#allocation8 + $0x28] sm:$0xff]  ;;  %v731_v35 = vld [vmem:[#allocation8 + $0xc0] sm:$0xff] }
  0x6b   : > { %684 = vmatpush.msra.mxu3 %v591_v61  ;;  %665 = vmatpush.msra.mxu2 %v574_v59  ;;  %v749_v36 = vld [vmem:[#allocation8 + $0x150] sm:$0xff]  ;;  %v767_v37 = vld [vmem:[#allocation8 + $0x1e0] sm:$0xff]  ;;  %v730_v39 = vld [vmem:[#allocation8 + $0xb8] sm:$0xff] }
  0x6c   : > { %644 = vmatpush.msra.mxu1 %v559_v62  ;;  %625 = vmatpush.msra.mxu0 %v542_v0  ;;  %v533_v14 = vsub.f32 %v532_v11, %v1606_v60  ;;  %v711_v38 = vld [vmem:[#allocation8 + $0x20] sm:$0xff]  ;;  %v748_v40 = vld [vmem:[#allocation8 + $0x148] sm:$0xff]  ;;  %v766_v41 = vld [vmem:[#allocation8 + $0x1d8] sm:$0xff] }
  0x6d   : > { %685 = vmatpush.msra.mxu3 %v590_v1  ;;  %626 = vmatmul.f32.vlgmr.msra.gmra.mxu0 %v1606_v60  ;;  %v710_v42 = vld [vmem:[#allocation8 + $0x18] sm:$0xff]  ;;  %v729_v43 = vld [vmem:[#allocation8 + $0xb0] sm:$0xff]  ;;  %v747_v44 = vld [vmem:[#allocation8 + $0x140] sm:$0xff] }
  0x6e   : > { %645 = vmatpush.msra.mxu1 %v558_v3  ;;  %775 = vmatpush.msrb.mxu0 %v722_v4  ;;  %v535_v18 = vmul.f32 %v533_v14, %v528_v63  ;;  %v765_v45 = vld [vmem:[#allocation8 + $0x1d0] sm:$0xff]  ;;  %v728_v47 = vld [vmem:[#allocation8 + $0xa8] sm:$0xff]  ;;  %v746_v48 = vld [vmem:[#allocation8 + $0x138] sm:$0xff] }
  0x6f   : > { %646 = vmatmul.f32.vlgmr.msra.gmra.mxu1 %v1483_v6  ;;  %815 = vmatpush.msrb.mxu2 %v754_v5  ;;  %v709_v46 = vld [vmem:[#allocation8 + $0x10] sm:$0xff]  ;;  %v764_v49 = vld [vmem:[#allocation8 + $0x1c8] sm:$0xff]  ;;  %v727_v51 = vld [vmem:[#allocation8 + $0xa0] sm:$0xff] }
  0x70   : > { %776 = vmatpush.msrb.mxu0 %v721_v7  ;;  %795 = vmatpush.msrb.mxu1 %v738_v8  ;;  %v536_v21 = vsub.f32 %v535_v18, %v1483_v6  ;;  %v708_v50 = vld [vmem:[#allocation8 + $0x8] sm:$0xff]  ;;  %v745_v52 = vld [vmem:[#allocation8 + $0x130] sm:$0xff]  ;;  %v763_v53 = vld [vmem:[#allocation8 + $0x1c0] sm:$0xff] }
  0x71   : > { %816 = vmatpush.msrb.mxu2 %v753_v9  ;;  %835 = vmatpush.msrb.mxu3 %v770_v10  ;;  %v707_v54 = vld [vmem:[#allocation8] sm:$0xff]  ;;  %v726_v55 = vld [vmem:[#allocation8 + $0x98] sm:$0xff]  ;;  %v744_v56 = vld [vmem:[#allocation8 + $0x128] sm:$0xff] }
  0x72   : > { %777 = vmatpush.msrb.mxu0 %v720_v12  ;;  %796 = vmatpush.msrb.mxu1 %v737_v13  ;;  %v762_v57 = vld [vmem:[#allocation8 + $0x1b8] sm:$0xff]  ;;  %v725_v58 = vld [vmem:[#allocation8 + $0x90] sm:$0xff]  ;;  %v743_v59 = vld [vmem:[#allocation8 + $0x120] sm:$0xff] }
  0x73   : > { %666 = vmatmul.f32.vlgmr.msra.gmra.mxu2 %v533_v14  ;;  %686 = vmatmul.f32.vlgmr.msra.gmra.mxu3 %v536_v21  ;;  %v761_v60 = vld [vmem:[#allocation8 + $0x1b0] sm:$0xff]  ;;  %v724_v61 = vld [vmem:[#allocation8 + $0x88] sm:$0xff]  ;;  %v742_v62 = vld [vmem:[#allocation8 + $0x118] sm:$0xff] }
  0x74   : > { %778 = vmatpush.msrb.mxu0 %v719_v15  ;;  %797 = vmatpush.msrb.mxu1 %v736_v16  ;;  %v760_v63 = vld [vmem:[#allocation8 + $0x1a8] sm:$0xff]  ;;  %v723_v0 = vld [vmem:[#allocation8 + $0x80] sm:$0xff]  ;;  %v741_v1 = vld [vmem:[#allocation8 + $0x110] sm:$0xff] }
  0x75   : > { %817 = vmatpush.msrb.mxu2 %v752_v17  ;;  %836 = vmatpush.msrb.mxu3 %v769_v29  ;;  %v759_v2 = vld [vmem:[#allocation8 + $0x1a0] sm:$0xff]  ;;  %v740_v3 = vld [vmem:[#allocation8 + $0x108] sm:$0xff]  ;;  %v758_v4 = vld [vmem:[#allocation8 + $0x198] sm:$0xff] }
  0x76   : > { %779 = vmatpush.msrb.mxu0 %v718_v19  ;;  %798 = vmatpush.msrb.mxu1 %v735_v20  ;;  %v1601_v5 = vld [vmem:[%s2295_s2] ss:$0 sm:$0xff]  ;;  %v739_v6 = vld [vmem:[#allocation8 + $0x100] sm:$0xff]  ;;  %v756_v9 = vld [vmem:[#allocation8 + $0x188] sm:$0xff] }
  0x77   : > { %818 = vmatpush.msrb.mxu2 %v751_v28  ;;  %837 = vmatpush.msrb.mxu3 %v768_v33  ;;  %v757_v7 = vld [vmem:[#allocation8 + $0x190] sm:$0xff]  ;;  %v755_v11 = vld [vmem:[#allocation8 + $0x180] sm:$0xff]  ;;  %v887_v13 = vld [vmem:[#allocation9 + $0x78] sm:$0xff] }
  0x78   : > { %780 = vmatpush.msrb.mxu0 %v717_v22  ;;  %799 = vmatpush.msrb.mxu1 %v734_v23  ;;  %v885_v28 = vld [vmem:[#allocation9 + $0x68] sm:$0xff]  ;;  %v903_v29 = vld [vmem:[#allocation9 + $0xf8] sm:$0xff]  ;;  %v882_v33 = vld [vmem:[#allocation9 + $0x50] sm:$0xff] }
  0x79   : > { %819 = vmatpush.msrb.mxu2 %v750_v32  ;;  %838 = vmatpush.msrb.mxu3 %v767_v37  ;;  %v902_v32 = vld [vmem:[#allocation9 + $0xf0] sm:$0xff]  ;;  %v900_v37 = vld [vmem:[#allocation9 + $0xe0] sm:$0xff] }
  0x7a   : > { %781 = vmatpush.msrb.mxu0 %v716_v24  ;;  %800 = vmatpush.msrb.mxu1 %v733_v27  ;;  %v886_v27 = vld [vmem:[#allocation9 + $0x70] sm:$0xff] }
  0x7b   : > { %820 = vmatpush.msrb.mxu2 %v749_v36  ;;  %839 = vmatpush.msrb.mxu3 %v766_v41  ;;  %v881_v36 = vld [vmem:[#allocation9 + $0x48] sm:$0xff]  ;;  %v899_v41 = vld [vmem:[#allocation9 + $0xd8] sm:$0xff] }
  0x7c   : > { %782 = vmatpush.msrb.mxu0 %v715_v25  ;;  %801 = vmatpush.msrb.mxu1 %v732_v31  ;;  %v883_v31 = vld [vmem:[#allocation9 + $0x58] sm:$0xff] }
  0x7d   : > { %821 = vmatpush.msrb.mxu2 %v748_v40  ;;  %840 = vmatpush.msrb.mxu3 %v765_v45  ;;  %v880_v40 = vld [vmem:[#allocation9 + $0x40] sm:$0xff]  ;;  %v879_v45 = vld [vmem:[#allocation9 + $0x38] sm:$0xff] }
  0x7e   : > { %783 = vmatpush.msrb.mxu0 %v714_v26  ;;  %802 = vmatpush.msrb.mxu1 %v731_v35  ;;  %v919_v35 = vld [vmem:[#allocation9 + $0x178] sm:$0xff] }
  0x7f   : > { %822 = vmatpush.msrb.mxu2 %v747_v44  ;;  %841 = vmatpush.msrb.mxu3 %v764_v49  ;;  %v934_v44 = vld [vmem:[#allocation9 + $0x1f0] sm:$0xff]  ;;  %v915_v49 = vld [vmem:[#allocation9 + $0x158] sm:$0xff] }
  0x80   : > { %784 = vmatpush.msrb.mxu0 %v713_v30  ;;  %803 = vmatpush.msrb.mxu1 %v730_v39  ;;  %v884_v30 = vld [vmem:[#allocation9 + $0x60] sm:$0xff]  ;;  %v917_v39 = vld [vmem:[#allocation9 + $0x168] sm:$0xff] }
  0x81   : > { %823 = vmatpush.msrb.mxu2 %v746_v48  ;;  %842 = vmatpush.msrb.mxu3 %v763_v53  ;;  %v897_v48 = vld [vmem:[#allocation9 + $0xc8] sm:$0xff]  ;;  %v914_v53 = vld [vmem:[#allocation9 + $0x150] sm:$0xff] }
  0x82   : > { %785 = vmatpush.msrb.mxu0 %v712_v34  ;;  %804 = vmatpush.msrb.mxu1 %v729_v43  ;;  %v901_v34 = vld [vmem:[#allocation9 + $0xe8] sm:$0xff]  ;;  %v916_v43 = vld [vmem:[#allocation9 + $0x160] sm:$0xff] }
  0x83   : > { %824 = vmatpush.msrb.mxu2 %v745_v52  ;;  %843 = vmatpush.msrb.mxu3 %v762_v57  ;;  %v896_v52 = vld [vmem:[#allocation9 + $0xc0] sm:$0xff]  ;;  %v913_v57 = vld [vmem:[#allocation9 + $0x148] sm:$0xff] }
  0x84   : > { %786 = vmatpush.msrb.mxu0 %v711_v38  ;;  %805 = vmatpush.msrb.mxu1 %v728_v47  ;;  %v918_v38 = vld [vmem:[#allocation9 + $0x170] sm:$0xff] }
  0x85   : > { %825 = vmatpush.msrb.mxu2 %v744_v56  ;;  %844 = vmatpush.msrb.mxu3 %v761_v60  ;;  %v878_v47 = vld [vmem:[#allocation9 + $0x30] sm:$0xff]  ;;  %v895_v56 = vld [vmem:[#allocation9 + $0xb8] sm:$0xff] }
  0x86   : > { %787 = vmatpush.msrb.mxu0 %v710_v42  ;;  %806 = vmatpush.msrb.mxu1 %v727_v51  ;;  %v935_v42 = vld [vmem:[#allocation9 + $0x1f8] sm:$0xff]  ;;  %v877_v51 = vld [vmem:[#allocation9 + $0x28] sm:$0xff]  ;;  %v894_v60 = vld [vmem:[#allocation9 + $0xb0] sm:$0xff] }
  0x87   : > { %826 = vmatpush.msrb.mxu2 %v743_v59  ;;  %845 = vmatpush.msrb.mxu3 %v760_v63  ;;  %v875_v59 = vld [vmem:[#allocation9 + $0x18] sm:$0xff]  ;;  %v874_v63 = vld [vmem:[#allocation9 + $0x10] sm:$0xff] }
  0x88   : > { %788 = vmatpush.msrb.mxu0 %v709_v46  ;;  %807 = vmatpush.msrb.mxu1 %v726_v55  ;;  %v898_v46 = vld [vmem:[#allocation9 + $0xd0] sm:$0xff]  ;;  %v876_v55 = vld [vmem:[#allocation9 + $0x20] sm:$0xff] }
  0x89   : > { %827 = vmatpush.msrb.mxu2 %v742_v62  ;;  %846 = vmatpush.msrb.mxu3 %v759_v2  ;;  %v930_v62 = vld [vmem:[#allocation9 + $0x1d0] sm:$0xff]  ;;  %v929_v2 = vld [vmem:[#allocation9 + $0x1c8] sm:$0xff] }
  0x8a   : > { %789 = vmatpush.msrb.mxu0 %v708_v50  ;;  %808 = vmatpush.msrb.mxu1 %v725_v58  ;;  %v933_v50 = vld [vmem:[#allocation9 + $0x1e8] sm:$0xff]  ;;  %v931_v58 = vld [vmem:[#allocation9 + $0x1d8] sm:$0xff] }
  0x8b   : > { %828 = vmatpush.msrb.mxu2 %v741_v1  ;;  %847 = vmatpush.msrb.mxu3 %v758_v4  ;;  %v911_v1 = vld [vmem:[#allocation9 + $0x138] sm:$0xff]  ;;  %v892_v4 = vld [vmem:[#allocation9 + $0xa0] sm:$0xff] }
  0x8c   : > { %790 = vmatpush.msrb.mxu0 %v707_v54  ;;  %809 = vmatpush.msrb.mxu1 %v724_v61  ;;  %v932_v54 = vld [vmem:[#allocation9 + $0x1e0] sm:$0xff] }
  0x8d   : > { %829 = vmatpush.msrb.mxu2 %v740_v3  ;;  %848 = vmatpush.msrb.mxu3 %v757_v7  ;;  %v912_v61 = vld [vmem:[#allocation9 + $0x140] sm:$0xff]  ;;  %v873_v3 = vld [vmem:[#allocation9 + $0x8] sm:$0xff] }
  0x8e   : > { %810 = vmatpush.msrb.mxu1 %v723_v0  ;;  %940 = vmatpush.msra.mxu0 %v887_v13  ;;  %v893_v0 = vld [vmem:[#allocation9 + $0xa8] sm:$0xff]  ;;  %v872_v7 = vld [vmem:[#allocation9] sm:$0xff]  ;;  %v926_v13 = vld [vmem:[#allocation9 + $0x1b0] sm:$0xff] }
  0x8f   : > { %830 = vmatpush.msrb.mxu2 %v739_v6  ;;  %849 = vmatpush.msrb.mxu3 %v756_v9  ;;  %v928_v6 = vld [vmem:[#allocation9 + $0x1c0] sm:$0xff]  ;;  %v909_v9 = vld [vmem:[#allocation9 + $0x128] sm:$0xff] }
  0x90   : > { %941 = vmatpush.msra.mxu0 %v886_v27  ;;  %960 = vmatpush.msra.mxu1 %v903_v29 }
  0x91   : > { %850 = vmatpush.msrb.mxu3 %v755_v11  ;;  %980 = vmatpush.msra.mxu2 %v919_v35  ;;  %v890_v11 = vld [vmem:[#allocation9 + $0x90] sm:$0xff] }
  0x92   : > { %942 = vmatpush.msra.mxu0 %v885_v28  ;;  %961 = vmatpush.msra.mxu1 %v902_v32  ;;  %v1052_v28 = vld [vmem:[#allocation11 + $0x78] sm:$0xff] }
  0x93   : > { %981 = vmatpush.msra.mxu2 %v918_v38  ;;  %1000 = vmatpush.msra.mxu3 %v935_v42 }
  0x94   : > { %943 = vmatpush.msra.mxu0 %v884_v30  ;;  %962 = vmatpush.msra.mxu1 %v901_v34 }
  0x95   : > { %982 = vmatpush.msra.mxu2 %v917_v39  ;;  %1001 = vmatpush.msra.mxu3 %v934_v44  ;;  %v1051_v44 = vld [vmem:[#allocation11 + $0x70] sm:$0xff] }
  0x96   : > { %944 = vmatpush.msra.mxu0 %v883_v31  ;;  %963 = vmatpush.msra.mxu1 %v900_v37 }
  0x97   : > { %983 = vmatpush.msra.mxu2 %v916_v43  ;;  %1002 = vmatpush.msra.mxu3 %v933_v50  ;;  %v1047_v50 = vld [vmem:[#allocation11 + $0x50] sm:$0xff] }
  0x98   : > { %945 = vmatpush.msra.mxu0 %v882_v33  ;;  %964 = vmatpush.msra.mxu1 %v899_v41 }
  0x99   : > { %984 = vmatpush.msra.mxu2 %v915_v49  ;;  %1003 = vmatpush.msra.mxu3 %v932_v54  ;;  %v1067_v49 = vld [vmem:[#allocation11 + $0xf0] sm:$0xff]  ;;  %v1065_v54 = vld [vmem:[#allocation11 + $0xe0] sm:$0xff] }
  0x9a   : > { %946 = vmatpush.msra.mxu0 %v881_v36  ;;  %965 = vmatpush.msra.mxu1 %v898_v46  ;;  %v1068_v46 = vld [vmem:[#allocation11 + $0xf8] sm:$0xff] }
  0x9b   : > { %985 = vmatpush.msra.mxu2 %v914_v53  ;;  %1004 = vmatpush.msra.mxu3 %v931_v58  ;;  %v1046_v53 = vld [vmem:[#allocation11 + $0x48] sm:$0xff]  ;;  %v1064_v58 = vld [vmem:[#allocation11 + $0xd8] sm:$0xff] }
  0x9c   : > { %947 = vmatpush.msra.mxu0 %v880_v40  ;;  %966 = vmatpush.msra.mxu1 %v897_v48  ;;  %v1048_v48 = vld [vmem:[#allocation11 + $0x58] sm:$0xff] }
  0x9d   : > { %986 = vmatpush.msra.mxu2 %v913_v57  ;;  %1005 = vmatpush.msra.mxu3 %v930_v62  ;;  %v1045_v57 = vld [vmem:[#allocation11 + $0x40] sm:$0xff]  ;;  %v1044_v62 = vld [vmem:[#allocation11 + $0x38] sm:$0xff] }
  0x9e   : > { %948 = vmatpush.msra.mxu0 %v879_v45  ;;  %967 = vmatpush.msra.mxu1 %v896_v52  ;;  %v1050_v45 = vld [vmem:[#allocation11 + $0x68] sm:$0xff]  ;;  %v1084_v52 = vld [vmem:[#allocation11 + $0x178] sm:$0xff] }
  0x9f   : > { %987 = vmatpush.msra.mxu2 %v912_v61  ;;  %1006 = vmatpush.msra.mxu3 %v929_v2  ;;  %v1099_v61 = vld [vmem:[#allocation11 + $0x1f0] sm:$0xff]  ;;  %v1080_v2 = vld [vmem:[#allocation11 + $0x158] sm:$0xff] }
  0xa0   : > { %949 = vmatpush.msra.mxu0 %v878_v47  ;;  %968 = vmatpush.msra.mxu1 %v895_v56  ;;  %v1049_v47 = vld [vmem:[#allocation11 + $0x60] sm:$0xff]  ;;  %v1082_v56 = vld [vmem:[#allocation11 + $0x168] sm:$0xff] }
  0xa1   : > { %988 = vmatpush.msra.mxu2 %v911_v1  ;;  %1007 = vmatpush.msra.mxu3 %v928_v6  ;;  %v1062_v1 = vld [vmem:[#allocation11 + $0xc8] sm:$0xff]  ;;  %v1079_v6 = vld [vmem:[#allocation11 + $0x150] sm:$0xff] }
  0xa2   : > { %950 = vmatpush.msra.mxu0 %v877_v51  ;;  %969 = vmatpush.msra.mxu1 %v894_v60  ;;  %v1066_v51 = vld [vmem:[#allocation11 + $0xe8] sm:$0xff]  ;;  %v1081_v60 = vld [vmem:[#allocation11 + $0x160] sm:$0xff] }
  0xa4   : > { %951 = vmatpush.msra.mxu0 %v876_v55  ;;  %970 = vmatpush.msra.mxu1 %v893_v0  ;;  %v1083_v55 = vld [vmem:[#allocation11 + $0x170] sm:$0xff] }
  0xa5   : > { %v1043_v0 = vld [vmem:[#allocation11 + $0x30] sm:$0xff] }
  0xa6   : > { %952 = vmatpush.msra.mxu0 %v875_v59  ;;  %971 = vmatpush.msra.mxu1 %v892_v4  ;;  %v1100_v59 = vld [vmem:[#allocation11 + $0x1f8] sm:$0xff]  ;;  %v1042_v4 = vld [vmem:[#allocation11 + $0x28] sm:$0xff] }
  0xa8   : > { %953 = vmatpush.msra.mxu0 %v874_v63  ;;  %v1063_v63 = vld [vmem:[#allocation11 + $0xd0] sm:$0xff] }
  0xaa   : > { %954 = vmatpush.msra.mxu0 %v873_v3  ;;  %v1098_v3 = vld [vmem:[#allocation11 + $0x1e8] sm:$0xff] }
  0xac   : > { %955 = vmatpush.msra.mxu0 %v872_v7  ;;  %v1097_v7 = vld [vmem:[#allocation11 + $0x1e0] sm:$0xff] }
  0xea   : > { %v627_v8 = vpop.f32.mrf.mxu0 }
  0xeb   : > { %v628_v10 = vadd.f32 %v1601_v5, %v627_v8  ;;  %v910_v5 = vld [vmem:[#allocation9 + $0x130] sm:$0xff]  ;;  %v891_v8 = vld [vmem:[#allocation9 + $0x98] sm:$0xff] }
  0xec   : > { %v647_v12 = vpop.f32.mrf.mxu1  ;;  %989 = vmatpush.msra.mxu2 %v910_v5  ;;  %972 = vmatpush.msra.mxu1 %v891_v8  ;;  %v1061_v5 = vld [vmem:[#allocation11 + $0xc0] sm:$0xff] }
  0xed   : > { %v648_v14 = vadd.f32 %v647_v12, %v628_v10  ;;  %v927_v10 = vld [vmem:[#allocation9 + $0x1b8] sm:$0xff]  ;;  %v908_v12 = vld [vmem:[#allocation9 + $0x120] sm:$0xff] }
  0xee   : > { %990 = vmatpush.msra.mxu2 %v909_v9  ;;  %1008 = vmatpush.msra.mxu3 %v927_v10  ;;  %v1041_v8 = vld [vmem:[#allocation11 + $0x20] sm:$0xff]  ;;  %v1060_v9 = vld [vmem:[#allocation11 + $0xb8] sm:$0xff]  ;;  %v1078_v10 = vld [vmem:[#allocation11 + $0x148] sm:$0xff] }
  0xef   : > { %973 = vmatpush.msra.mxu1 %v890_v11  ;;  %v1096_v11 = vld [vmem:[#allocation11 + $0x1d8] sm:$0xff] }
  0xf0   : > { %991 = vmatpush.msra.mxu2 %v908_v12  ;;  %1009 = vmatpush.msra.mxu3 %v926_v13  ;;  %v1040_v12 = vld [vmem:[#allocation11 + $0x18] sm:$0xff]  ;;  %v1059_v13 = vld [vmem:[#allocation11 + $0xb0] sm:$0xff] }
  0xf6   : > { %v667_v15 = vpop.f32.mrf.mxu2  ;;  %v687_v17 = vpop.f32.mrf.mxu3 }
  0xf7   : > { %v668_v16 = vadd.f32 %v667_v15, %v648_v14  ;;  %v889_v14 = vld [vmem:[#allocation9 + $0x88] sm:$0xff]  ;;  %v907_v15 = vld [vmem:[#allocation9 + $0x118] sm:$0xff] }
  0xf8   : > { %974 = vmatpush.msra.mxu1 %v889_v14  ;;  %992 = vmatpush.msra.mxu2 %v907_v15  ;;  %v1077_v14 = vld [vmem:[#allocation11 + $0x140] sm:$0xff]  ;;  %v1095_v15 = vld [vmem:[#allocation11 + $0x1d0] sm:$0xff] }
  0xf9   : > { %v688_v18 = vadd.f32 %v687_v17, %v668_v16  ;;  %v925_v16 = vld [vmem:[#allocation9 + $0x1a8] sm:$0xff]  ;;  %v888_v17 = vld [vmem:[#allocation9 + $0x80] sm:$0xff] }
  0xfa   : > { %1010 = vmatpush.msra.mxu3 %v925_v16  ;;  %975 = vmatpush.msra.mxu1 %v888_v17  ;;  %v1039_v16 = vld [vmem:[#allocation11 + $0x10] sm:$0xff]  ;;  %v1058_v17 = vld [vmem:[#allocation11 + $0xa8] sm:$0xff] }
  0xfb   : > { %690 = vst [vmem:[%s2273_s29] sm:$0xff] %v688_v18  ;;  %1607 = vtanh.f32 %v688_v18  ;;  %v906_v18 = vld [vmem:[#allocation9 + $0x110] sm:$0xff]  ;;  %s2175_s29 = scalar_lea.sflag [#allocation14], %s1192_s5 }
  0xfc   : > { %993 = vmatpush.msra.mxu2 %v906_v18  ;;  %v1076_v18 = vld [vmem:[#allocation11 + $0x138] sm:$0xff] }
 0x101   : > { %v1608_v19 = vpop.eup %1607 }
 0x102   : > { %791 = vmatmul.f32.vlgmr.msrb.gmra.mxu0 %v1608_v19  ;;  %v693_v20 = vmul.f32 2.0, %v1608_v19 }
 0x103   : > { %1105 = vmatpush.msrb.mxu0 %v1052_v28  ;;  %v1055_v28 = vld [vmem:[#allocation11 + $0x90] sm:$0xff] }
 0x104   : > { %v694_v21 = vmul.f32 %v1608_v19, %v693_v20 }
 0x105   : > { %1106 = vmatpush.msrb.mxu0 %v1051_v44 }
 0x106   : > { %v1484_v22 = vadd.f32 -1.0, %v694_v21  ;;  %v923_v21 = vld [vmem:[#allocation9 + $0x198] sm:$0xff] }
 0x107   : > { %1107 = vmatpush.msrb.mxu0 %v1050_v45 }
 0x108   : > { %811 = vmatmul.f32.vlgmr.msrb.gmra.mxu1 %v1484_v22  ;;  %v697_v23 = vmul.f32 %v1484_v22, %v693_v20 }
 0x109   : > { %1125 = vmatpush.msrb.mxu1 %v1068_v46  ;;  %1108 = vmatpush.msrb.mxu0 %v1049_v47 }
 0x10a   : > { %v698_v24 = vsub.f32 %v697_v23, %v1608_v19  ;;  %v924_v19 = vld [vmem:[#allocation9 + $0x1a0] sm:$0xff]  ;;  %v922_v23 = vld [vmem:[#allocation9 + $0x190] sm:$0xff] }
 0x10b   : > { %1011 = vmatpush.msra.mxu3 %v924_v19  ;;  %1109 = vmatpush.msrb.mxu0 %v1048_v48  ;;  %v1094_v19 = vld [vmem:[#allocation11 + $0x1c8] sm:$0xff] }
 0x10c   : > { %831 = vmatmul.f32.vlgmr.msrb.gmra.mxu2 %v698_v24  ;;  %v700_v25 = vmul.f32 %v698_v24, %v693_v20  ;;  %v905_v20 = vld [vmem:[#allocation9 + $0x108] sm:$0xff]  ;;  %1126 = vmatpush.msrb.mxu1 %v1067_v49 }
 0x10d   : > { %994 = vmatpush.msra.mxu2 %v905_v20  ;;  %1012 = vmatpush.msra.mxu3 %v923_v21  ;;  %v921_v24 = vld [vmem:[#allocation9 + $0x188] sm:$0xff]  ;;  %v1057_v21 = vld [vmem:[#allocation11 + $0xa0] sm:$0xff] }
 0x10e   : > { %v701_v26 = vsub.f32 %v700_v25, %v1484_v22  ;;  %v904_v22 = vld [vmem:[#allocation9 + $0x100] sm:$0xff]  ;;  %1110 = vmatpush.msrb.mxu0 %v1047_v50  ;;  %1127 = vmatpush.msrb.mxu1 %v1066_v51  ;;  %v1038_v20 = vld [vmem:[#allocation11 + $0x8] sm:$0xff] }
 0x10f   : > { %995 = vmatpush.msra.mxu2 %v904_v22  ;;  %1013 = vmatpush.msra.mxu3 %v922_v23  ;;  %v920_v25 = vld [vmem:[#allocation9 + $0x180] sm:$0xff]  ;;  %v1075_v22 = vld [vmem:[#allocation11 + $0x130] sm:$0xff] }
 0x110   : > { %851 = vmatmul.f32.vlgmr.msrb.gmra.mxu3 %v701_v26  ;;  %v1602_v26 = vld [vmem:[%s2260_s4] ss:$0 sm:$0xff]  ;;  %1111 = vmatpush.msrb.mxu0 %v1046_v53  ;;  %v1093_v23 = vld [vmem:[#allocation11 + $0x1c0] sm:$0xff] }
 0x111   : > { %1014 = vmatpush.msra.mxu3 %v921_v24  ;;  %1145 = vmatpush.msrb.mxu2 %v1084_v52  ;;  %v1037_v24 = vld [vmem:[#allocation11] sm:$0xff] }
 0x112   : > { %1128 = vmatpush.msrb.mxu1 %v1065_v54  ;;  %1112 = vmatpush.msrb.mxu0 %v1045_v57 }
 0x113   : > { %1015 = vmatpush.msra.mxu3 %v920_v25  ;;  %1146 = vmatpush.msrb.mxu2 %v1083_v55  ;;  %v1056_v25 = vld [vmem:[#allocation11 + $0x98] sm:$0xff] }
 0x114   : > { %1129 = vmatpush.msrb.mxu1 %v1064_v58  ;;  %1113 = vmatpush.msrb.mxu0 %v1044_v62 }
 0x115   : > { %1147 = vmatpush.msrb.mxu2 %v1082_v56  ;;  %1165 = vmatpush.msrb.mxu3 %v1100_v59 }
 0x116   : > { %1130 = vmatpush.msrb.mxu1 %v1063_v63  ;;  %1114 = vmatpush.msrb.mxu0 %v1043_v0 }
 0x117   : > { %1148 = vmatpush.msrb.mxu2 %v1081_v60  ;;  %1166 = vmatpush.msrb.mxu3 %v1099_v61 }
 0x118   : > { %1131 = vmatpush.msrb.mxu1 %v1062_v1  ;;  %1115 = vmatpush.msrb.mxu0 %v1042_v4 }
 0x119   : > { %1149 = vmatpush.msrb.mxu2 %v1080_v2  ;;  %1167 = vmatpush.msrb.mxu3 %v1098_v3 }
 0x11a   : > { %1132 = vmatpush.msrb.mxu1 %v1061_v5  ;;  %1116 = vmatpush.msrb.mxu0 %v1041_v8 }
 0x11b   : > { %1150 = vmatpush.msrb.mxu2 %v1079_v6  ;;  %1168 = vmatpush.msrb.mxu3 %v1097_v7 }
 0x11c   : > { %1133 = vmatpush.msrb.mxu1 %v1060_v9  ;;  %1117 = vmatpush.msrb.mxu0 %v1040_v12 }
 0x11d   : > { %1151 = vmatpush.msrb.mxu2 %v1078_v10  ;;  %1169 = vmatpush.msrb.mxu3 %v1096_v11 }
 0x11e   : > { %1134 = vmatpush.msrb.mxu1 %v1059_v13  ;;  %1118 = vmatpush.msrb.mxu0 %v1039_v16 }
 0x11f   : > { %1152 = vmatpush.msrb.mxu2 %v1077_v14  ;;  %1170 = vmatpush.msrb.mxu3 %v1095_v15 }
 0x120   : > { %1135 = vmatpush.msrb.mxu1 %v1058_v17  ;;  %1119 = vmatpush.msrb.mxu0 %v1038_v20 }
 0x121   : > { %1153 = vmatpush.msrb.mxu2 %v1076_v18  ;;  %1171 = vmatpush.msrb.mxu3 %v1094_v19 }
 0x122   : > { %1136 = vmatpush.msrb.mxu1 %v1057_v21  ;;  %1120 = vmatpush.msrb.mxu0 %v1037_v24 }
 0x123   : > { %1154 = vmatpush.msrb.mxu2 %v1075_v22  ;;  %1172 = vmatpush.msrb.mxu3 %v1093_v23 }
 0x124   : > { %1137 = vmatpush.msrb.mxu1 %v1056_v25 }
 0x126   : > { %1138 = vmatpush.msrb.mxu1 %v1055_v28 }
 0x17f   : > { %v792_v27 = vpop.f32.mrf.mxu0 }
 0x180   : > { %v793_v30 = vadd.f32 %v1602_v26, %v792_v27  ;;  %v1074_v26 = vld [vmem:[#allocation11 + $0x128] sm:$0xff]  ;;  %v1092_v27 = vld [vmem:[#allocation11 + $0x1b8] sm:$0xff] }
 0x181   : > { %1155 = vmatpush.msrb.mxu2 %v1074_v26  ;;  %1173 = vmatpush.msrb.mxu3 %v1092_v27 }
 0x185   : > { %v812_v29 = vpop.f32.mrf.mxu1 }
 0x186   : > { %v813_v32 = vadd.f32 %v812_v29, %v793_v30  ;;  %v1073_v29 = vld [vmem:[#allocation11 + $0x120] sm:$0xff]  ;;  %v1091_v30 = vld [vmem:[#allocation11 + $0x1b0] sm:$0xff] }
 0x187   : > { %1156 = vmatpush.msrb.mxu2 %v1073_v29  ;;  %1174 = vmatpush.msrb.mxu3 %v1091_v30 }
 0x18f   : > { %v832_v31 = vpop.f32.mrf.mxu2 }
 0x190   : > { %v833_v33 = vadd.f32 %v832_v31, %v813_v32  ;;  %v1054_v31 = vld [vmem:[#allocation11 + $0x88] sm:$0xff]  ;;  %v1072_v32 = vld [vmem:[#allocation11 + $0x118] sm:$0xff] }
 0x191   : > { %1139 = vmatpush.msrb.mxu1 %v1054_v31  ;;  %1157 = vmatpush.msrb.mxu2 %v1072_v32 }
 0x193   : > { %v852_v34 = vpop.f32.mrf.mxu3 }
 0x194   : > { %v853_v35 = vadd.f32 %v852_v34, %v833_v33  ;;  %v1090_v33 = vld [vmem:[#allocation11 + $0x1a8] sm:$0xff]  ;;  %v1053_v34 = vld [vmem:[#allocation11 + $0x80] sm:$0xff] }
 0x195   : > { %1175 = vmatpush.msrb.mxu3 %v1090_v33  ;;  %1140 = vmatpush.msrb.mxu1 %v1053_v34 }
 0x196   : > { %855 = vst [vmem:[%s510_s17] sm:$0xff] %v853_v35  ;;  %1609 = vtanh.f32 %v853_v35  ;;  %v1071_v35 = vld [vmem:[#allocation11 + $0x110] sm:$0xff]  ;;  %s1783_s17 = scalar_lea.hbm %s2266_s10, 16 }
 0x197   : > { %1158 = vmatpush.msrb.mxu2 %v1071_v35 }
 0x19c   : > { %v1610_v36 = vpop.eup %1609 }
 0x19d   : > { %956 = vmatmul.f32.vlgmr.msra.gmra.mxu0 %v1610_v36  ;;  %v858_v37 = vmul.f32 2.0, %v1610_v36 }
 0x19f   : > { %v859_v38 = vmul.f32 %v1610_v36, %v858_v37 }
 0x1a1   : > { %v1485_v39 = vadd.f32 -1.0, %v859_v38  ;;  %v1088_v38 = vld [vmem:[#allocation11 + $0x198] sm:$0xff] }
 0x1a3   : > { %976 = vmatmul.f32.vlgmr.msra.gmra.mxu1 %v1485_v39  ;;  %v862_v40 = vmul.f32 %v1485_v39, %v858_v37 }
 0x1a5   : > { %v863_v41 = vsub.f32 %v862_v40, %v1610_v36  ;;  %v1089_v36 = vld [vmem:[#allocation11 + $0x1a0] sm:$0xff]  ;;  %v1087_v40 = vld [vmem:[#allocation11 + $0x190] sm:$0xff] }
 0x1a6   : > { %1176 = vmatpush.msrb.mxu3 %v1089_v36 }
 0x1a7   : > { %996 = vmatmul.f32.vlgmr.msra.gmra.mxu2 %v863_v41  ;;  %v865_v42 = vmul.f32 %v863_v41, %v858_v37  ;;  %v1070_v37 = vld [vmem:[#allocation11 + $0x108] sm:$0xff] }
 0x1a8   : > { %1159 = vmatpush.msrb.mxu2 %v1070_v37  ;;  %1177 = vmatpush.msrb.mxu3 %v1088_v38  ;;  %v1086_v41 = vld [vmem:[#allocation11 + $0x188] sm:$0xff] }
 0x1a9   : > { %v866_v43 = vsub.f32 %v865_v42, %v1485_v39  ;;  %v1069_v39 = vld [vmem:[#allocation11 + $0x100] sm:$0xff] }
 0x1aa   : > { %1160 = vmatpush.msrb.mxu2 %v1069_v39  ;;  %1178 = vmatpush.msrb.mxu3 %v1087_v40  ;;  %v1085_v42 = vld [vmem:[#allocation11 + $0x180] sm:$0xff] }
 0x1ab   : > { %1016 = vmatmul.f32.vlgmr.msra.gmra.mxu3 %v866_v43  ;;  %v1603_v43 = vld [vmem:[%s2262_s6] ss:$0 sm:$0xff] }
 0x1ac   : > { %1179 = vmatpush.msrb.mxu3 %v1086_v41 }
 0x1ae   : > { %1180 = vmatpush.msrb.mxu3 %v1085_v42 }
 0x21a   : > { %v957_v44 = vpop.f32.mrf.mxu0 }
 0x21b   : > { %v958_v46 = vadd.f32 %v1603_v43, %v957_v44 }
 0x220   : > { %v977_v45 = vpop.f32.mrf.mxu1 }
 0x221   : > { %v978_v48 = vadd.f32 %v977_v45, %v958_v46 }
 0x22a   : > { %v997_v47 = vpop.f32.mrf.mxu2 }
 0x22b   : > { %v998_v49 = vadd.f32 %v997_v47, %v978_v48 }
 0x22e   : > { %v1017_v50 = vpop.f32.mrf.mxu3 }
 0x22f   : > { %v1018_v51 = vadd.f32 %v1017_v50, %v998_v49 }
 0x231   : > { %1020 = vst [vmem:[%s517_s3] sm:$0xff] %v1018_v51  ;;  %1611 = vtanh.f32 %v1018_v51  ;;  %s1779_s3 = scalar_lea.hbm %s1778_s0, 8 }
 0x232   : > { %p1780_p1 = scmp.ne.s32.totalorder %s1778_s0, %s1779_s3  ;;  %p1785_p7 = scmp.lt.s32.totalorder %s1783_s17, %s1779_s3 }
 0x234   : > { %p1781_p3 = pnand %p1780_p1, %p2091_p4  ;;  %p1786_p8 = por %p1785_p7, %p1784_p12 }
 0x236   : > { %p1782_p5 = pneg %p1781_p3 }
 0x237   : > { %v1612_v52 = vpop.eup %1611 }
 0x238   : > { %1121 = vmatmul.f32.vlgmr.msrb.gmra.mxu0 %v1612_v52  ;;  %v1023_v53 = vmul.f32 2.0, %v1612_v52  ;;  %p1787_p9 = pnand %p1786_p8, %p1782_p5 }
 0x23a   : > { %v1024_v54 = vmul.f32 %v1612_v52, %v1023_v53 }
 0x23c   : > { %v1486_v55 = vadd.f32 -1.0, %v1024_v54 }
 0x23e   : > { %1141 = vmatmul.f32.vlgmr.msrb.gmra.mxu1 %v1486_v55  ;;  %v1027_v56 = vmul.f32 %v1486_v55, %v1023_v53 }
 0x240   : > { %v1028_v57 = vsub.f32 %v1027_v56, %v1612_v52 }
 0x242   : > { %1161 = vmatmul.f32.vlgmr.msrb.gmra.mxu2 %v1028_v57  ;;  %v1030_v58 = vmul.f32 %v1028_v57, %v1023_v53 }
 0x244   : > { %v1031_v59 = vsub.f32 %v1030_v58, %v1486_v55 }
 0x246   : > { %1181 = vmatmul.f32.vlgmr.msrb.gmra.mxu3 %v1031_v59 }
 0x247   : > { %1790 = shalt.err (!%p1787_p9)
}
 0x248   : > { %1516 = dma.vmem_to_hbm [thread:$0]  (%p2091_p4), %s1230_s7, 128, %s1232_s1, %s2175_s29  }
 0x249   : > { %s2296_s5 = scalar_lea.vmem [#allocation12], %s2125_s26  ;;  %s1217_s15 = sshll.u32 %s1213_s25, 4  ;;  %s1218_s15 = int_to_ptr.hbm [resolvable:$true] %s1217_s15 }
 0x24a   : > { %s1215_s20 = sshll.u32 %s2296_s5, 4  ;;  %s1188_s19 = scalar_lea.sflag [#allocation5], %s2122_s30  ;;  %s1216_s20 = int_to_ptr.vmem [resolvable:$true] %s1215_s20 }
 0x24b   : > { %s1805_s28 = sshra.s32 %s1218_s15, 4  ;;  %s1811_s23 = scalar_lea.hbm %s2265_s9, 16  ;;  %s1806_s28 = int_to_ptr.hbm [resolvable:$true] %s1805_s28 }
 0x24c   : > { %s1807_s0 = scalar_lea.hbm %s1806_s28, 8  ;;  %p1812_p0 = scmp.lt.s32.totalorder %s1806_s28, %s2265_s9 }
 0x24d   : > { %p1808_p10 = scmp.ne.s32.totalorder %s1806_s28, %s1807_s0  ;;  %p1813_p2 = scmp.lt.s32.totalorder %s1811_s23, %s1807_s0 }
 0x24f   : > { %p1809_p13 = pnand %p1808_p10, %p2091_p4  ;;  %p1814_p1 = por %p1813_p2, %p1812_p0 }
 0x251   : > { %p1810_p11 = pneg %p1809_p13 }
 0x253   : > { %p1815_p3 = pnand %p1814_p1, %p1810_p11 }
 0x255   : > { %1818 = shalt.err (!%p1815_p3)
}
 0x256   : > { %1515 = dma.vmem_to_hbm [thread:$0]  (%p2091_p4), %s1216_s20, 128, %s1218_s15, %s1188_s19  }
 0x257   : > { %s1241_s25 = scalar_lea.hbm %s2267_s11, %s2160_s27  ;;  %s1839_s17 = scalar_lea.hbm %s2267_s11, 16 }
 0x258   : > { %s1245_s5 = sshll.u32 %s1241_s25, 4  ;;  %s1246_s5 = int_to_ptr.hbm [resolvable:$true] %s1245_s5 }
 0x259   : > { %s1833_s3 = sshra.s32 %s1246_s5, 4  ;;  %s1834_s3 = int_to_ptr.hbm [resolvable:$true] %s1833_s3 }
 0x25a   : > { %s1835_s2 = scalar_lea.hbm %s1834_s3, 8  ;;  %p1840_p8 = scmp.lt.s32.totalorder %s1834_s3, %s2267_s11 }
 0x25b   : > { %p1836_p5 = scmp.ne.s32.totalorder %s1834_s3, %s1835_s2  ;;  %p1841_p9 = scmp.lt.s32.totalorder %s1839_s17, %s1835_s2 }
 0x25d   : > { %p1837_p12 = pnand %p1836_p5, %p2091_p4  ;;  %p1842_p10 = por %p1841_p9, %p1840_p8 }
 0x25f   : > { %p1838_p7 = pneg %p1837_p12 }
 0x261   : > { %p1843_p13 = pnand %p1842_p10, %p1838_p7 }
 0x263   : > { %1846 = shalt.err (!%p1843_p13)
}
 0x264   : > { %1517 = dma.vmem_to_hbm [thread:$0]  (%p2091_p4), %s1244_s13, 128, %s1246_s5, %s2175_s29   ;;  %v1604_v60 = vld [vmem:[%s2264_s8] ss:$0 sm:$0xff] }
 0x265   : > { %s1255_s1 = scalar_lea.hbm %s2268_s12, %s2160_s27  ;;  %s524_s25 = scalar_lea.vmem [#allocation16], %s2125_s26 }
 0x266   : > { %s1257_s3 = sshll.u32 %s524_s25, 4  ;;  %s1259_s29 = sshll.u32 %s1255_s1, 4  ;;  %s1258_s3 = int_to_ptr.vmem [resolvable:$true] %s1257_s3  ;;  %s1260_s29 = int_to_ptr.hbm [resolvable:$true] %s1259_s29 }
 0x267   : > { %s1203_s13 = scalar_lea.sflag [#allocation17], %s2122_s30  ;;  %s1861_s5 = sshra.s32 %s1260_s29, 4  ;;  %s1862_s5 = int_to_ptr.hbm [resolvable:$true] %s1861_s5 }
 0x268   : > { %s1863_s2 = scalar_lea.hbm %s1862_s5, 8  ;;  %s1867_s0 = scalar_lea.hbm %s2268_s12, 16 }
 0x269   : > { %p1864_p11 = scmp.ne.s32.totalorder %s1862_s5, %s1863_s2  ;;  %p1868_p1 = scmp.lt.s32.totalorder %s1862_s5, %s2268_s12 }
 0x26a   : > { %p1869_p3 = scmp.lt.s32.totalorder %s1867_s0, %s1863_s2 }
 0x26b   : > { %p1865_p0 = pnand %p1864_p11, %p2091_p4 }
 0x26c   : > { %p1870_p5 = por %p1869_p3, %p1868_p1 }
 0x26d   : > { %p1866_p2 = pneg %p1865_p0 }
 0x26f   : > { %p1871_p12 = pnand %p1870_p5, %p1866_p2 }
 0x2b5   : > { %v1122_v61 = vpop.f32.mrf.mxu0 }
 0x2b6   : > { %v1123_v63 = vadd.f32 %v1604_v60, %v1122_v61 }
 0x2bb   : > { %v1142_v62 = vpop.f32.mrf.mxu1 }
 0x2bc   : > { %v1143_v1 = vadd.f32 %v1142_v62, %v1123_v63 }
 0x2c5   : > { %v1162_v0 = vpop.f32.mrf.mxu2 }
 0x2c6   : > { %v1163_v2 = vadd.f32 %v1162_v0, %v1143_v1 }
 0x2c9   : > { %v1182_v3 = vpop.f32.mrf.mxu3 }
 0x2ca   : > { %v1183_v4 = vadd.f32 %v1182_v3, %v1163_v2 }
 0x2cc   : > { %v1185_v5 = vmax.f32 %v1183_v4, 0.0 }
 0x2ce   : > { %1186 = vst [vmem:[%s524_s25] sm:$0xff] %v1185_v5 }
 0x2cf   : > { %1874 = shalt.err (!%p1871_p12)
}
 0x2d0   : > { %1518 = dma.vmem_to_hbm [thread:$0]  (%p2091_p4), %s1258_s3, 128, %s1260_s29, %s1203_s13  }
 0x2d1 PF: > { %s1271_s30 = sand.u32 1, %s1917_s21   ;;  %p2297_p7 = scmp.ge.s32.totalorder %s1929_s24, 2 }
 0x2d2   : > { %s1272_s23 = scalar_lea.sflag [#allocation5], %s1271_s30 }
 0x2d3   : > { %p1541_p8 = pnand %p2297_p7, %p2095_p6 }
 0x2d5   : > { %p1542_p9 = pneg %p1541_p8 }
 0x2d7   : > { %1904 = dma.done.wait (%p1542_p9), %s1272_s23, 128  }
 0x2d8   : > { %1906 = vsyncadd (%p1542_p9), %s1272_s23, 4294967168  ;;  %s2298_s20 = sadd.s32 4294967294, %s1929_s24  }
 0x2d9   : > { %s1281_s15 = sand.u32 1, %s2298_s20  }
 0x2da   : > { %s1282_s19 = scalar_lea.sflag [#allocation14], %s1281_s15 }
 0x2db   : > { %1908 = dma.done.wait (%p1542_p9), %s1282_s19, 256  }
 0x2dc   : > { %1910 = vsyncadd (%p1542_p9), %s1282_s19, 4294967040  ;;  %s1302_s14 = scalar_lea.sflag [#allocation17], %s1271_s30 }
 0x2dd   : > { %1912 = dma.done.wait (%p1542_p9), %s1302_s14, 128  }
 0x2de   : > { %1914 = vsyncadd (%p1542_p9), %s1302_s14, 4294967168  ;;  %s2299_s24 = sld [smem:[#allocation25_spill]]  ;;  %s2302_s21 = smov %s1921_s22 }
 0x2df   : > { %s2300_s16 = sld [smem:[#allocation24_spill]] }
 0x2e0   : > { %s2301_s23 = sld [smem:[#allocation26_spill]] }
 0x2e4   : > { %p34_p4 = scmp.ge.s32.totalorder %s2299_s24, 4  }
 0x2e5   : > { %s2303_s22 = smov %s2300_s16 }
 0x2e6   :  { %36 = sbr.rel (!%p34_p4) target bundleno = 18 (0x12), region = 166 }
 0x2eb   :  { %1308 = vsyncpa [#allocation4], 1 }
 0x2ec   :  { %1310 = vsyncpa [#allocation4 + $0x1], 1 }
 0x2ed   :  { %1311 = vsyncpa [#allocation7], 1 }
 0x2ee   :  { %1312 = vsyncpa [#allocation10], 1 }
 0x2ef   :  { %1313 = vsyncpa [#allocation5], 1 }
 0x2f0   :  { %1315 = vsyncpa [#allocation5 + $0x1], 1 }
 0x2f1   :  { %1316 = vsyncpa [#allocation14], 1 }
 0x2f2   :  { %1318 = vsyncpa [#allocation14 + $0x1], 1 }
 0x2f3   :  { %1319 = vsyncpa [#allocation17], 1 }
 0x2f4   :  { %1321 = vsyncpa [#allocation17 + $0x1], 1 }

// kernel: tpu_custom_call.1
= control target key start
LH: loop header
LB: loop body
LE: loop exit
PB: predicated region body
PF: predicated region fallthrough
CT: control target
= control target key end

     0   :  { %s2256_s0 = inlined_call_operand.hbm [shape: f32[16,128], index: 0, kind: input, shape index: {}]   ;;  %s2257_s1 = inlined_call_operand.hbm [shape: f32[512,128], index: 1, kind: input, shape index: {}]   ;;  %s2258_s2 = inlined_call_operand.vmem [shape: f32[1,128], index: 2, kind: input, shape index: {}]   ;;  %s2259_s3 = inlined_call_operand.hbm [shape: f32[512,128], index: 3, kind: input, shape index: {}]   ;;  %s2260_s4 = inlined_call_operand.vmem [shape: f32[1,128], index: 4, kind: input, shape index: {}]   ;;  %s2261_s5 = inlined_call_operand.hbm [shape: f32[512,128], index: 5, kind: input, shape index: {}]   ;;  %s2262_s6 = inlined_call_operand.vmem [shape: f32[1,128], index: 6, kind: input, shape index: {}]   ;;  %s2263_s7 = inlined_call_operand.hbm [shape: f32[512,128], index: 7, kind: input, shape index: {}]   ;;  %s2264_s8 = inlined_call_operand.vmem [shape: f32[1,128], index: 8, kind: input, shape index: {}]   ;;  %s2265_s9 = inlined_call_operand.hbm [shape: f32[16,128], index: 9, kind: output, shape index: {0}]   ;;  %s2266_s10 = inlined_call_operand.hbm [shape: f32[16,128], index: 10, kind: output, shape index: {1}]   ;;  %s2267_s11 = inlined_call_operand.hbm [shape: f32[16,128], index: 11, kind: output, shape index: {2}]   ;;  %s2268_s12 = inlined_call_operand.hbm [shape: f32[16,128], index: 12, kind: output, shape index: {3}]  }
   0x1   :  { %2274 = sst [smem:[#allocation27_spill]] %s2256_s0 }
   0x2   :  { %2275 = sst [smem:[#allocation28_spill]] %s2257_s1 }
   0x3   :  { %2276 = sst [smem:[#allocation29_spill]] %s2258_s2 }
   0x4   :  { %2277 = sst [smem:[#allocation30_spill]] %s2259_s3 }
   0x5   :  { %2278 = sst [smem:[#allocation31_spill]] %s2261_s5 }
   0x6   :  { %2279 = sst [smem:[#allocation32_spill]] %s2263_s7 }
   0x7   :  { %18 = vsyncpa [#allocation4], 0 }
   0x8   :  { %20 = vsyncpa [#allocation4 + $0x1], 0 }
   0x9   :  { %21 = vsyncpa [#allocation7], 0 }
   0xa   :  { %22 = vsyncpa [#allocation10], 0 }
   0xb   :  { %23 = vsyncpa [#allocation5], 0 }
   0xc   :  { %25 = vsyncpa [#allocation5 + $0x1], 0 }
   0xd   :  { %26 = vsyncpa [#allocation14], 0 }
   0xe   :  { %28 = vsyncpa [#allocation14 + $0x1], 0 }
   0xf   :  { %29 = vsyncpa [#allocation17], 0 }
  0x10   :  { %31 = vsyncpa [#allocation17 + $0x1], 0  ;;  %s2002_s21 = smov 0   ;;  %s2004_s22 = smov 0  }
  0x11   :  { %s2006_s23 = smov 0   ;;  %s2008_s24 = smov 0  }
  0x12 LB: > { %2280 = sst [smem:[#allocation24_spill]] %s1925_s23  ;;  %s2026_s28 = sadd.s32 4294967295, %s1929_s24   ;;  %s1929_s24 = sphi %s2008_s24, %s2299_s24   ;;  %s1925_s23 = sphi %s2006_s23, %s2301_s23   ;;  %s1921_s22 = sphi %s2004_s22, %s2303_s22   ;;  %s1917_s21 = sphi %s2002_s21, %s2302_s21  }
  0x13   : > { %s2281_s1 = sld [smem:[#allocation28_spill]]  ;;  %p1465_p0 = scmp.ge.s32.totalorder %s1929_s24, 1 }
  0x14   : > { %p58_p1 = scmp.eq.s32.totalorder %s2026_s28, 0  ;;  %p340_p2 = scmp.lt.s32.totalorder %s1929_s24, 3 }
  0x15   : > { %s1931_s30 = smov [#allocation6]   ;;  %s2283_s5 = sld [smem:[#allocation31_spill]] }
  0x16   : > { %p2031_p3 = pnand %p1465_p0, %p340_p2  ;;  %s353_s13 = sshll.u32 %s1931_s30, 4  ;;  %s354_s13 = int_to_ptr.vmem [resolvable:$true] %s353_s13 }
  0x17   : > { %s2285_s3 = sld [smem:[#allocation30_spill]]  ;;  %s1932_s25 = smov [#allocation9]  }
  0x18   : > { %p1523_p4 = pneg %p2031_p3  ;;  %s387_s26 = sshll.u32 %s1932_s25, 4  ;;  %s388_s26 = int_to_ptr.vmem [resolvable:$true] %s387_s26 }
  0x19   : > { %s351_s27 = sshll.u32 %s2281_s1, 4  ;;  %s1933_s30 = smov 128   ;;  %s352_s27 = int_to_ptr.hbm [resolvable:$true] %s351_s27 }
  0x1a   : > { %p2043_p6 = pnand %p1523_p4, %p58_p1  ;;  %s1934_s14 = smov 8  }
  0x1b   : > { %s385_s16 = sshll.u32 %s2283_s5, 4  ;;  %s2286_s7 = sld [smem:[#allocation32_spill]]  ;;  %s386_s16 = int_to_ptr.hbm [resolvable:$true] %s385_s16 }
  0x1c   : > { %1526 = dma.hbm_to_vmem [thread:$0]  (!%p2043_p6), %s352_s27, 8192, %s354_s13, [#allocation7], %s1933_s30, %s1933_s30, %s1934_s14  }
  0x1d   : > { %s368_s20 = sshll.u32 %s2285_s3, 4  ;;  %s1935_s19 = smov [#allocation8]   ;;  %s369_s20 = int_to_ptr.hbm [resolvable:$true] %s368_s20 }
  0x1e   : > { %1532 = dma.hbm_to_vmem [thread:$0]  (!%p2043_p6), %s386_s16, 8192, %s388_s26, [#allocation10], %s1933_s30, %s1933_s30, %s1934_s14  }
  0x1f   : > { %s370_s25 = sshll.u32 %s1935_s19, 4  ;;  %s1936_s27 = smov [#allocation11]   ;;  %s371_s25 = int_to_ptr.vmem [resolvable:$true] %s370_s25 }
  0x20   : > { %1529 = dma.hbm_to_vmem [thread:$0]  (!%p2043_p6), %s369_s20, 8192, %s371_s25, [#allocation7], %s1933_s30, %s1933_s30, %s1934_s14  }
  0x21   : > { %s402_s18 = sshll.u32 %s2286_s7, 4  ;;  %s404_s13 = sshll.u32 %s1936_s27, 4  ;;  %s403_s18 = int_to_ptr.hbm [resolvable:$true] %s402_s18  ;;  %s405_s13 = int_to_ptr.vmem [resolvable:$true] %s404_s13 }
  0x22   : > { %1535 = dma.hbm_to_vmem [thread:$0]  (!%p2043_p6), %s403_s18, 8192, %s405_s13, [#allocation10], %s1933_s30, %s1933_s30, %s1934_s14  }
  0x23   : > { %s2269_s1 = sadd.s32 4294967294, %s1929_s24   ;;  %s2063_s16 = sadd.s32 1, %s1929_s24  }
  0x24   : > { %2287 = sst [smem:[#allocation25_spill]] %s2063_s16  ;;  %s41_s26 = ssub.s32 %s1929_s24, %s2063_s16 }
  0x25   : > { %s44_s15 = sadd.s32 1, %s1925_s23  ;;  %p42_p7 = scmp.eq.s32.totalorder %s41_s26, 0 }
  0x26   : > { %p51_p8 = scmp.ne.s32.totalorder %s1925_s23, %s1921_s22  ;;  %p52_p9 = scmp.eq.s32.totalorder %s1929_s24, 0 }
  0x27   : > { %p57_p10 = scmp.ne.s32.totalorder %s1921_s22, %s1917_s21  ;;  %p249_p13 = scmp.eq.s32.totalorder %s2026_s28, 1 }
  0x28   : > { %s2074_s20 = scalar_select %p42_p7, %s1925_s23, %s44_s15  }
  0x29   : > { %p2076_p11 = por %p52_p9, %p51_p8  ;;  %p2082_p12 = por %p58_p1, %p57_p10 }
  0x2a   : > { %2288 = sst [smem:[#allocation26_spill]] %s2074_s20  ;;  %p255_p0 = scmp.eq.s32.totalorder %s2269_s1, 1 }
  0x2b   : > { %p1557_p2 = scmp.lt.s32.totalorder %s1929_s24, 2  ;;  %s421_s30 = sand.u32 1, %s1925_s23  }
  0x2c   : > { %p2091_p4 = por %p249_p13, %p51_p8  ;;  %p2095_p6 = por %p255_p0, %p57_p10 }
  0x2d   : > { %s1471_s25 = sshll.u32 %s421_s30, 3  ;;  %s1472_s27 = sshll.u32 %s1929_s24, 3 }
  0x2e   : > { %s2293_s0 = sld [smem:[#allocation27_spill]]  ;;  %s425_s3 = scalar_lea.vmem [#allocation3], %s1471_s25 }
  0x2f   : > { %s433_s5 = sshll.u32 %s425_s3, 4  ;;  %p2105_p7 = pnand %p1557_p2, %p2076_p11  ;;  %s434_s5 = int_to_ptr.vmem [resolvable:$true] %s433_s5 }
  0x30   : > { %s422_s20 = scalar_lea.sflag [#allocation4], %s421_s30 }
  0x31   : > { %p1737_p9 = pneg %p2105_p7 }
  0x34   : > { %s429_s15 = scalar_lea.hbm %s2293_s0, %s1472_s27  ;;  %s1740_s27 = scalar_lea.hbm %s2293_s0, 16 }
  0x35   : > { %s431_s7 = sshll.u32 %s429_s15, 4  ;;  %s432_s7 = int_to_ptr.hbm [resolvable:$true] %s431_s7 }
  0x36   : > { %s1733_s23 = sshra.s32 %s432_s7, 4  ;;  %s1734_s23 = int_to_ptr.hbm [resolvable:$true] %s1733_s23 }
  0x37   : > { %s1735_s16 = scalar_lea.hbm %s1734_s23, 8  ;;  %p1741_p11 = scmp.lt.s32.totalorder %s1734_s23, %s2293_s0 }
  0x38   : > { %p1736_p8 = scmp.ne.s32.totalorder %s1734_s23, %s1735_s16  ;;  %p1742_p0 = scmp.lt.s32.totalorder %s1740_s27, %s1735_s16 }
  0x3a   : > { %p1738_p10 = pnand %p1737_p9, %p1736_p8  ;;  %p1743_p2 = por %p1742_p0, %p1741_p11 }
  0x3c   : > { %p1739_p13 = pneg %p1738_p10 }
  0x3e   : > { %p1744_p5 = pnand %p1743_p2, %p1739_p13 }
  0x40   : > { %1747 = shalt.err (!%p1744_p5)
}
  0x41   : > { %1539 = dma.hbm_to_vmem [thread:$0]  (!%p2105_p7), %s432_s7, 128, %s434_s5, %s422_s20  }
  0x42   : > { %442 = sbr.rel (%p2031_p3) target bundleno = 721 (0x2d1), region = 56  ;;  %s2122_s30 = sand.u32 (!%p2031_p3), 1, %s1921_s22  }
  0x43   : > { %s2125_s26 = sshll.u32 (!%p2031_p3), %s2122_s30, 3  ;;  %s445_s23 = scalar_lea.sflag (!%p2031_p3), [#allocation4], %s2122_s30 }
  0x44   : > { %s448_s16 = scalar_lea.vmem (!%p2031_p3), [#allocation3], %s2125_s26 }
  0x47   : > { %1892 = dma.done.wait (%p2082_p12), %s445_s23, 128  }
  0x48   : > { %1894 = vsyncadd (%p2082_p12), %s445_s23, 4294967168 }
  0x49   : > { %1896 = dma.done.wait (%p58_p1), [#allocation7], 16384  }
  0x4a   : > { %1898 = vsyncadd (%p58_p1), [#allocation7], 4294950912 }
  0x4b   : > { %1900 = dma.done.wait (%p58_p1), [#allocation10], 16384  }
  0x4c   : > { %1902 = vsyncadd (%p58_p1), [#allocation10], 4294950912  ;;  %v589_v0 = vld [vmem:[#allocation6 + $0x178] sm:$0xff]  ;;  %v588_v2 = vld [vmem:[#allocation6 + $0x170] sm:$0xff]  ;;  %s2295_s2 = sld [smem:[#allocation29_spill]]  ;;  %s2273_s29 = scalar_lea.vmem [#allocation12], %s2125_s26 }
  0x4d   : > { %v557_v1 = vld [vmem:[#allocation6 + $0x78] sm:$0xff]  ;;  %650 = vmatpush.msra.mxu2 %v589_v0  ;;  %v556_v4 = vld [vmem:[#allocation6 + $0x70] sm:$0xff]  ;;  %v587_v6 = vld [vmem:[#allocation6 + $0x168] sm:$0xff]  ;;  %s510_s17 = scalar_lea.vmem [#allocation13], %s2125_s26  ;;  %s517_s3 = scalar_lea.vmem [#allocation15], %s2125_s26 }
  0x4e   : > { %610 = vmatpush.msra.mxu0 %v557_v1  ;;  %v605_v3 = vld [vmem:[#allocation6 + $0x1f8] sm:$0xff]  ;;  %v604_v7 = vld [vmem:[#allocation6 + $0x1f0] sm:$0xff]  ;;  %v555_v8 = vld [vmem:[#allocation6 + $0x68] sm:$0xff]  ;;  %s2160_s27 = sshll.u32 %s2026_s28, 3  ;;  %s2162_s13 = sshll.u32 %s517_s3, 4  ;;  %s1244_s13 = int_to_ptr.vmem [resolvable:$true] %s2162_s13 }
  0x4f   : > { %v573_v5 = vld [vmem:[#allocation6 + $0xf8] sm:$0xff]  ;;  %670 = vmatpush.msra.mxu3 %v605_v3  ;;  %651 = vmatpush.msra.mxu2 %v588_v2  ;;  %v572_v9 = vld [vmem:[#allocation6 + $0xf0] sm:$0xff]  ;;  %v603_v10 = vld [vmem:[#allocation6 + $0x1e8] sm:$0xff]  ;;  %s1192_s5 = sand.u32 1, %s2026_s28   ;;  %s1229_s7 = sshll.u32 %s510_s17, 4  ;;  %s1230_s7 = int_to_ptr.vmem [resolvable:$true] %s1229_s7 }
  0x50   : > { %630 = vmatpush.msra.mxu1 %v573_v5  ;;  %611 = vmatpush.msra.mxu0 %v556_v4  ;;  %v586_v11 = vld [vmem:[#allocation6 + $0x160] sm:$0xff]  ;;  %v571_v13 = vld [vmem:[#allocation6 + $0xe8] sm:$0xff]  ;;  %v585_v16 = vld [vmem:[#allocation6 + $0x158] sm:$0xff]  ;;  %s1213_s25 = scalar_lea.hbm %s2265_s9, %s2160_s27 }
  0x51   : > { %671 = vmatpush.msra.mxu3 %v604_v7  ;;  %v554_v12 = vld [vmem:[#allocation6 + $0x60] sm:$0xff]  ;;  %652 = vmatpush.msra.mxu2 %v587_v6  ;;  %v553_v17 = vld [vmem:[#allocation6 + $0x58] sm:$0xff]  ;;  %v584_v20 = vld [vmem:[#allocation6 + $0x150] sm:$0xff] }
  0x52   : > { %631 = vmatpush.msra.mxu1 %v572_v9  ;;  %612 = vmatpush.msra.mxu0 %v555_v8  ;;  %v602_v14 = vld [vmem:[#allocation6 + $0x1e0] sm:$0xff]  ;;  %v601_v18 = vld [vmem:[#allocation6 + $0x1d8] sm:$0xff]  ;;  %v552_v21 = vld [vmem:[#allocation6 + $0x50] sm:$0xff] }
  0x53   : > { %v570_v15 = vld [vmem:[#allocation6 + $0xe0] sm:$0xff]  ;;  %672 = vmatpush.msra.mxu3 %v603_v10  ;;  %653 = vmatpush.msra.mxu2 %v586_v11  ;;  %v569_v19 = vld [vmem:[#allocation6 + $0xd8] sm:$0xff]  ;;  %v600_v22 = vld [vmem:[#allocation6 + $0x1d0] sm:$0xff] }
  0x54   : > { %632 = vmatpush.msra.mxu1 %v571_v13  ;;  %613 = vmatpush.msra.mxu0 %v554_v12  ;;  %v568_v23 = vld [vmem:[#allocation6 + $0xd0] sm:$0xff]  ;;  %v583_v24 = vld [vmem:[#allocation6 + $0x148] sm:$0xff]  ;;  %v582_v28 = vld [vmem:[#allocation6 + $0x140] sm:$0xff] }
  0x55   : > { %673 = vmatpush.msra.mxu3 %v602_v14  ;;  %654 = vmatpush.msra.mxu2 %v585_v16  ;;  %v551_v25 = vld [vmem:[#allocation6 + $0x48] sm:$0xff]  ;;  %v550_v29 = vld [vmem:[#allocation6 + $0x40] sm:$0xff]  ;;  %v581_v32 = vld [vmem:[#allocation6 + $0x138] sm:$0xff] }
  0x56   : > { %633 = vmatpush.msra.mxu1 %v570_v15  ;;  %614 = vmatpush.msra.mxu0 %v553_v17  ;;  %v599_v26 = vld [vmem:[#allocation6 + $0x1c8] sm:$0xff]  ;;  %v598_v30 = vld [vmem:[#allocation6 + $0x1c0] sm:$0xff]  ;;  %v549_v33 = vld [vmem:[#allocation6 + $0x38] sm:$0xff] }
  0x57   : > { %674 = vmatpush.msra.mxu3 %v601_v18  ;;  %655 = vmatpush.msra.mxu2 %v584_v20  ;;  %v567_v27 = vld [vmem:[#allocation6 + $0xc8] sm:$0xff]  ;;  %v566_v31 = vld [vmem:[#allocation6 + $0xc0] sm:$0xff]  ;;  %v597_v34 = vld [vmem:[#allocation6 + $0x1b8] sm:$0xff] }
  0x58   : > { %634 = vmatpush.msra.mxu1 %v569_v19  ;;  %615 = vmatpush.msra.mxu0 %v552_v21  ;;  %v565_v35 = vld [vmem:[#allocation6 + $0xb8] sm:$0xff]  ;;  %v580_v36 = vld [vmem:[#allocation6 + $0x130] sm:$0xff]  ;;  %v579_v40 = vld [vmem:[#allocation6 + $0x128] sm:$0xff] }
  0x59   : > { %675 = vmatpush.msra.mxu3 %v600_v22  ;;  %656 = vmatpush.msra.mxu2 %v583_v24  ;;  %v548_v37 = vld [vmem:[#allocation6 + $0x30] sm:$0xff]  ;;  %v547_v41 = vld [vmem:[#allocation6 + $0x28] sm:$0xff]  ;;  %v578_v44 = vld [vmem:[#allocation6 + $0x120] sm:$0xff] }
  0x5a   : > { %635 = vmatpush.msra.mxu1 %v568_v23  ;;  %616 = vmatpush.msra.mxu0 %v551_v25  ;;  %v596_v38 = vld [vmem:[#allocation6 + $0x1b0] sm:$0xff]  ;;  %v595_v42 = vld [vmem:[#allocation6 + $0x1a8] sm:$0xff]  ;;  %v546_v45 = vld [vmem:[#allocation6 + $0x20] sm:$0xff] }
  0x5b   : > { %676 = vmatpush.msra.mxu3 %v599_v26  ;;  %657 = vmatpush.msra.mxu2 %v582_v28  ;;  %v564_v39 = vld [vmem:[#allocation6 + $0xb0] sm:$0xff]  ;;  %v563_v43 = vld [vmem:[#allocation6 + $0xa8] sm:$0xff]  ;;  %v594_v47 = vld [vmem:[#allocation6 + $0x1a0] sm:$0xff] }
  0x5c   : > { %636 = vmatpush.msra.mxu1 %v567_v27  ;;  %617 = vmatpush.msra.mxu0 %v550_v29  ;;  %v525_v46 = vld [vmem:[%s448_s16] sm:$0xff]  ;;  %v562_v48 = vld [vmem:[#allocation6 + $0xa0] sm:$0xff]  ;;  %v575_v57 = vld [vmem:[#allocation6 + $0x108] sm:$0xff]  ;;  %s1227_s16 = scalar_lea.hbm %s2266_s10, %s2160_s27 }
  0x5d   : > { %677 = vmatpush.msra.mxu3 %v598_v30  ;;  %658 = vmatpush.msra.mxu2 %v581_v32  ;;  %1605 = vtanh.f32 %v525_v46  ;;  %v577_v49 = vld [vmem:[#allocation6 + $0x118] sm:$0xff]  ;;  %v576_v53 = vld [vmem:[#allocation6 + $0x110] sm:$0xff]  ;;  %v543_v58 = vld [vmem:[#allocation6 + $0x8] sm:$0xff]  ;;  %s1231_s1 = sshll.u32 %s1227_s16, 4  ;;  %s1232_s1 = int_to_ptr.hbm [resolvable:$true] %s1231_s1 }
  0x5e   : > { %637 = vmatpush.msra.mxu1 %v566_v31  ;;  %618 = vmatpush.msra.mxu0 %v549_v33  ;;  %v545_v50 = vld [vmem:[#allocation6 + $0x18] sm:$0xff]  ;;  %v544_v54 = vld [vmem:[#allocation6 + $0x10] sm:$0xff]  ;;  %v574_v59 = vld [vmem:[#allocation6 + $0x100] sm:$0xff]  ;;  %s1777_s0 = sshra.s32 %s1232_s1, 4  ;;  %s1778_s0 = int_to_ptr.hbm [resolvable:$true] %s1777_s0 }
  0x5f   : > { %678 = vmatpush.msra.mxu3 %v597_v34  ;;  %659 = vmatpush.msra.mxu2 %v580_v36  ;;  %v593_v51 = vld [vmem:[#allocation6 + $0x198] sm:$0xff]  ;;  %v592_v55 = vld [vmem:[#allocation6 + $0x190] sm:$0xff]  ;;  %v591_v61 = vld [vmem:[#allocation6 + $0x188] sm:$0xff]  ;;  %p1784_p12 = scmp.lt.s32.totalorder %s1778_s0, %s2266_s10 }
  0x60   : > { %638 = vmatpush.msra.mxu1 %v565_v35  ;;  %619 = vmatpush.msra.mxu0 %v548_v37  ;;  %v561_v52 = vld [vmem:[#allocation6 + $0x98] sm:$0xff]  ;;  %v560_v56 = vld [vmem:[#allocation6 + $0x90] sm:$0xff]  ;;  %v559_v62 = vld [vmem:[#allocation6 + $0x88] sm:$0xff] }
  0x61   : > { %679 = vmatpush.msra.mxu3 %v596_v38  ;;  %660 = vmatpush.msra.mxu2 %v579_v40  ;;  %v542_v0 = vld [vmem:[#allocation6] sm:$0xff]  ;;  %v722_v4 = vld [vmem:[#allocation8 + $0x78] sm:$0xff]  ;;  %v721_v7 = vld [vmem:[#allocation8 + $0x70] sm:$0xff] }
  0x62   : > { %639 = vmatpush.msra.mxu1 %v564_v39  ;;  %620 = vmatpush.msra.mxu0 %v547_v41  ;;  %v590_v1 = vld [vmem:[#allocation6 + $0x180] sm:$0xff]  ;;  %v754_v5 = vld [vmem:[#allocation8 + $0x178] sm:$0xff]  ;;  %v753_v9 = vld [vmem:[#allocation8 + $0x170] sm:$0xff] }
  0x63   : > { %680 = vmatpush.msra.mxu3 %v595_v42  ;;  %661 = vmatpush.msra.mxu2 %v578_v44  ;;  %v1606_v60 = vpop.eup %1605  ;;  %v558_v3 = vld [vmem:[#allocation6 + $0x80] sm:$0xff]  ;;  %v738_v8 = vld [vmem:[#allocation8 + $0xf8] sm:$0xff]  ;;  %v720_v12 = vld [vmem:[#allocation8 + $0x68] sm:$0xff] }
  0x64   : > { %640 = vmatpush.msra.mxu1 %v563_v43  ;;  %621 = vmatpush.msra.mxu0 %v546_v45  ;;  %v528_v63 = vmul.f32 2.0, %v1606_v60  ;;  %v770_v10 = vld [vmem:[#allocation8 + $0x1f8] sm:$0xff]  ;;  %v737_v13 = vld [vmem:[#allocation8 + $0xf0] sm:$0xff]  ;;  %v719_v15 = vld [vmem:[#allocation8 + $0x60] sm:$0xff] }
  0x65   : > { %681 = vmatpush.msra.mxu3 %v594_v47  ;;  %662 = vmatpush.msra.mxu2 %v577_v49  ;;  %v736_v16 = vld [vmem:[#allocation8 + $0xe8] sm:$0xff]  ;;  %v718_v19 = vld [vmem:[#allocation8 + $0x58] sm:$0xff]  ;;  %v735_v20 = vld [vmem:[#allocation8 + $0xe0] sm:$0xff] }
  0x66   : > { %641 = vmatpush.msra.mxu1 %v562_v48  ;;  %622 = vmatpush.msra.mxu0 %v545_v50  ;;  %v529_v2 = vmul.f32 %v1606_v60, %v528_v63  ;;  %v752_v17 = vld [vmem:[#allocation8 + $0x168] sm:$0xff]  ;;  %v717_v22 = vld [vmem:[#allocation8 + $0x50] sm:$0xff]  ;;  %v734_v23 = vld [vmem:[#allocation8 + $0xd8] sm:$0xff] }
  0x67   : > { %682 = vmatpush.msra.mxu3 %v593_v51  ;;  %663 = vmatpush.msra.mxu2 %v576_v53  ;;  %v716_v24 = vld [vmem:[#allocation8 + $0x48] sm:$0xff]  ;;  %v715_v25 = vld [vmem:[#allocation8 + $0x40] sm:$0xff]  ;;  %v714_v26 = vld [vmem:[#allocation8 + $0x38] sm:$0xff] }
  0x68   : > { %642 = vmatpush.msra.mxu1 %v561_v52  ;;  %623 = vmatpush.msra.mxu0 %v544_v54  ;;  %v1483_v6 = vadd.f32 -1.0, %v529_v2  ;;  %v733_v27 = vld [vmem:[#allocation8 + $0xd0] sm:$0xff]  ;;  %v751_v28 = vld [vmem:[#allocation8 + $0x160] sm:$0xff]  ;;  %v732_v31 = vld [vmem:[#allocation8 + $0xc8] sm:$0xff] }
  0x69   : > { %683 = vmatpush.msra.mxu3 %v592_v55  ;;  %664 = vmatpush.msra.mxu2 %v575_v57  ;;  %v769_v29 = vld [vmem:[#allocation8 + $0x1f0] sm:$0xff]  ;;  %v750_v32 = vld [vmem:[#allocation8 + $0x158] sm:$0xff]  ;;  %v768_v33 = vld [vmem:[#allocation8 + $0x1e8] sm:$0xff] }
  0x6a   : > { %643 = vmatpush.msra.mxu1 %v560_v56  ;;  %624 = vmatpush.msra.mxu0 %v543_v58  ;;  %v532_v11 = vmul.f32 %v1483_v6, %v528_v63  ;;  %v713_v30 = vld [vmem:[#allocation8 + $0x30] sm:$0xff]  ;;  %v712_v34 = vld [vmem:[#allocation8 + $0x28] sm:$0xff]  ;;  %v731_v35 = vld [vmem:[#allocation8 + $0xc0] sm:$0xff] }
  0x6b   : > { %684 = vmatpush.msra.mxu3 %v591_v61  ;;  %665 = vmatpush.msra.mxu2 %v574_v59  ;;  %v749_v36 = vld [vmem:[#allocation8 + $0x150] sm:$0xff]  ;;  %v767_v37 = vld [vmem:[#allocation8 + $0x1e0] sm:$0xff]  ;;  %v730_v39 = vld [vmem:[#allocation8 + $0xb8] sm:$0xff] }
  0x6c   : > { %644 = vmatpush.msra.mxu1 %v559_v62  ;;  %625 = vmatpush.msra.mxu0 %v542_v0  ;;  %v533_v14 = vsub.f32 %v532_v11, %v1606_v60  ;;  %v711_v38 = vld [vmem:[#allocation8 + $0x20] sm:$0xff]  ;;  %v748_v40 = vld [vmem:[#allocation8 + $0x148] sm:$0xff]  ;;  %v766_v41 = vld [vmem:[#allocation8 + $0x1d8] sm:$0xff] }
  0x6d   : > { %685 = vmatpush.msra.mxu3 %v590_v1  ;;  %626 = vmatmul.f32.vlgmr.msra.gmra.mxu0 %v1606_v60  ;;  %v710_v42 = vld [vmem:[#allocation8 + $0x18] sm:$0xff]  ;;  %v729_v43 = vld [vmem:[#allocation8 + $0xb0] sm:$0xff]  ;;  %v747_v44 = vld [vmem:[#allocation8 + $0x140] sm:$0xff] }
  0x6e   : > { %645 = vmatpush.msra.mxu1 %v558_v3  ;;  %775 = vmatpush.msrb.mxu0 %v722_v4  ;;  %v535_v18 = vmul.f32 %v533_v14, %v528_v63  ;;  %v765_v45 = vld [vmem:[#allocation8 + $0x1d0] sm:$0xff]  ;;  %v728_v47 = vld [vmem:[#allocation8 + $0xa8] sm:$0xff]  ;;  %v746_v48 = vld [vmem:[#allocation8 + $0x138] sm:$0xff] }
  0x6f   : > { %646 = vmatmul.f32.vlgmr.msra.gmra.mxu1 %v1483_v6  ;;  %815 = vmatpush.msrb.mxu2 %v754_v5  ;;  %v709_v46 = vld [vmem:[#allocation8 + $0x10] sm:$0xff]  ;;  %v764_v49 = vld [vmem:[#allocation8 + $0x1c8] sm:$0xff]  ;;  %v727_v51 = vld [vmem:[#allocation8 + $0xa0] sm:$0xff] }
  0x70   : > { %776 = vmatpush.msrb.mxu0 %v721_v7  ;;  %795 = vmatpush.msrb.mxu1 %v738_v8  ;;  %v536_v21 = vsub.f32 %v535_v18, %v1483_v6  ;;  %v708_v50 = vld [vmem:[#allocation8 + $0x8] sm:$0xff]  ;;  %v745_v52 = vld [vmem:[#allocation8 + $0x130] sm:$0xff]  ;;  %v763_v53 = vld [vmem:[#allocation8 + $0x1c0] sm:$0xff] }
  0x71   : > { %816 = vmatpush.msrb.mxu2 %v753_v9  ;;  %835 = vmatpush.msrb.mxu3 %v770_v10  ;;  %v707_v54 = vld [vmem:[#allocation8] sm:$0xff]  ;;  %v726_v55 = vld [vmem:[#allocation8 + $0x98] sm:$0xff]  ;;  %v744_v56 = vld [vmem:[#allocation8 + $0x128] sm:$0xff] }
  0x72   : > { %777 = vmatpush.msrb.mxu0 %v720_v12  ;;  %796 = vmatpush.msrb.mxu1 %v737_v13  ;;  %v762_v57 = vld [vmem:[#allocation8 + $0x1b8] sm:$0xff]  ;;  %v725_v58 = vld [vmem:[#allocation8 + $0x90] sm:$0xff]  ;;  %v743_v59 = vld [vmem:[#allocation8 + $0x120] sm:$0xff] }
  0x73   : > { %666 = vmatmul.f32.vlgmr.msra.gmra.mxu2 %v533_v14  ;;  %686 = vmatmul.f32.vlgmr.msra.gmra.mxu3 %v536_v21  ;;  %v761_v60 = vld [vmem:[#allocation8 + $0x1b0] sm:$0xff]  ;;  %v724_v61 = vld [vmem:[#allocation8 + $0x88] sm:$0xff]  ;;  %v742_v62 = vld [vmem:[#allocation8 + $0x118] sm:$0xff] }
  0x74   : > { %778 = vmatpush.msrb.mxu0 %v719_v15  ;;  %797 = vmatpush.msrb.mxu1 %v736_v16  ;;  %v760_v63 = vld [vmem:[#allocation8 + $0x1a8] sm:$0xff]  ;;  %v723_v0 = vld [vmem:[#allocation8 + $0x80] sm:$0xff]  ;;  %v741_v1 = vld [vmem:[#allocation8 + $0x110] sm:$0xff] }
  0x75   : > { %817 = vmatpush.msrb.mxu2 %v752_v17  ;;  %836 = vmatpush.msrb.mxu3 %v769_v29  ;;  %v759_v2 = vld [vmem:[#allocation8 + $0x1a0] sm:$0xff]  ;;  %v740_v3 = vld [vmem:[#allocation8 + $0x108] sm:$0xff]  ;;  %v758_v4 = vld [vmem:[#allocation8 + $0x198] sm:$0xff] }
  0x76   : > { %779 = vmatpush.msrb.mxu0 %v718_v19  ;;  %798 = vmatpush.msrb.mxu1 %v735_v20  ;;  %v1601_v5 = vld [vmem:[%s2295_s2] ss:$0 sm:$0xff]  ;;  %v739_v6 = vld [vmem:[#allocation8 + $0x100] sm:$0xff]  ;;  %v756_v9 = vld [vmem:[#allocation8 + $0x188] sm:$0xff] }
  0x77   : > { %818 = vmatpush.msrb.mxu2 %v751_v28  ;;  %837 = vmatpush.msrb.mxu3 %v768_v33  ;;  %v757_v7 = vld [vmem:[#allocation8 + $0x190] sm:$0xff]  ;;  %v755_v11 = vld [vmem:[#allocation8 + $0x180] sm:$0xff]  ;;  %v887_v13 = vld [vmem:[#allocation9 + $0x78] sm:$0xff] }
  0x78   : > { %780 = vmatpush.msrb.mxu0 %v717_v22  ;;  %799 = vmatpush.msrb.mxu1 %v734_v23  ;;  %v885_v28 = vld [vmem:[#allocation9 + $0x68] sm:$0xff]  ;;  %v903_v29 = vld [vmem:[#allocation9 + $0xf8] sm:$0xff]  ;;  %v882_v33 = vld [vmem:[#allocation9 + $0x50] sm:$0xff] }
  0x79   : > { %819 = vmatpush.msrb.mxu2 %v750_v32  ;;  %838 = vmatpush.msrb.mxu3 %v767_v37  ;;  %v902_v32 = vld [vmem:[#allocation9 + $0xf0] sm:$0xff]  ;;  %v900_v37 = vld [vmem:[#allocation9 + $0xe0] sm:$0xff] }
  0x7a   : > { %781 = vmatpush.msrb.mxu0 %v716_v24  ;;  %800 = vmatpush.msrb.mxu1 %v733_v27  ;;  %v886_v27 = vld [vmem:[#allocation9 + $0x70] sm:$0xff] }
  0x7b   : > { %820 = vmatpush.msrb.mxu2 %v749_v36  ;;  %839 = vmatpush.msrb.mxu3 %v766_v41  ;;  %v881_v36 = vld [vmem:[#allocation9 + $0x48] sm:$0xff]  ;;  %v899_v41 = vld [vmem:[#allocation9 + $0xd8] sm:$0xff] }
  0x7c   : > { %782 = vmatpush.msrb.mxu0 %v715_v25  ;;  %801 = vmatpush.msrb.mxu1 %v732_v31  ;;  %v883_v31 = vld [vmem:[#allocation9 + $0x58] sm:$0xff] }
  0x7d   : > { %821 = vmatpush.msrb.mxu2 %v748_v40  ;;  %840 = vmatpush.msrb.mxu3 %v765_v45  ;;  %v880_v40 = vld [vmem:[#allocation9 + $0x40] sm:$0xff]  ;;  %v879_v45 = vld [vmem:[#allocation9 + $0x38] sm:$0xff] }
  0x7e   : > { %783 = vmatpush.msrb.mxu0 %v714_v26  ;;  %802 = vmatpush.msrb.mxu1 %v731_v35  ;;  %v919_v35 = vld [vmem:[#allocation9 + $0x178] sm:$0xff] }
  0x7f   : > { %822 = vmatpush.msrb.mxu2 %v747_v44  ;;  %841 = vmatpush.msrb.mxu3 %v764_v49  ;;  %v934_v44 = vld [vmem:[#allocation9 + $0x1f0] sm:$0xff]  ;;  %v915_v49 = vld [vmem:[#allocation9 + $0x158] sm:$0xff] }
  0x80   : > { %784 = vmatpush.msrb.mxu0 %v713_v30  ;;  %803 = vmatpush.msrb.mxu1 %v730_v39  ;;  %v884_v30 = vld [vmem:[#allocation9 + $0x60] sm:$0xff]  ;;  %v917_v39 = vld [vmem:[#allocation9 + $0x168] sm:$0xff] }
  0x81   : > { %823 = vmatpush.msrb.mxu2 %v746_v48  ;;  %842 = vmatpush.msrb.mxu3 %v763_v53  ;;  %v897_v48 = vld [vmem:[#allocation9 + $0xc8] sm:$0xff]  ;;  %v914_v53 = vld [vmem:[#allocation9 + $0x150] sm:$0xff] }
  0x82   : > { %785 = vmatpush.msrb.mxu0 %v712_v34  ;;  %804 = vmatpush.msrb.mxu1 %v729_v43  ;;  %v901_v34 = vld [vmem:[#allocation9 + $0xe8] sm:$0xff]  ;;  %v916_v43 = vld [vmem:[#allocation9 + $0x160] sm:$0xff] }
  0x83   : > { %824 = vmatpush.msrb.mxu2 %v745_v52  ;;  %843 = vmatpush.msrb.mxu3 %v762_v57  ;;  %v896_v52 = vld [vmem:[#allocation9 + $0xc0] sm:$0xff]  ;;  %v913_v57 = vld [vmem:[#allocation9 + $0x148] sm:$0xff] }
  0x84   : > { %786 = vmatpush.msrb.mxu0 %v711_v38  ;;  %805 = vmatpush.msrb.mxu1 %v728_v47  ;;  %v918_v38 = vld [vmem:[#allocation9 + $0x170] sm:$0xff] }
  0x85   : > { %825 = vmatpush.msrb.mxu2 %v744_v56  ;;  %844 = vmatpush.msrb.mxu3 %v761_v60  ;;  %v878_v47 = vld [vmem:[#allocation9 + $0x30] sm:$0xff]  ;;  %v895_v56 = vld [vmem:[#allocation9 + $0xb8] sm:$0xff] }
  0x86   : > { %787 = vmatpush.msrb.mxu0 %v710_v42  ;;  %806 = vmatpush.msrb.mxu1 %v727_v51  ;;  %v935_v42 = vld [vmem:[#allocation9 + $0x1f8] sm:$0xff]  ;;  %v877_v51 = vld [vmem:[#allocation9 + $0x28] sm:$0xff]  ;;  %v894_v60 = vld [vmem:[#allocation9 + $0xb0] sm:$0xff] }
  0x87   : > { %826 = vmatpush.msrb.mxu2 %v743_v59  ;;  %845 = vmatpush.msrb.mxu3 %v760_v63  ;;  %v875_v59 = vld [vmem:[#allocation9 + $0x18] sm:$0xff]  ;;  %v874_v63 = vld [vmem:[#allocation9 + $0x10] sm:$0xff] }
  0x88   : > { %788 = vmatpush.msrb.mxu0 %v709_v46  ;;  %807 = vmatpush.msrb.mxu1 %v726_v55  ;;  %v898_v46 = vld [vmem:[#allocation9 + $0xd0] sm:$0xff]  ;;  %v876_v55 = vld [vmem:[#allocation9 + $0x20] sm:$0xff] }
  0x89   : > { %827 = vmatpush.msrb.mxu2 %v742_v62  ;;  %846 = vmatpush.msrb.mxu3 %v759_v2  ;;  %v930_v62 = vld [vmem:[#allocation9 + $0x1d0] sm:$0xff]  ;;  %v929_v2 = vld [vmem:[#allocation9 + $0x1c8] sm:$0xff] }
  0x8a   : > { %789 = vmatpush.msrb.mxu0 %v708_v50  ;;  %808 = vmatpush.msrb.mxu1 %v725_v58  ;;  %v933_v50 = vld [vmem:[#allocation9 + $0x1e8] sm:$0xff]  ;;  %v931_v58 = vld [vmem:[#allocation9 + $0x1d8] sm:$0xff] }
  0x8b   : > { %828 = vmatpush.msrb.mxu2 %v741_v1  ;;  %847 = vmatpush.msrb.mxu3 %v758_v4  ;;  %v911_v1 = vld [vmem:[#allocation9 + $0x138] sm:$0xff]  ;;  %v892_v4 = vld [vmem:[#allocation9 + $0xa0] sm:$0xff] }
  0x8c   : > { %790 = vmatpush.msrb.mxu0 %v707_v54  ;;  %809 = vmatpush.msrb.mxu1 %v724_v61  ;;  %v932_v54 = vld [vmem:[#allocation9 + $0x1e0] sm:$0xff] }
  0x8d   : > { %829 = vmatpush.msrb.mxu2 %v740_v3  ;;  %848 = vmatpush.msrb.mxu3 %v757_v7  ;;  %v912_v61 = vld [vmem:[#allocation9 + $0x140] sm:$0xff]  ;;  %v873_v3 = vld [vmem:[#allocation9 + $0x8] sm:$0xff] }
  0x8e   : > { %810 = vmatpush.msrb.mxu1 %v723_v0  ;;  %940 = vmatpush.msra.mxu0 %v887_v13  ;;  %v893_v0 = vld [vmem:[#allocation9 + $0xa8] sm:$0xff]  ;;  %v872_v7 = vld [vmem:[#allocation9] sm:$0xff]  ;;  %v926_v13 = vld [vmem:[#allocation9 + $0x1b0] sm:$0xff] }
  0x8f   : > { %830 = vmatpush.msrb.mxu2 %v739_v6  ;;  %849 = vmatpush.msrb.mxu3 %v756_v9  ;;  %v928_v6 = vld [vmem:[#allocation9 + $0x1c0] sm:$0xff]  ;;  %v909_v9 = vld [vmem:[#allocation9 + $0x128] sm:$0xff] }
  0x90   : > { %941 = vmatpush.msra.mxu0 %v886_v27  ;;  %960 = vmatpush.msra.mxu1 %v903_v29 }
  0x91   : > { %850 = vmatpush.msrb.mxu3 %v755_v11  ;;  %980 = vmatpush.msra.mxu2 %v919_v35  ;;  %v890_v11 = vld [vmem:[#allocation9 + $0x90] sm:$0xff] }
  0x92   : > { %942 = vmatpush.msra.mxu0 %v885_v28  ;;  %961 = vmatpush.msra.mxu1 %v902_v32  ;;  %v1052_v28 = vld [vmem:[#allocation11 + $0x78] sm:$0xff] }
  0x93   : > { %981 = vmatpush.msra.mxu2 %v918_v38  ;;  %1000 = vmatpush.msra.mxu3 %v935_v42 }
  0x94   : > { %943 = vmatpush.msra.mxu0 %v884_v30  ;;  %962 = vmatpush.msra.mxu1 %v901_v34 }
  0x95   : > { %982 = vmatpush.msra.mxu2 %v917_v39  ;;  %1001 = vmatpush.msra.mxu3 %v934_v44  ;;  %v1051_v44 = vld [vmem:[#allocation11 + $0x70] sm:$0xff] }
  0x96   : > { %944 = vmatpush.msra.mxu0 %v883_v31  ;;  %963 = vmatpush.msra.mxu1 %v900_v37 }
  0x97   : > { %983 = vmatpush.msra.mxu2 %v916_v43  ;;  %1002 = vmatpush.msra.mxu3 %v933_v50  ;;  %v1047_v50 = vld [vmem:[#allocation11 + $0x50] sm:$0xff] }
  0x98   : > { %945 = vmatpush.msra.mxu0 %v882_v33  ;;  %964 = vmatpush.msra.mxu1 %v899_v41 }
  0x99   : > { %984 = vmatpush.msra.mxu2 %v915_v49  ;;  %1003 = vmatpush.msra.mxu3 %v932_v54  ;;  %v1067_v49 = vld [vmem:[#allocation11 + $0xf0] sm:$0xff]  ;;  %v1065_v54 = vld [vmem:[#allocation11 + $0xe0] sm:$0xff] }
  0x9a   : > { %946 = vmatpush.msra.mxu0 %v881_v36  ;;  %965 = vmatpush.msra.mxu1 %v898_v46  ;;  %v1068_v46 = vld [vmem:[#allocation11 + $0xf8] sm:$0xff] }
  0x9b   : > { %985 = vmatpush.msra.mxu2 %v914_v53  ;;  %1004 = vmatpush.msra.mxu3 %v931_v58  ;;  %v1046_v53 = vld [vmem:[#allocation11 + $0x48] sm:$0xff]  ;;  %v1064_v58 = vld [vmem:[#allocation11 + $0xd8] sm:$0xff] }
  0x9c   : > { %947 = vmatpush.msra.mxu0 %v880_v40  ;;  %966 = vmatpush.msra.mxu1 %v897_v48  ;;  %v1048_v48 = vld [vmem:[#allocation11 + $0x58] sm:$0xff] }
  0x9d   : > { %986 = vmatpush.msra.mxu2 %v913_v57  ;;  %1005 = vmatpush.msra.mxu3 %v930_v62  ;;  %v1045_v57 = vld [vmem:[#allocation11 + $0x40] sm:$0xff]  ;;  %v1044_v62 = vld [vmem:[#allocation11 + $0x38] sm:$0xff] }
  0x9e   : > { %948 = vmatpush.msra.mxu0 %v879_v45  ;;  %967 = vmatpush.msra.mxu1 %v896_v52  ;;  %v1050_v45 = vld [vmem:[#allocation11 + $0x68] sm:$0xff]  ;;  %v1084_v52 = vld [vmem:[#allocation11 + $0x178] sm:$0xff] }
  0x9f   : > { %987 = vmatpush.msra.mxu2 %v912_v61  ;;  %1006 = vmatpush.msra.mxu3 %v929_v2  ;;  %v1099_v61 = vld [vmem:[#allocation11 + $0x1f0] sm:$0xff]  ;;  %v1080_v2 = vld [vmem:[#allocation11 + $0x158] sm:$0xff] }
  0xa0   : > { %949 = vmatpush.msra.mxu0 %v878_v47  ;;  %968 = vmatpush.msra.mxu1 %v895_v56  ;;  %v1049_v47 = vld [vmem:[#allocation11 + $0x60] sm:$0xff]  ;;  %v1082_v56 = vld [vmem:[#allocation11 + $0x168] sm:$0xff] }
  0xa1   : > { %988 = vmatpush.msra.mxu2 %v911_v1  ;;  %1007 = vmatpush.msra.mxu3 %v928_v6  ;;  %v1062_v1 = vld [vmem:[#allocation11 + $0xc8] sm:$0xff]  ;;  %v1079_v6 = vld [vmem:[#allocation11 + $0x150] sm:$0xff] }
  0xa2   : > { %950 = vmatpush.msra.mxu0 %v877_v51  ;;  %969 = vmatpush.msra.mxu1 %v894_v60  ;;  %v1066_v51 = vld [vmem:[#allocation11 + $0xe8] sm:$0xff]  ;;  %v1081_v60 = vld [vmem:[#allocation11 + $0x160] sm:$0xff] }
  0xa4   : > { %951 = vmatpush.msra.mxu0 %v876_v55  ;;  %970 = vmatpush.msra.mxu1 %v893_v0  ;;  %v1083_v55 = vld [vmem:[#allocation11 + $0x170] sm:$0xff] }
  0xa5   : > { %v1043_v0 = vld [vmem:[#allocation11 + $0x30] sm:$0xff] }
  0xa6   : > { %952 = vmatpush.msra.mxu0 %v875_v59  ;;  %971 = vmatpush.msra.mxu1 %v892_v4  ;;  %v1100_v59 = vld [vmem:[#allocation11 + $0x1f8] sm:$0xff]  ;;  %v1042_v4 = vld [vmem:[#allocation11 + $0x28] sm:$0xff] }
  0xa8   : > { %953 = vmatpush.msra.mxu0 %v874_v63  ;;  %v1063_v63 = vld [vmem:[#allocation11 + $0xd0] sm:$0xff] }
  0xaa   : > { %954 = vmatpush.msra.mxu0 %v873_v3  ;;  %v1098_v3 = vld [vmem:[#allocation11 + $0x1e8] sm:$0xff] }
  0xac   : > { %955 = vmatpush.msra.mxu0 %v872_v7  ;;  %v1097_v7 = vld [vmem:[#allocation11 + $0x1e0] sm:$0xff] }
  0xea   : > { %v627_v8 = vpop.f32.mrf.mxu0 }
  0xeb   : > { %v628_v10 = vadd.f32 %v1601_v5, %v627_v8  ;;  %v910_v5 = vld [vmem:[#allocation9 + $0x130] sm:$0xff]  ;;  %v891_v8 = vld [vmem:[#allocation9 + $0x98] sm:$0xff] }
  0xec   : > { %v647_v12 = vpop.f32.mrf.mxu1  ;;  %989 = vmatpush.msra.mxu2 %v910_v5  ;;  %972 = vmatpush.msra.mxu1 %v891_v8  ;;  %v1061_v5 = vld [vmem:[#allocation11 + $0xc0] sm:$0xff] }
  0xed   : > { %v648_v14 = vadd.f32 %v647_v12, %v628_v10  ;;  %v927_v10 = vld [vmem:[#allocation9 + $0x1b8] sm:$0xff]  ;;  %v908_v12 = vld [vmem:[#allocation9 + $0x120] sm:$0xff] }
  0xee   : > { %990 = vmatpush.msra.mxu2 %v909_v9  ;;  %1008 = vmatpush.msra.mxu3 %v927_v10  ;;  %v1041_v8 = vld [vmem:[#allocation11 + $0x20] sm:$0xff]  ;;  %v1060_v9 = vld [vmem:[#allocation11 + $0xb8] sm:$0xff]  ;;  %v1078_v10 = vld [vmem:[#allocation11 + $0x148] sm:$0xff] }
  0xef   : > { %973 = vmatpush.msra.mxu1 %v890_v11  ;;  %v1096_v11 = vld [vmem:[#allocation11 + $0x1d8] sm:$0xff] }
  0xf0   : > { %991 = vmatpush.msra.mxu2 %v908_v12  ;;  %1009 = vmatpush.msra.mxu3 %v926_v13  ;;  %v1040_v12 = vld [vmem:[#allocation11 + $0x18] sm:$0xff]  ;;  %v1059_v13 = vld [vmem:[#allocation11 + $0xb0] sm:$0xff] }
  0xf6   : > { %v667_v15 = vpop.f32.mrf.mxu2  ;;  %v687_v17 = vpop.f32.mrf.mxu3 }
  0xf7   : > { %v668_v16 = vadd.f32 %v667_v15, %v648_v14  ;;  %v889_v14 = vld [vmem:[#allocation9 + $0x88] sm:$0xff]  ;;  %v907_v15 = vld [vmem:[#allocation9 + $0x118] sm:$0xff] }
  0xf8   : > { %974 = vmatpush.msra.mxu1 %v889_v14  ;;  %992 = vmatpush.msra.mxu2 %v907_v15  ;;  %v1077_v14 = vld [vmem:[#allocation11 + $0x140] sm:$0xff]  ;;  %v1095_v15 = vld [vmem:[#allocation11 + $0x1d0] sm:$0xff] }
  0xf9   : > { %v688_v18 = vadd.f32 %v687_v17, %v668_v16  ;;  %v925_v16 = vld [vmem:[#allocation9 + $0x1a8] sm:$0xff]  ;;  %v888_v17 = vld [vmem:[#allocation9 + $0x80] sm:$0xff] }
  0xfa   : > { %1010 = vmatpush.msra.mxu3 %v925_v16  ;;  %975 = vmatpush.msra.mxu1 %v888_v17  ;;  %v1039_v16 = vld [vmem:[#allocation11 + $0x10] sm:$0xff]  ;;  %v1058_v17 = vld [vmem:[#allocation11 + $0xa8] sm:$0xff] }
  0xfb   : > { %690 = vst [vmem:[%s2273_s29] sm:$0xff] %v688_v18  ;;  %1607 = vtanh.f32 %v688_v18  ;;  %v906_v18 = vld [vmem:[#allocation9 + $0x110] sm:$0xff]  ;;  %s2175_s29 = scalar_lea.sflag [#allocation14], %s1192_s5 }
  0xfc   : > { %993 = vmatpush.msra.mxu2 %v906_v18  ;;  %v1076_v18 = vld [vmem:[#allocation11 + $0x138] sm:$0xff] }
 0x101   : > { %v1608_v19 = vpop.eup %1607 }
 0x102   : > { %791 = vmatmul.f32.vlgmr.msrb.gmra.mxu0 %v1608_v19  ;;  %v693_v20 = vmul.f32 2.0, %v1608_v19 }
 0x103   : > { %1105 = vmatpush.msrb.mxu0 %v1052_v28  ;;  %v1055_v28 = vld [vmem:[#allocation11 + $0x90] sm:$0xff] }
 0x104   : > { %v694_v21 = vmul.f32 %v1608_v19, %v693_v20 }
 0x105   : > { %1106 = vmatpush.msrb.mxu0 %v1051_v44 }
 0x106   : > { %v1484_v22 = vadd.f32 -1.0, %v694_v21  ;;  %v923_v21 = vld [vmem:[#allocation9 + $0x198] sm:$0xff] }
 0x107   : > { %1107 = vmatpush.msrb.mxu0 %v1050_v45 }
 0x108   : > { %811 = vmatmul.f32.vlgmr.msrb.gmra.mxu1 %v1484_v22  ;;  %v697_v23 = vmul.f32 %v1484_v22, %v693_v20 }
 0x109   : > { %1125 = vmatpush.msrb.mxu1 %v1068_v46  ;;  %1108 = vmatpush.msrb.mxu0 %v1049_v47 }
 0x10a   : > { %v698_v24 = vsub.f32 %v697_v23, %v1608_v19  ;;  %v924_v19 = vld [vmem:[#allocation9 + $0x1a0] sm:$0xff]  ;;  %v922_v23 = vld [vmem:[#allocation9 + $0x190] sm:$0xff] }
 0x10b   : > { %1011 = vmatpush.msra.mxu3 %v924_v19  ;;  %1109 = vmatpush.msrb.mxu0 %v1048_v48  ;;  %v1094_v19 = vld [vmem:[#allocation11 + $0x1c8] sm:$0xff] }
 0x10c   : > { %831 = vmatmul.f32.vlgmr.msrb.gmra.mxu2 %v698_v24  ;;  %v700_v25 = vmul.f32 %v698_v24, %v693_v20  ;;  %v905_v20 = vld [vmem:[#allocation9 + $0x108] sm:$0xff]  ;;  %1126 = vmatpush.msrb.mxu1 %v1067_v49 }
 0x10d   : > { %994 = vmatpush.msra.mxu2 %v905_v20  ;;  %1012 = vmatpush.msra.mxu3 %v923_v21  ;;  %v921_v24 = vld [vmem:[#allocation9 + $0x188] sm:$0xff]  ;;  %v1057_v21 = vld [vmem:[#allocation11 + $0xa0] sm:$0xff] }
 0x10e   : > { %v701_v26 = vsub.f32 %v700_v25, %v1484_v22  ;;  %v904_v22 = vld [vmem:[#allocation9 + $0x100] sm:$0xff]  ;;  %1110 = vmatpush.msrb.mxu0 %v1047_v50  ;;  %1127 = vmatpush.msrb.mxu1 %v1066_v51  ;;  %v1038_v20 = vld [vmem:[#allocation11 + $0x8] sm:$0xff] }
 0x10f   : > { %995 = vmatpush.msra.mxu2 %v904_v22  ;;  %1013 = vmatpush.msra.mxu3 %v922_v23  ;;  %v920_v25 = vld [vmem:[#allocation9 + $0x180] sm:$0xff]  ;;  %v1075_v22 = vld [vmem:[#allocation11 + $0x130] sm:$0xff] }
 0x110   : > { %851 = vmatmul.f32.vlgmr.msrb.gmra.mxu3 %v701_v26  ;;  %v1602_v26 = vld [vmem:[%s2260_s4] ss:$0 sm:$0xff]  ;;  %1111 = vmatpush.msrb.mxu0 %v1046_v53  ;;  %v1093_v23 = vld [vmem:[#allocation11 + $0x1c0] sm:$0xff] }
 0x111   : > { %1014 = vmatpush.msra.mxu3 %v921_v24  ;;  %1145 = vmatpush.msrb.mxu2 %v1084_v52  ;;  %v1037_v24 = vld [vmem:[#allocation11] sm:$0xff] }
 0x112   : > { %1128 = vmatpush.msrb.mxu1 %v1065_v54  ;;  %1112 = vmatpush.msrb.mxu0 %v1045_v57 }
 0x113   : > { %1015 = vmatpush.msra.mxu3 %v920_v25  ;;  %1146 = vmatpush.msrb.mxu2 %v1083_v55  ;;  %v1056_v25 = vld [vmem:[#allocation11 + $0x98] sm:$0xff] }
 0x114   : > { %1129 = vmatpush.msrb.mxu1 %v1064_v58  ;;  %1113 = vmatpush.msrb.mxu0 %v1044_v62 }
 0x115   : > { %1147 = vmatpush.msrb.mxu2 %v1082_v56  ;;  %1165 = vmatpush.msrb.mxu3 %v1100_v59 }
 0x116   : > { %1130 = vmatpush.msrb.mxu1 %v1063_v63  ;;  %1114 = vmatpush.msrb.mxu0 %v1043_v0 }
 0x117   : > { %1148 = vmatpush.msrb.mxu2 %v1081_v60  ;;  %1166 = vmatpush.msrb.mxu3 %v1099_v61 }
 0x118   : > { %1131 = vmatpush.msrb.mxu1 %v1062_v1  ;;  %1115 = vmatpush.msrb.mxu0 %v1042_v4 }
 0x119   : > { %1149 = vmatpush.msrb.mxu2 %v1080_v2  ;;  %1167 = vmatpush.msrb.mxu3 %v1098_v3 }
 0x11a   : > { %1132 = vmatpush.msrb.mxu1 %v1061_v5  ;;  %1116 = vmatpush.msrb.mxu0 %v1041_v8 }
 0x11b   : > { %1150 = vmatpush.msrb.mxu2 %v1079_v6  ;;  %1168 = vmatpush.msrb.mxu3 %v1097_v7 }
 0x11c   : > { %1133 = vmatpush.msrb.mxu1 %v1060_v9  ;;  %1117 = vmatpush.msrb.mxu0 %v1040_v12 }
 0x11d   : > { %1151 = vmatpush.msrb.mxu2 %v1078_v10  ;;  %1169 = vmatpush.msrb.mxu3 %v1096_v11 }
 0x11e   : > { %1134 = vmatpush.msrb.mxu1 %v1059_v13  ;;  %1118 = vmatpush.msrb.mxu0 %v1039_v16 }
 0x11f   : > { %1152 = vmatpush.msrb.mxu2 %v1077_v14  ;;  %1170 = vmatpush.msrb.mxu3 %v1095_v15 }
 0x120   : > { %1135 = vmatpush.msrb.mxu1 %v1058_v17  ;;  %1119 = vmatpush.msrb.mxu0 %v1038_v20 }
 0x121   : > { %1153 = vmatpush.msrb.mxu2 %v1076_v18  ;;  %1171 = vmatpush.msrb.mxu3 %v1094_v19 }
 0x122   : > { %1136 = vmatpush.msrb.mxu1 %v1057_v21  ;;  %1120 = vmatpush.msrb.mxu0 %v1037_v24 }
 0x123   : > { %1154 = vmatpush.msrb.mxu2 %v1075_v22  ;;  %1172 = vmatpush.msrb.mxu3 %v1093_v23 }
 0x124   : > { %1137 = vmatpush.msrb.mxu1 %v1056_v25 }
 0x126   : > { %1138 = vmatpush.msrb.mxu1 %v1055_v28 }
 0x17f   : > { %v792_v27 = vpop.f32.mrf.mxu0 }
 0x180   : > { %v793_v30 = vadd.f32 %v1602_v26, %v792_v27  ;;  %v1074_v26 = vld [vmem:[#allocation11 + $0x128] sm:$0xff]  ;;  %v1092_v27 = vld [vmem:[#allocation11 + $0x1b8] sm:$0xff] }
 0x181   : > { %1155 = vmatpush.msrb.mxu2 %v1074_v26  ;;  %1173 = vmatpush.msrb.mxu3 %v1092_v27 }
 0x185   : > { %v812_v29 = vpop.f32.mrf.mxu1 }
 0x186   : > { %v813_v32 = vadd.f32 %v812_v29, %v793_v30  ;;  %v1073_v29 = vld [vmem:[#allocation11 + $0x120] sm:$0xff]  ;;  %v1091_v30 = vld [vmem:[#allocation11 + $0x1b0] sm:$0xff] }
 0x187   : > { %1156 = vmatpush.msrb.mxu2 %v1073_v29  ;;  %1174 = vmatpush.msrb.mxu3 %v1091_v30 }
 0x18f   : > { %v832_v31 = vpop.f32.mrf.mxu2 }
 0x190   : > { %v833_v33 = vadd.f32 %v832_v31, %v813_v32  ;;  %v1054_v31 = vld [vmem:[#allocation11 + $0x88] sm:$0xff]  ;;  %v1072_v32 = vld [vmem:[#allocation11 + $0x118] sm:$0xff] }
 0x191   : > { %1139 = vmatpush.msrb.mxu1 %v1054_v31  ;;  %1157 = vmatpush.msrb.mxu2 %v1072_v32 }
 0x193   : > { %v852_v34 = vpop.f32.mrf.mxu3 }
 0x194   : > { %v853_v35 = vadd.f32 %v852_v34, %v833_v33  ;;  %v1090_v33 = vld [vmem:[#allocation11 + $0x1a8] sm:$0xff]  ;;  %v1053_v34 = vld [vmem:[#allocation11 + $0x80] sm:$0xff] }
 0x195   : > { %1175 = vmatpush.msrb.mxu3 %v1090_v33  ;;  %1140 = vmatpush.msrb.mxu1 %v1053_v34 }
 0x196   : > { %855 = vst [vmem:[%s510_s17] sm:$0xff] %v853_v35  ;;  %1609 = vtanh.f32 %v853_v35  ;;  %v1071_v35 = vld [vmem:[#allocation11 + $0x110] sm:$0xff]  ;;  %s1783_s17 = scalar_lea.hbm %s2266_s10, 16 }
 0x197   : > { %1158 = vmatpush.msrb.mxu2 %v1071_v35 }
 0x19c   : > { %v1610_v36 = vpop.eup %1609 }
 0x19d   : > { %956 = vmatmul.f32.vlgmr.msra.gmra.mxu0 %v1610_v36  ;;  %v858_v37 = vmul.f32 2.0, %v1610_v36 }
 0x19f   : > { %v859_v38 = vmul.f32 %v1610_v36, %v858_v37 }
 0x1a1   : > { %v1485_v39 = vadd.f32 -1.0, %v859_v38  ;;  %v1088_v38 = vld [vmem:[#allocation11 + $0x198] sm:$0xff] }
 0x1a3   : > { %976 = vmatmul.f32.vlgmr.msra.gmra.mxu1 %v1485_v39  ;;  %v862_v40 = vmul.f32 %v1485_v39, %v858_v37 }
 0x1a5   : > { %v863_v41 = vsub.f32 %v862_v40, %v1610_v36  ;;  %v1089_v36 = vld [vmem:[#allocation11 + $0x1a0] sm:$0xff]  ;;  %v1087_v40 = vld [vmem:[#allocation11 + $0x190] sm:$0xff] }
 0x1a6   : > { %1176 = vmatpush.msrb.mxu3 %v1089_v36 }
 0x1a7   : > { %996 = vmatmul.f32.vlgmr.msra.gmra.mxu2 %v863_v41  ;;  %v865_v42 = vmul.f32 %v863_v41, %v858_v37  ;;  %v1070_v37 = vld [vmem:[#allocation11 + $0x108] sm:$0xff] }
 0x1a8   : > { %1159 = vmatpush.msrb.mxu2 %v1070_v37  ;;  %1177 = vmatpush.msrb.mxu3 %v1088_v38  ;;  %v1086_v41 = vld [vmem:[#allocation11 + $0x188] sm:$0xff] }
 0x1a9   : > { %v866_v43 = vsub.f32 %v865_v42, %v1485_v39  ;;  %v1069_v39 = vld [vmem:[#allocation11 + $0x100] sm:$0xff] }
 0x1aa   : > { %1160 = vmatpush.msrb.mxu2 %v1069_v39  ;;  %1178 = vmatpush.msrb.mxu3 %v1087_v40  ;;  %v1085_v42 = vld [vmem:[#allocation11 + $0x180] sm:$0xff] }
 0x1ab   : > { %1016 = vmatmul.f32.vlgmr.msra.gmra.mxu3 %v866_v43  ;;  %v1603_v43 = vld [vmem:[%s2262_s6] ss:$0 sm:$0xff] }
 0x1ac   : > { %1179 = vmatpush.msrb.mxu3 %v1086_v41 }
 0x1ae   : > { %1180 = vmatpush.msrb.mxu3 %v1085_v42 }
 0x21a   : > { %v957_v44 = vpop.f32.mrf.mxu0 }
 0x21b   : > { %v958_v46 = vadd.f32 %v1603_v43, %v957_v44 }
 0x220   : > { %v977_v45 = vpop.f32.mrf.mxu1 }
 0x221   : > { %v978_v48 = vadd.f32 %v977_v45, %v958_v46 }
 0x22a   : > { %v997_v47 = vpop.f32.mrf.mxu2 }
 0x22b   : > { %v998_v49 = vadd.f32 %v997_v47, %v978_v48 }
 0x22e   : > { %v1017_v50 = vpop.f32.mrf.mxu3 }
 0x22f   : > { %v1018_v51 = vadd.f32 %v1017_v50, %v998_v49 }
 0x231   : > { %1020 = vst [vmem:[%s517_s3] sm:$0xff] %v1018_v51  ;;  %1611 = vtanh.f32 %v1018_v51  ;;  %s1779_s3 = scalar_lea.hbm %s1778_s0, 8 }
 0x232   : > { %p1780_p1 = scmp.ne.s32.totalorder %s1778_s0, %s1779_s3  ;;  %p1785_p7 = scmp.lt.s32.totalorder %s1783_s17, %s1779_s3 }
 0x234   : > { %p1781_p3 = pnand %p1780_p1, %p2091_p4  ;;  %p1786_p8 = por %p1785_p7, %p1784_p12 }
 0x236   : > { %p1782_p5 = pneg %p1781_p3 }
 0x237   : > { %v1612_v52 = vpop.eup %1611 }
 0x238   : > { %1121 = vmatmul.f32.vlgmr.msrb.gmra.mxu0 %v1612_v52  ;;  %v1023_v53 = vmul.f32 2.0, %v1612_v52  ;;  %p1787_p9 = pnand %p1786_p8, %p1782_p5 }
 0x23a   : > { %v1024_v54 = vmul.f32 %v1612_v52, %v1023_v53 }
 0x23c   : > { %v1486_v55 = vadd.f32 -1.0, %v1024_v54 }
 0x23e   : > { %1141 = vmatmul.f32.vlgmr.msrb.gmra.mxu1 %v1486_v55  ;;  %v1027_v56 = vmul.f32 %v1486_v55, %v1023_v53 }
 0x240   : > { %v1028_v57 = vsub.f32 %v1027_v56, %v1612_v52 }
 0x242   : > { %1161 = vmatmul.f32.vlgmr.msrb.gmra.mxu2 %v1028_v57  ;;  %v1030_v58 = vmul.f32 %v1028_v57, %v1023_v53 }
 0x244   : > { %v1031_v59 = vsub.f32 %v1030_v58, %v1486_v55 }
 0x246   : > { %1181 = vmatmul.f32.vlgmr.msrb.gmra.mxu3 %v1031_v59 }
 0x247   : > { %1790 = shalt.err (!%p1787_p9)
}
 0x248   : > { %1516 = dma.vmem_to_hbm [thread:$0]  (%p2091_p4), %s1230_s7, 128, %s1232_s1, %s2175_s29  }
 0x249   : > { %s2296_s5 = scalar_lea.vmem [#allocation12], %s2125_s26  ;;  %s1217_s15 = sshll.u32 %s1213_s25, 4  ;;  %s1218_s15 = int_to_ptr.hbm [resolvable:$true] %s1217_s15 }
 0x24a   : > { %s1215_s20 = sshll.u32 %s2296_s5, 4  ;;  %s1188_s19 = scalar_lea.sflag [#allocation5], %s2122_s30  ;;  %s1216_s20 = int_to_ptr.vmem [resolvable:$true] %s1215_s20 }
 0x24b   : > { %s1805_s28 = sshra.s32 %s1218_s15, 4  ;;  %s1811_s23 = scalar_lea.hbm %s2265_s9, 16  ;;  %s1806_s28 = int_to_ptr.hbm [resolvable:$true] %s1805_s28 }
 0x24c   : > { %s1807_s0 = scalar_lea.hbm %s1806_s28, 8  ;;  %p1812_p0 = scmp.lt.s32.totalorder %s1806_s28, %s2265_s9 }
 0x24d   : > { %p1808_p10 = scmp.ne.s32.totalorder %s1806_s28, %s1807_s0  ;;  %p1813_p2 = scmp.lt.s32.totalorder %s1811_s23, %s1807_s0 }
 0x24f   : > { %p1809_p13 = pnand %p1808_p10, %p2091_p4  ;;  %p1814_p1 = por %p1813_p2, %p1812_p0 }
 0x251   : > { %p1810_p11 = pneg %p1809_p13 }
 0x253   : > { %p1815_p3 = pnand %p1814_p1, %p1810_p11 }
 0x255   : > { %1818 = shalt.err (!%p1815_p3)
}
 0x256   : > { %1515 = dma.vmem_to_hbm [thread:$0]  (%p2091_p4), %s1216_s20, 128, %s1218_s15, %s1188_s19  }
 0x257   : > { %s1241_s25 = scalar_lea.hbm %s2267_s11, %s2160_s27  ;;  %s1839_s17 = scalar_lea.hbm %s2267_s11, 16 }
 0x258   : > { %s1245_s5 = sshll.u32 %s1241_s25, 4  ;;  %s1246_s5 = int_to_ptr.hbm [resolvable:$true] %s1245_s5 }
 0x259   : > { %s1833_s3 = sshra.s32 %s1246_s5, 4  ;;  %s1834_s3 = int_to_ptr.hbm [resolvable:$true] %s1833_s3 }
 0x25a   : > { %s1835_s2 = scalar_lea.hbm %s1834_s3, 8  ;;  %p1840_p8 = scmp.lt.s32.totalorder %s1834_s3, %s2267_s11 }
 0x25b   : > { %p1836_p5 = scmp.ne.s32.totalorder %s1834_s3, %s1835_s2  ;;  %p1841_p9 = scmp.lt.s32.totalorder %s1839_s17, %s1835_s2 }
 0x25d   : > { %p1837_p12 = pnand %p1836_p5, %p2091_p4  ;;  %p1842_p10 = por %p1841_p9, %p1840_p8 }
 0x25f   : > { %p1838_p7 = pneg %p1837_p12 }
 0x261   : > { %p1843_p13 = pnand %p1842_p10, %p1838_p7 }
 0x263   : > { %1846 = shalt.err (!%p1843_p13)
}
 0x264   : > { %1517 = dma.vmem_to_hbm [thread:$0]  (%p2091_p4), %s1244_s13, 128, %s1246_s5, %s2175_s29   ;;  %v1604_v60 = vld [vmem:[%s2264_s8] ss:$0 sm:$0xff] }
 0x265   : > { %s1255_s1 = scalar_lea.hbm %s2268_s12, %s2160_s27  ;;  %s524_s25 = scalar_lea.vmem [#allocation16], %s2125_s26 }
 0x266   : > { %s1257_s3 = sshll.u32 %s524_s25, 4  ;;  %s1259_s29 = sshll.u32 %s1255_s1, 4  ;;  %s1258_s3 = int_to_ptr.vmem [resolvable:$true] %s1257_s3  ;;  %s1260_s29 = int_to_ptr.hbm [resolvable:$true] %s1259_s29 }
 0x267   : > { %s1203_s13 = scalar_lea.sflag [#allocation17], %s2122_s30  ;;  %s1861_s5 = sshra.s32 %s1260_s29, 4  ;;  %s1862_s5 = int_to_ptr.hbm [resolvable:$true] %s1861_s5 }
 0x268   : > { %s1863_s2 = scalar_lea.hbm %s1862_s5, 8  ;;  %s1867_s0 = scalar_lea.hbm %s2268_s12, 16 }
 0x269   : > { %p1864_p11 = scmp.ne.s32.totalorder %s1862_s5, %s1863_s2  ;;  %p1868_p1 = scmp.lt.s32.totalorder %s1862_s5, %s2268_s12 }
 0x26a   : > { %p1869_p3 = scmp.lt.s32.totalorder %s1867_s0, %s1863_s2 }
 0x26b   : > { %p1865_p0 = pnand %p1864_p11, %p2091_p4 }
 0x26c   : > { %p1870_p5 = por %p1869_p3, %p1868_p1 }
 0x26d   : > { %p1866_p2 = pneg %p1865_p0 }
 0x26f   : > { %p1871_p12 = pnand %p1870_p5, %p1866_p2 }
 0x2b5   : > { %v1122_v61 = vpop.f32.mrf.mxu0 }
 0x2b6   : > { %v1123_v63 = vadd.f32 %v1604_v60, %v1122_v61 }
 0x2bb   : > { %v1142_v62 = vpop.f32.mrf.mxu1 }
 0x2bc   : > { %v1143_v1 = vadd.f32 %v1142_v62, %v1123_v63 }
 0x2c5   : > { %v1162_v0 = vpop.f32.mrf.mxu2 }
 0x2c6   : > { %v1163_v2 = vadd.f32 %v1162_v0, %v1143_v1 }
 0x2c9   : > { %v1182_v3 = vpop.f32.mrf.mxu3 }
 0x2ca   : > { %v1183_v4 = vadd.f32 %v1182_v3, %v1163_v2 }
 0x2cc   : > { %v1185_v5 = vmax.f32 %v1183_v4, 0.0 }
 0x2ce   : > { %1186 = vst [vmem:[%s524_s25] sm:$0xff] %v1185_v5 }
 0x2cf   : > { %1874 = shalt.err (!%p1871_p12)
}
 0x2d0   : > { %1518 = dma.vmem_to_hbm [thread:$0]  (%p2091_p4), %s1258_s3, 128, %s1260_s29, %s1203_s13  }
 0x2d1 PF: > { %s1271_s30 = sand.u32 1, %s1917_s21   ;;  %p2297_p7 = scmp.ge.s32.totalorder %s1929_s24, 2 }
 0x2d2   : > { %s1272_s23 = scalar_lea.sflag [#allocation5], %s1271_s30 }
 0x2d3   : > { %p1541_p8 = pnand %p2297_p7, %p2095_p6 }
 0x2d5   : > { %p1542_p9 = pneg %p1541_p8 }
 0x2d7   : > { %1904 = dma.done.wait (%p1542_p9), %s1272_s23, 128  }
 0x2d8   : > { %1906 = vsyncadd (%p1542_p9), %s1272_s23, 4294967168  ;;  %s2298_s20 = sadd.s32 4294967294, %s1929_s24  }
 0x2d9   : > { %s1281_s15 = sand.u32 1, %s2298_s20  }
 0x2da   : > { %s1282_s19 = scalar_lea.sflag [#allocation14], %s1281_s15 }
 0x2db   : > { %1908 = dma.done.wait (%p1542_p9), %s1282_s19, 256  }
 0x2dc   : > { %1910 = vsyncadd (%p1542_p9), %s1282_s19, 4294967040  ;;  %s1302_s14 = scalar_lea.sflag [#allocation17], %s1271_s30 }
 0x2dd   : > { %1912 = dma.done.wait (%p1542_p9), %s1302_s14, 128  }
 0x2de   : > { %1914 = vsyncadd (%p1542_p9), %s1302_s14, 4294967168  ;;  %s2299_s24 = sld [smem:[#allocation25_spill]]  ;;  %s2302_s21 = smov %s1921_s22 }
 0x2df   : > { %s2300_s16 = sld [smem:[#allocation24_spill]] }
 0x2e0   : > { %s2301_s23 = sld [smem:[#allocation26_spill]] }
 0x2e4   : > { %p34_p4 = scmp.ge.s32.totalorder %s2299_s24, 4  }
 0x2e5   : > { %s2303_s22 = smov %s2300_s16 }
 0x2e6   :  { %36 = sbr.rel (!%p34_p4) target bundleno = 18 (0x12), region = 166 }
 0x2eb   :  { %1308 = vsyncpa [#allocation4], 1 }
 0x2ec   :  { %1310 = vsyncpa [#allocation4 + $0x1], 1 }
 0x2ed   :  { %1311 = vsyncpa [#allocation7], 1 }
 0x2ee   :  { %1312 = vsyncpa [#allocation10], 1 }
 0x2ef   :  { %1313 = vsyncpa [#allocation5], 1 }
 0x2f0   :  { %1315 = vsyncpa [#allocation5 + $0x1], 1 }
 0x2f1   :  { %1316 = vsyncpa [#allocation14], 1 }
 0x2f2   :  { %1318 = vsyncpa [#allocation14 + $0x1], 1 }
 0x2f3   :  { %1319 = vsyncpa [#allocation17], 1 }
 0x2f4   :  { %1321 = vsyncpa [#allocation17 + $0x1], 1 }

</bundles_post_ra>
